<compile_context>
chip_gen: v7x
topology: tpu7x:2x2x1
jax: 0.10.0
libtpu: 0.0.40
codegen_flags: <defaults>
</compile_context>

<pallas_src>
import math
import jax
import jax.numpy as jnp
from jax.experimental import pallas as pl
from jax.experimental.pallas import tpu as pltpu


# Lane padding for every hidden/feature axis that is stored to HBM or fed to
# the MXU as an output dimension -> unmasked, lane-dense stores.
HP = 128

# Matmul operand dtype for the MXU.  Kept f32 for bit-faithful parity with the
# PyTorch reference; set to jnp.bfloat16 to roughly double MXU throughput at
# the original problem scale (accumulation stays f32 via preferred_element_type).
MM_DTYPE = jnp.float32


# ----------------------------------------------------------------------------
# Fused kernel: per batch tile of subjects, compute
#   reduced = relu(K)^T @ A @ relu(K)          (dim_reduce, both branches)
#   c3      = GCN3(GCN2(GCN1(reduced)))        (3 fused GCN layers, both branches)
# and store the lane-padded embeddings (TB, D, HP) for the p and n branches.
# ----------------------------------------------------------------------------
def _fused_embedding_kernel(a_p_ref, a_n_ref,
                            kp_ref, kpT_ref, kn_ref, knT_ref,
                            eye_ref,
                            g1p_ref, g2p_ref, g3p_ref,
                            g1n_ref, g2n_ref, g3n_ref,
                            p_out_ref, n_out_ref):
    flat_rows, N = a_p_ref.shape          # (TB*N, N) flattened subject tile
    D = kp_ref.shape[1]
    TB = flat_rows // N
    eye = eye_ref[...][None, :, :]        # (1, D, HP) — precomputed on host

    def softplus(x):
        # numerically-stable log(1 + exp(x))
        return jnp.maximum(x, 0.0) + jnp.log(1.0 + jnp.exp(-jnp.abs(x)))

    def gcn_layer(reduced, x, k):
        # Broadcast the shared weight across the subject tile so every matmul
        # is a canonical batched einsum (same pattern as batched attention).
        kb = jnp.broadcast_to(k.astype(MM_DTYPE), (TB,) + k.shape)
        if x is None:
            axw = jnp.einsum('bij,bjh->bih', reduced.astype(MM_DTYPE), kb,
                             preferred_element_type=jnp.float32)
        else:
            xw = jnp.einsum('bih,bhk->bik', x.astype(MM_DTYPE), kb,
                            preferred_element_type=jnp.float32)
            axw = jnp.einsum('bij,bjh->bih', reduced.astype(MM_DTYPE),
                             xw.astype(MM_DTYPE),
                             preferred_element_type=jnp.float32)
        y = jnp.maximum(eye + 0.85 * axw, 0.0)                 # relu(I + c*AXW)
        # torch.mean(dim=-2): mean over the D rows of each subject (per column)
        col_mean = jnp.mean(y, axis=-2, keepdims=True) + 1e-6  # (TB, 1, HP)
        return softplus(y / col_mean)

    def branch(a_ref, k_ref, kT_ref, k1_ref, k2_ref, k3_ref, out_ref):
        kpos = jnp.maximum(k_ref[...], 0.0)                    # relu(K)  (N, D)
        kposT = jnp.maximum(kT_ref[...], 0.0)                  # relu(K)^T (D, N)
        # dim_reduce step 1: ONE flattened matmul for the whole tile
        #   (TB*N, N) @ (N, D)  — batch folded into the MXU M dimension.
        af = jnp.dot(a_ref[...].astype(MM_DTYPE), kpos.astype(MM_DTYPE),
                     preferred_element_type=jnp.float32)       # (TB*N, D)
        af3 = af.reshape(TB, N, D)
        # dim_reduce step 2: reduced[b] = relu(K)^T @ A[b] @ relu(K)
        kTb = jnp.broadcast_to(kposT.astype(MM_DTYPE), (TB, D, N))
        reduced = jnp.einsum('bin,bnj->bij', kTb, af3.astype(MM_DTYPE),
                             preferred_element_type=jnp.float32)  # (TB, D, D)
        c1 = gcn_layer(reduced, None, k1_ref[...])
        c2 = gcn_layer(reduced, c1, k2_ref[...])
        c3 = gcn_layer(reduced, c2, k3_ref[...])
        out_ref[...] = c3                                      # lane-dense (TB, D, 128)

    branch(a_p_ref, kp_ref, kpT_ref, g1p_ref, g2p_ref, g3p_ref, p_out_ref)
    branch(a_n_ref, kn_ref, knT_ref, g1n_ref, g2n_ref, g3n_ref, n_out_ref)


def _pad_cols(w, hp):
    r, c = w.shape
    return jnp.zeros((r, hp), jnp.float32).at[:, :c].set(w)


def _pad_rows_cols(w, hp):
    r, c = w.shape
    return jnp.zeros((hp, hp), jnp.float32).at[:r, :c].set(w)


def fused_embedding(s_p, s_n, kernel_p, kernel_n,
                    g1p, g2p, g3p, g1n, g2n, g3n, *, batch_tile=None):
    """Returns lane-padded (B, D, HP) embeddings for the p and n branches."""
    B, N, _ = s_p.shape
    D = kernel_p.shape[1]
    tb = B if batch_tile is None else batch_tile
    assert B % tb == 0, "batch must be divisible by the batch tile"
    num_tiles = B // tb

    # flatten subjects into the matmul M dimension (free XLA-level reshape)
    a_p = s_p.reshape(B * N, N)
    a_n = s_n.reshape(B * N, N)

    eye_pad = jnp.eye(D, HP, dtype=jnp.float32)                # identity, padded cols = 0
    g1p_p, g1n_p = _pad_cols(g1p, HP), _pad_cols(g1n, HP)
    g2p_p, g3p_p = _pad_rows_cols(g2p, HP), _pad_rows_cols(g3p, HP)
    g2n_p, g3n_p = _pad_rows_cols(g2n, HP), _pad_rows_cols(g3n, HP)

    const2 = lambda i: (0, 0)
    out_shape = jax.ShapeDtypeStruct((B, D, HP), jnp.float32)
    # Megacore-shard only when there is more than one (large) tile of work.
    grid_sem = ("parallel",) if num_tiles > 1 else ("arbitrary",)

    return pl.pallas_call(
        _fused_embedding_kernel,
        out_shape=(out_shape, out_shape),
        grid=(num_tiles,),
        in_specs=[
            pl.BlockSpec((tb * N, N), lambda i: (i, 0)),       # pos adjacencies (flattened)
            pl.BlockSpec((tb * N, N), lambda i: (i, 0)),       # neg adjacencies (flattened)
            pl.BlockSpec((N, D), const2),                      # kernel_p
            pl.BlockSpec((D, N), const2),                      # kernel_p^T
            pl.BlockSpec((N, D), const2),                      # kernel_n
            pl.BlockSpec((D, N), const2),                      # kernel_n^T
            pl.BlockSpec((D, HP), const2),                     # eye (hoisted out of the body)
            pl.BlockSpec((D, HP), const2),                     # gcn1_p (lane-padded)
            pl.BlockSpec((HP, HP), const2),                    # gcn2_p
            pl.BlockSpec((HP, HP), const2),                    # gcn3_p
            pl.BlockSpec((D, HP), const2),                     # gcn1_n
            pl.BlockSpec((HP, HP), const2),                    # gcn2_n
            pl.BlockSpec((HP, HP), const2),                    # gcn3_n
        ],
        out_specs=(pl.BlockSpec((tb, D, HP), lambda i: (i, 0, 0)),
                   pl.BlockSpec((tb, D, HP), lambda i: (i, 0, 0))),
        compiler_params=pltpu.CompilerParams(
            dimension_semantics=grid_sem,
            # explicit limit so larger batch tiles at original scale stay
            # within v7x's 64 MiB physical VMEM (128 MiB on v5e/v6e).
            vmem_limit_bytes=48 * 1024 * 1024),
    )(a_p, a_n, kernel_p, kernel_p.T, kernel_n, kernel_n.T,
      eye_pad, g1p_p, g2p_p, g3p_p, g1n_p, g2n_p, g3n_p)


# ----------------------------------------------------------------------------
# Parameter-only regularizer glue (matches dim_reduce's appended losses)
# ----------------------------------------------------------------------------
def dim_reduce_loss(kernel, ortho_penalty, variance_penalty, neg_penalty):
    kp = jnp.maximum(kernel, 0.0)
    gram = kp.T @ kp
    diag = jnp.diagonal(gram)
    ortho = ortho_penalty * jnp.sum(jnp.square(gram - jnp.diag(diag)))
    var = variance_penalty * jnp.var(diag, ddof=1)      # torch .var() is unbiased
    neg = neg_penalty * jnp.sum(jnp.maximum(1e-6 - kernel, 0.0))
    l1 = 0.05 * jnp.sum(jnp.abs(kp))
    return ortho + var + neg + l1


# ----------------------------------------------------------------------------
# Full forward: one fused Pallas kernel for the per-subject hot path, tiny
# population-GCN / FC tail and losses in plain XLA.
# ----------------------------------------------------------------------------
def my_higcn_forward(params, graph_adj, nodes, nodes_adj, *, batch_tile=None):
    A = graph_adj[nodes]                     # (B, 2, N, N)  (gather in XLA)
    s_p = A[:, 0]                            # per-subject positive adjacencies
    s_n = A[:, 1]                            # per-subject negative adjacencies
    B, N, _ = s_p.shape
    D = params["kernel_p"].shape[1]
    H = params["gcn1_p"].shape[1]
    # The reference GCN adds eye(D) to a (D, H) tensor -> requires in_dim == hidden_dim.
    assert D == H, "in_dim must equal hidden_dim (required by I + c*AXW in the reference)"

    p3_pad, n3_pad = fused_embedding(
        s_p, s_n, params["kernel_p"], params["kernel_n"],
        params["gcn1_p"], params["gcn2_p"], params["gcn3_p"],
        params["gcn1_n"], params["gcn2_n"], params["gcn3_n"],
        batch_tile=batch_tile)

    # drop the zero/softplus(0) padding lanes, then the torch-style interleave
    p3 = p3_pad[..., :H]
    n3 = n3_pad[..., :H]
    conv_concat = jnp.concatenate([p3, n3], axis=-1).reshape(B, 2 * D * H)

    cluster_loss = (dim_reduce_loss(params["kernel_p"], 0.2, 0.3, 0.1)
                    + dim_reduce_loss(params["kernel_n"], 0.2, 0.5, 0.1))

    # TODO(synk): model_gnn.lin1/lin2/softmax are computed in the reference but
    # never used in the returned outputs (only conv_concat is returned) -> skipped.

    # Population DenseGCNConv (+self loops, sym-norm) + fc1 + fc2 — kept in
    # plain XLA per the perf review (four matmuls with M=B, K<=128; a separate
    # pallas_call's dispatch cost would exceed the compute).  The reference
    # applies no nonlinearity between these layers.
    adj = jnp.where(jnp.eye(B, dtype=bool), jnp.float32(1.0), nodes_adj)  # diag = 1
    deg = jnp.sum(adj, axis=-1)
    dis = jax.lax.rsqrt(jnp.maximum(deg, 1.0))            # deg.clamp(min=1) ** -0.5
    adj_norm = dis[:, None] * adj * dis[None, :]
    h = adj_norm @ (conv_concat @ params["w_gcn1"]) + params["b_gcn1"]
    h = h @ params["w_fc1"] + params["b_fc1"]
    out = h @ params["w_fc2"] + params["b_fc2"]           # (B, num_classes)
    return out, cluster_loss


# ----------------------------------------------------------------------------
# Deterministic parameter init (xavier-uniform style); no checkpoint loading.
# ----------------------------------------------------------------------------
def xavier_uniform(key, shape):
    limit = math.sqrt(6.0 / (shape[0] + shape[1]))
    return jax.random.uniform(key, shape, jnp.float32, -limit, limit)


if __name__ == "__main__":
    # small, consistent shapes: in_dim == hidden_dim (required by I + c*AXW)
    IN_DIM = 5
    HIDDEN = 5
    BRAIN_N = 16          # brain_region_num (116 in the original)
    NUM_GRAPHS = 12       # dataset size (871 in the original)
    B = 8                 # number of selected subjects per forward
    NUM_CLASSES = 2
    FEAT = 2 * IN_DIM * HIDDEN            # 50 -> DenseGCNConv in_channels
    GCN1_OUT = 128
    FC1_OUT = 32

    key = jax.random.PRNGKey(0)
    ks = jax.random.split(key, 16)

    params = {
        # model_gnn parameters
        "kernel_p": xavier_uniform(ks[0], (BRAIN_N, IN_DIM)),
        "kernel_n": xavier_uniform(ks[1], (BRAIN_N, IN_DIM)),
        "gcn1_p": xavier_uniform(ks[2], (IN_DIM, HIDDEN)),
        "gcn2_p": xavier_uniform(ks[3], (HIDDEN, HIDDEN)),
        "gcn3_p": xavier_uniform(ks[4], (HIDDEN, HIDDEN)),
        "gcn1_n": xavier_uniform(ks[5], (IN_DIM, HIDDEN)),
        "gcn2_n": xavier_uniform(ks[6], (HIDDEN, HIDDEN)),
        "gcn3_n": xavier_uniform(ks[7], (HIDDEN, HIDDEN)),
        # MyHIgcn parameters (DenseGCNConv + fc1 + fc2); biases stored as (1, out)
        "w_gcn1": xavier_uniform(ks[8], (FEAT, GCN1_OUT)),
        "b_gcn1": jnp.zeros((1, GCN1_OUT), jnp.float32),
        "w_fc1": xavier_uniform(ks[9], (GCN1_OUT, FC1_OUT)),
        "b_fc1": jax.random.uniform(ks[10], (1, FC1_OUT), jnp.float32, -0.05, 0.05),
        "w_fc2": xavier_uniform(ks[11], (FC1_OUT, NUM_CLASSES)),
        "b_fc2": jax.random.uniform(ks[12], (1, NUM_CLASSES), jnp.float32, -0.05, 0.05),
    }

    # Inputs: per-subject (pos, neg) brain-region adjacencies, subject indices,
    # and the population adjacency among the selected subjects.
    graph_adj = jax.random.normal(ks[13], (NUM_GRAPHS, 2, BRAIN_N, BRAIN_N), jnp.float32)
    nodes = jnp.array([0, 2, 4, 5, 7, 8, 10, 11], dtype=jnp.int32)           # (B,)
    nodes_adj = (jax.random.uniform(ks[14], (B, B)) > 0.5).astype(jnp.float32)

    fwd = jax.jit(my_higcn_forward)
    out, cluster_loss = fwd(params, graph_adj, nodes, nodes_adj)
    jax.block_until_ready((out, cluster_loss))

    assert out.shape == (B, NUM_CLASSES)
    assert cluster_loss.shape == ()
    print("KERNEL_OK")
</pallas_src>

<mosaic_0001>
module attributes {stable_mosaic.version = 11 : i64} {
  func.func @_fused_embedding_kernel(%arg0: i32, %arg1: memref<128x16xf32, #tpu.memory_space<vmem>>, %arg2: memref<128x16xf32, #tpu.memory_space<vmem>>, %arg3: memref<16x5xf32, #tpu.memory_space<vmem>>, %arg4: memref<5x16xf32, #tpu.memory_space<vmem>>, %arg5: memref<16x5xf32, #tpu.memory_space<vmem>>, %arg6: memref<5x16xf32, #tpu.memory_space<vmem>>, %arg7: memref<5x128xf32, #tpu.memory_space<vmem>>, %arg8: memref<5x128xf32, #tpu.memory_space<vmem>>, %arg9: memref<128x128xf32, #tpu.memory_space<vmem>>, %arg10: memref<128x128xf32, #tpu.memory_space<vmem>>, %arg11: memref<5x128xf32, #tpu.memory_space<vmem>>, %arg12: memref<128x128xf32, #tpu.memory_space<vmem>>, %arg13: memref<128x128xf32, #tpu.memory_space<vmem>>, %arg14: memref<8x5x128xf32, #tpu.memory_space<vmem>>, %arg15: memref<8x5x128xf32, #tpu.memory_space<vmem>>) attributes {dimension_semantics = [#tpu.dimension_semantics<arbitrary>], iteration_bounds = array<i64: 1>, scalar_prefetch = 0 : i64, scratch_operands = 0 : i64, tpu.core_type = #tpu.core_type<tc>, window_params = [{transform_indices = @transform_0, window_bounds = array<i64: 128, 16>}, {transform_indices = @transform_1, window_bounds = array<i64: 128, 16>}, {pipeline_mode = #tpu.pipeline_mode<synchronous>, transform_indices = @transform_2, window_bounds = array<i64: 16, 5>}, {pipeline_mode = #tpu.pipeline_mode<synchronous>, transform_indices = @transform_3, window_bounds = array<i64: 5, 16>}, {pipeline_mode = #tpu.pipeline_mode<synchronous>, transform_indices = @transform_4, window_bounds = array<i64: 16, 5>}, {pipeline_mode = #tpu.pipeline_mode<synchronous>, transform_indices = @transform_5, window_bounds = array<i64: 5, 16>}, {pipeline_mode = #tpu.pipeline_mode<synchronous>, transform_indices = @transform_6, window_bounds = array<i64: 5, 128>}, {pipeline_mode = #tpu.pipeline_mode<synchronous>, transform_indices = @transform_7, window_bounds = array<i64: 5, 128>}, {pipeline_mode = #tpu.pipeline_mode<synchronous>, transform_indices = @transform_8, window_bounds = array<i64: 128, 128>}, {pipeline_mode = #tpu.pipeline_mode<synchronous>, transform_indices = @transform_9, window_bounds = array<i64: 128, 128>}, {pipeline_mode = #tpu.pipeline_mode<synchronous>, transform_indices = @transform_10, window_bounds = array<i64: 5, 128>}, {pipeline_mode = #tpu.pipeline_mode<synchronous>, transform_indices = @transform_11, window_bounds = array<i64: 128, 128>}, {pipeline_mode = #tpu.pipeline_mode<synchronous>, transform_indices = @transform_12, window_bounds = array<i64: 128, 128>}, {transform_indices = @transform_13, window_bounds = array<i64: 8, 5, 128>}, {transform_indices = @transform_14, window_bounds = array<i64: 8, 5, 128>}]} {
    %c0 = arith.constant 0 : index
    %c0_0 = arith.constant 0 : index
    %0 = vector.load %arg7[%c0, %c0_0] : memref<5x128xf32, #tpu.memory_space<vmem>>, vector<5x128xf32>
    %1 = vector.shape_cast %0 : vector<5x128xf32> to vector<1x5x128xf32>
    %c0_1 = arith.constant 0 : index
    %c0_2 = arith.constant 0 : index
    %2 = vector.load %arg3[%c0_1, %c0_2] : memref<16x5xf32, #tpu.memory_space<vmem>>, vector<16x5xf32>
    %cst = arith.constant 0.000000e+00 : f32
    %3 = vector.broadcast %cst : f32 to vector<16x5xf32>
    %4 = arith.maximumf %2, %3 : vector<16x5xf32>
    %c0_3 = arith.constant 0 : index
    %c0_4 = arith.constant 0 : index
    %5 = vector.load %arg4[%c0_3, %c0_4] : memref<5x16xf32, #tpu.memory_space<vmem>>, vector<5x16xf32>
    %cst_5 = arith.constant 0.000000e+00 : f32
    %6 = vector.broadcast %cst_5 : f32 to vector<5x16xf32>
    %7 = arith.maximumf %5, %6 : vector<5x16xf32>
    %c0_6 = arith.constant 0 : index
    %c0_7 = arith.constant 0 : index
    %8 = vector.load %arg1[%c0_6, %c0_7] : memref<128x16xf32, #tpu.memory_space<vmem>>, vector<128x16xf32>
    %cst_8 = arith.constant dense<0.000000e+00> : vector<128x5xf32>
    %9 = tpu.matmul %8, %4, %cst_8 {dimension_numbers = #tpu.dot_dimension_numbers<[1], [0], [0], [1], [0, 0, 1, 1], [], []>} : vector<128x16xf32>, vector<16x5xf32>, vector<128x5xf32> -> vector<128x5xf32>
    %10 = vector.shape_cast %9 : vector<128x5xf32> to vector<8x16x5xf32>
    %11 = vector.shape_cast %7 : vector<5x16xf32> to vector<1x5x16xf32>
    %12 = vector.broadcast %11 : vector<1x5x16xf32> to vector<8x5x16xf32>
    "tpu.trace_start"() <{level = 10 : i32, message = "bin,bnj->bij"}> : () -> ()
    %cst_9 = arith.constant dense<0.000000e+00> : vector<8x5x5xf32>
    %13 = tpu.matmul %12, %10, %cst_9 {dimension_numbers = #tpu.dot_dimension_numbers<[2], [1], [1], [2], [0, 0, 0, 1, 1, 2], [0], [0]>} : vector<8x5x16xf32>, vector<8x16x5xf32>, vector<8x5x5xf32> -> vector<8x5x5xf32>
    "tpu.trace_stop"() : () -> ()
    %c0_10 = arith.constant 0 : index
    %c0_11 = arith.constant 0 : index
    %14 = vector.load %arg8[%c0_10, %c0_11] : memref<5x128xf32, #tpu.memory_space<vmem>>, vector<5x128xf32>
    %15 = vector.shape_cast %14 : vector<5x128xf32> to vector<1x5x128xf32>
    %16 = vector.broadcast %15 : vector<1x5x128xf32> to vector<8x5x128xf32>
    "tpu.trace_start"() <{level = 10 : i32, message = "bij,bjh->bih"}> : () -> ()
    %cst_12 = arith.constant dense<0.000000e+00> : vector<8x5x128xf32>
    %17 = tpu.matmul %13, %16, %cst_12 {dimension_numbers = #tpu.dot_dimension_numbers<[2], [1], [1], [2], [0, 0, 0, 1, 1, 2], [0], [0]>} : vector<8x5x5xf32>, vector<8x5x128xf32>, vector<8x5x128xf32> -> vector<8x5x128xf32>
    "tpu.trace_stop"() : () -> ()
    %cst_13 = arith.constant 8.500000e-01 : f32
    %18 = vector.broadcast %cst_13 : f32 to vector<8x5x128xf32>
    %19 = arith.mulf %18, %17 : vector<8x5x128xf32>
    %20 = vector.broadcast %1 : vector<1x5x128xf32> to vector<8x5x128xf32>
    %21 = arith.addf %20, %19 : vector<8x5x128xf32>
    %cst_14 = arith.constant 0.000000e+00 : f32
    %22 = vector.broadcast %cst_14 : f32 to vector<8x5x128xf32>
    %23 = arith.maximumf %21, %22 : vector<8x5x128xf32>
    %cst_15 = arith.constant dense<0.000000e+00> : vector<8x128xf32>
    %24 = vector.multi_reduction <add>, %23, %cst_15 [1] : vector<8x5x128xf32> to vector<8x128xf32>
    %25 = vector.shape_cast %24 : vector<8x128xf32> to vector<8x1x128xf32>
    %cst_16 = arith.constant 5.000000e+00 : f32
    %26 = vector.broadcast %cst_16 : f32 to vector<8x1x128xf32>
    %27 = arith.divf %25, %26 : vector<8x1x128xf32>
    %cst_17 = arith.constant 9.99999997E-7 : f32
    %28 = vector.broadcast %cst_17 : f32 to vector<8x1x128xf32>
    %29 = arith.addf %27, %28 : vector<8x1x128xf32>
    %30 = vector.broadcast %29 : vector<8x1x128xf32> to vector<8x5x128xf32>
    %31 = arith.divf %23, %30 : vector<8x5x128xf32>
    %cst_18 = arith.constant 0.000000e+00 : f32
    %32 = vector.broadcast %cst_18 : f32 to vector<8x5x128xf32>
    %33 = arith.maximumf %31, %32 : vector<8x5x128xf32>
    %34 = math.absf %31 : vector<8x5x128xf32>
    %cst_19 = arith.constant 0.000000e+00 : f32
    %35 = vector.broadcast %cst_19 : f32 to vector<8x5x128xf32>
    %36 = arith.subf %35, %34 : vector<8x5x128xf32>
    %37 = math.exp %36 : vector<8x5x128xf32>
    %cst_20 = arith.constant 1.000000e+00 : f32
    %38 = vector.broadcast %cst_20 : f32 to vector<8x5x128xf32>
    %39 = arith.addf %38, %37 : vector<8x5x128xf32>
    %40 = math.log %39 : vector<8x5x128xf32>
    %41 = arith.addf %33, %40 : vector<8x5x128xf32>
    %c0_21 = arith.constant 0 : index
    %c0_22 = arith.constant 0 : index
    %42 = vector.load %arg9[%c0_21, %c0_22] : memref<128x128xf32, #tpu.memory_space<vmem>>, vector<128x128xf32>
    %43 = vector.shape_cast %42 : vector<128x128xf32> to vector<1x128x128xf32>
    %44 = vector.broadcast %43 : vector<1x128x128xf32> to vector<8x128x128xf32>
    "tpu.trace_start"() <{level = 10 : i32, message = "bih,bhk->bik"}> : () -> ()
    %cst_23 = arith.constant dense<0.000000e+00> : vector<8x5x128xf32>
    %45 = tpu.matmul %41, %44, %cst_23 {dimension_numbers = #tpu.dot_dimension_numbers<[2], [1], [1], [2], [0, 0, 0, 1, 1, 2], [0], [0]>} : vector<8x5x128xf32>, vector<8x128x128xf32>, vector<8x5x128xf32> -> vector<8x5x128xf32>
    "tpu.trace_stop"() : () -> ()
    "tpu.trace_start"() <{level = 10 : i32, message = "bij,bjh->bih"}> : () -> ()
    %cst_24 = arith.constant dense<0.000000e+00> : vector<8x5x128xf32>
    %46 = tpu.matmul %13, %45, %cst_24 {dimension_numbers = #tpu.dot_dimension_numbers<[2], [1], [1], [2], [0, 0, 0, 1, 1, 2], [0], [0]>} : vector<8x5x5xf32>, vector<8x5x128xf32>, vector<8x5x128xf32> -> vector<8x5x128xf32>
    "tpu.trace_stop"() : () -> ()
    %cst_25 = arith.constant 8.500000e-01 : f32
    %47 = vector.broadcast %cst_25 : f32 to vector<8x5x128xf32>
    %48 = arith.mulf %47, %46 : vector<8x5x128xf32>
    %49 = vector.broadcast %1 : vector<1x5x128xf32> to vector<8x5x128xf32>
    %50 = arith.addf %49, %48 : vector<8x5x128xf32>
    %cst_26 = arith.constant 0.000000e+00 : f32
    %51 = vector.broadcast %cst_26 : f32 to vector<8x5x128xf32>
    %52 = arith.maximumf %50, %51 : vector<8x5x128xf32>
    %cst_27 = arith.constant dense<0.000000e+00> : vector<8x128xf32>
    %53 = vector.multi_reduction <add>, %52, %cst_27 [1] : vector<8x5x128xf32> to vector<8x128xf32>
    %54 = vector.shape_cast %53 : vector<8x128xf32> to vector<8x1x128xf32>
    %cst_28 = arith.constant 5.000000e+00 : f32
    %55 = vector.broadcast %cst_28 : f32 to vector<8x1x128xf32>
    %56 = arith.divf %54, %55 : vector<8x1x128xf32>
    %cst_29 = arith.constant 9.99999997E-7 : f32
    %57 = vector.broadcast %cst_29 : f32 to vector<8x1x128xf32>
    %58 = arith.addf %56, %57 : vector<8x1x128xf32>
    %59 = vector.broadcast %58 : vector<8x1x128xf32> to vector<8x5x128xf32>
    %60 = arith.divf %52, %59 : vector<8x5x128xf32>
    %cst_30 = arith.constant 0.000000e+00 : f32
    %61 = vector.broadcast %cst_30 : f32 to vector<8x5x128xf32>
    %62 = arith.maximumf %60, %61 : vector<8x5x128xf32>
    %63 = math.absf %60 : vector<8x5x128xf32>
    %cst_31 = arith.constant 0.000000e+00 : f32
    %64 = vector.broadcast %cst_31 : f32 to vector<8x5x128xf32>
    %65 = arith.subf %64, %63 : vector<8x5x128xf32>
    %66 = math.exp %65 : vector<8x5x128xf32>
    %cst_32 = arith.constant 1.000000e+00 : f32
    %67 = vector.broadcast %cst_32 : f32 to vector<8x5x128xf32>
    %68 = arith.addf %67, %66 : vector<8x5x128xf32>
    %69 = math.log %68 : vector<8x5x128xf32>
    %70 = arith.addf %62, %69 : vector<8x5x128xf32>
    %c0_33 = arith.constant 0 : index
    %c0_34 = arith.constant 0 : index
    %71 = vector.load %arg10[%c0_33, %c0_34] : memref<128x128xf32, #tpu.memory_space<vmem>>, vector<128x128xf32>
    %72 = vector.shape_cast %71 : vector<128x128xf32> to vector<1x128x128xf32>
    %73 = vector.broadcast %72 : vector<1x128x128xf32> to vector<8x128x128xf32>
    "tpu.trace_start"() <{level = 10 : i32, message = "bih,bhk->bik"}> : () -> ()
    %cst_35 = arith.constant dense<0.000000e+00> : vector<8x5x128xf32>
    %74 = tpu.matmul %70, %73, %cst_35 {dimension_numbers = #tpu.dot_dimension_numbers<[2], [1], [1], [2], [0, 0, 0, 1, 1, 2], [0], [0]>} : vector<8x5x128xf32>, vector<8x128x128xf32>, vector<8x5x128xf32> -> vector<8x5x128xf32>
    "tpu.trace_stop"() : () -> ()
    "tpu.trace_start"() <{level = 10 : i32, message = "bij,bjh->bih"}> : () -> ()
    %cst_36 = arith.constant dense<0.000000e+00> : vector<8x5x128xf32>
    %75 = tpu.matmul %13, %74, %cst_36 {dimension_numbers = #tpu.dot_dimension_numbers<[2], [1], [1], [2], [0, 0, 0, 1, 1, 2], [0], [0]>} : vector<8x5x5xf32>, vector<8x5x128xf32>, vector<8x5x128xf32> -> vector<8x5x128xf32>
    "tpu.trace_stop"() : () -> ()
    %cst_37 = arith.constant 8.500000e-01 : f32
    %76 = vector.broadcast %cst_37 : f32 to vector<8x5x128xf32>
    %77 = arith.mulf %76, %75 : vector<8x5x128xf32>
    %78 = vector.broadcast %1 : vector<1x5x128xf32> to vector<8x5x128xf32>
    %79 = arith.addf %78, %77 : vector<8x5x128xf32>
    %cst_38 = arith.constant 0.000000e+00 : f32
    %80 = vector.broadcast %cst_38 : f32 to vector<8x5x128xf32>
    %81 = arith.maximumf %79, %80 : vector<8x5x128xf32>
    %cst_39 = arith.constant dense<0.000000e+00> : vector<8x128xf32>
    %82 = vector.multi_reduction <add>, %81, %cst_39 [1] : vector<8x5x128xf32> to vector<8x128xf32>
    %83 = vector.shape_cast %82 : vector<8x128xf32> to vector<8x1x128xf32>
    %cst_40 = arith.constant 5.000000e+00 : f32
    %84 = vector.broadcast %cst_40 : f32 to vector<8x1x128xf32>
    %85 = arith.divf %83, %84 : vector<8x1x128xf32>
    %cst_41 = arith.constant 9.99999997E-7 : f32
    %86 = vector.broadcast %cst_41 : f32 to vector<8x1x128xf32>
    %87 = arith.addf %85, %86 : vector<8x1x128xf32>
    %88 = vector.broadcast %87 : vector<8x1x128xf32> to vector<8x5x128xf32>
    %89 = arith.divf %81, %88 : vector<8x5x128xf32>
    %cst_42 = arith.constant 0.000000e+00 : f32
    %90 = vector.broadcast %cst_42 : f32 to vector<8x5x128xf32>
    %91 = arith.maximumf %89, %90 : vector<8x5x128xf32>
    %92 = math.absf %89 : vector<8x5x128xf32>
    %cst_43 = arith.constant 0.000000e+00 : f32
    %93 = vector.broadcast %cst_43 : f32 to vector<8x5x128xf32>
    %94 = arith.subf %93, %92 : vector<8x5x128xf32>
    %95 = math.exp %94 : vector<8x5x128xf32>
    %cst_44 = arith.constant 1.000000e+00 : f32
    %96 = vector.broadcast %cst_44 : f32 to vector<8x5x128xf32>
    %97 = arith.addf %96, %95 : vector<8x5x128xf32>
    %98 = math.log %97 : vector<8x5x128xf32>
    %99 = arith.addf %91, %98 : vector<8x5x128xf32>
    %c0_45 = arith.constant 0 : index
    %c0_46 = arith.constant 0 : index
    %c0_47 = arith.constant 0 : index
    %100 = vector.load %arg14[%c0_45, %c0_46, %c0_47] : memref<8x5x128xf32, #tpu.memory_space<vmem>>, vector<8x5x128xf32>
    tpu.vector_store %arg14[%c0_45, %c0_46, %c0_47], %99 {strides = array<i32>} : memref<8x5x128xf32, #tpu.memory_space<vmem>>, vector<8x5x128xf32>,
    %c0_48 = arith.constant 0 : index
    %c0_49 = arith.constant 0 : index
    %101 = vector.load %arg5[%c0_48, %c0_49] : memref<16x5xf32, #tpu.memory_space<vmem>>, vector<16x5xf32>
    %cst_50 = arith.constant 0.000000e+00 : f32
    %102 = vector.broadcast %cst_50 : f32 to vector<16x5xf32>
    %103 = arith.maximumf %101, %102 : vector<16x5xf32>
    %c0_51 = arith.constant 0 : index
    %c0_52 = arith.constant 0 : index
    %104 = vector.load %arg6[%c0_51, %c0_52] : memref<5x16xf32, #tpu.memory_space<vmem>>, vector<5x16xf32>
    %cst_53 = arith.constant 0.000000e+00 : f32
    %105 = vector.broadcast %cst_53 : f32 to vector<5x16xf32>
    %106 = arith.maximumf %104, %105 : vector<5x16xf32>
    %c0_54 = arith.constant 0 : index
    %c0_55 = arith.constant 0 : index
    %107 = vector.load %arg2[%c0_54, %c0_55] : memref<128x16xf32, #tpu.memory_space<vmem>>, vector<128x16xf32>
    %cst_56 = arith.constant dense<0.000000e+00> : vector<128x5xf32>
    %108 = tpu.matmul %107, %103, %cst_56 {dimension_numbers = #tpu.dot_dimension_numbers<[1], [0], [0], [1], [0, 0, 1, 1], [], []>} : vector<128x16xf32>, vector<16x5xf32>, vector<128x5xf32> -> vector<128x5xf32>
    %109 = vector.shape_cast %108 : vector<128x5xf32> to vector<8x16x5xf32>
    %110 = vector.shape_cast %106 : vector<5x16xf32> to vector<1x5x16xf32>
    %111 = vector.broadcast %110 : vector<1x5x16xf32> to vector<8x5x16xf32>
    "tpu.trace_start"() <{level = 10 : i32, message = "bin,bnj->bij"}> : () -> ()
    %cst_57 = arith.constant dense<0.000000e+00> : vector<8x5x5xf32>
    %112 = tpu.matmul %111, %109, %cst_57 {dimension_numbers = #tpu.dot_dimension_numbers<[2], [1], [1], [2], [0, 0, 0, 1, 1, 2], [0], [0]>} : vector<8x5x16xf32>, vector<8x16x5xf32>, vector<8x5x5xf32> -> vector<8x5x5xf32>
    "tpu.trace_stop"() : () -> ()
    %c0_58 = arith.constant 0 : index
    %c0_59 = arith.constant 0 : index
    %113 = vector.load %arg11[%c0_58, %c0_59] : memref<5x128xf32, #tpu.memory_space<vmem>>, vector<5x128xf32>
    %114 = vector.shape_cast %113 : vector<5x128xf32> to vector<1x5x128xf32>
    %115 = vector.broadcast %114 : vector<1x5x128xf32> to vector<8x5x128xf32>
    "tpu.trace_start"() <{level = 10 : i32, message = "bij,bjh->bih"}> : () -> ()
    %cst_60 = arith.constant dense<0.000000e+00> : vector<8x5x128xf32>
    %116 = tpu.matmul %112, %115, %cst_60 {dimension_numbers = #tpu.dot_dimension_numbers<[2], [1], [1], [2], [0, 0, 0, 1, 1, 2], [0], [0]>} : vector<8x5x5xf32>, vector<8x5x128xf32>, vector<8x5x128xf32> -> vector<8x5x128xf32>
    "tpu.trace_stop"() : () -> ()
    %cst_61 = arith.constant 8.500000e-01 : f32
    %117 = vector.broadcast %cst_61 : f32 to vector<8x5x128xf32>
    %118 = arith.mulf %117, %116 : vector<8x5x128xf32>
    %119 = vector.broadcast %1 : vector<1x5x128xf32> to vector<8x5x128xf32>
    %120 = arith.addf %119, %118 : vector<8x5x128xf32>
    %cst_62 = arith.constant 0.000000e+00 : f32
    %121 = vector.broadcast %cst_62 : f32 to vector<8x5x128xf32>
    %122 = arith.maximumf %120, %121 : vector<8x5x128xf32>
    %cst_63 = arith.constant dense<0.000000e+00> : vector<8x128xf32>
    %123 = vector.multi_reduction <add>, %122, %cst_63 [1] : vector<8x5x128xf32> to vector<8x128xf32>
    %124 = vector.shape_cast %123 : vector<8x128xf32> to vector<8x1x128xf32>
    %cst_64 = arith.constant 5.000000e+00 : f32
    %125 = vector.broadcast %cst_64 : f32 to vector<8x1x128xf32>
    %126 = arith.divf %124, %125 : vector<8x1x128xf32>
    %cst_65 = arith.constant 9.99999997E-7 : f32
    %127 = vector.broadcast %cst_65 : f32 to vector<8x1x128xf32>
    %128 = arith.addf %126, %127 : vector<8x1x128xf32>
    %129 = vector.broadcast %128 : vector<8x1x128xf32> to vector<8x5x128xf32>
    %130 = arith.divf %122, %129 : vector<8x5x128xf32>
    %cst_66 = arith.constant 0.000000e+00 : f32
    %131 = vector.broadcast %cst_66 : f32 to vector<8x5x128xf32>
    %132 = arith.maximumf %130, %131 : vector<8x5x128xf32>
    %133 = math.absf %130 : vector<8x5x128xf32>
    %cst_67 = arith.constant 0.000000e+00 : f32
    %134 = vector.broadcast %cst_67 : f32 to vector<8x5x128xf32>
    %135 = arith.subf %134, %133 : vector<8x5x128xf32>
    %136 = math.exp %135 : vector<8x5x128xf32>
    %cst_68 = arith.constant 1.000000e+00 : f32
    %137 = vector.broadcast %cst_68 : f32 to vector<8x5x128xf32>
    %138 = arith.addf %137, %136 : vector<8x5x128xf32>
    %139 = math.log %138 : vector<8x5x128xf32>
    %140 = arith.addf %132, %139 : vector<8x5x128xf32>
    %c0_69 = arith.constant 0 : index
    %c0_70 = arith.constant 0 : index
    %141 = vector.load %arg12[%c0_69, %c0_70] : memref<128x128xf32, #tpu.memory_space<vmem>>, vector<128x128xf32>
    %142 = vector.shape_cast %141 : vector<128x128xf32> to vector<1x128x128xf32>
    %143 = vector.broadcast %142 : vector<1x128x128xf32> to vector<8x128x128xf32>
    "tpu.trace_start"() <{level = 10 : i32, message = "bih,bhk->bik"}> : () -> ()
    %cst_71 = arith.constant dense<0.000000e+00> : vector<8x5x128xf32>
    %144 = tpu.matmul %140, %143, %cst_71 {dimension_numbers = #tpu.dot_dimension_numbers<[2], [1], [1], [2], [0, 0, 0, 1, 1, 2], [0], [0]>} : vector<8x5x128xf32>, vector<8x128x128xf32>, vector<8x5x128xf32> -> vector<8x5x128xf32>
    "tpu.trace_stop"() : () -> ()
    "tpu.trace_start"() <{level = 10 : i32, message = "bij,bjh->bih"}> : () -> ()
    %cst_72 = arith.constant dense<0.000000e+00> : vector<8x5x128xf32>
    %145 = tpu.matmul %112, %144, %cst_72 {dimension_numbers = #tpu.dot_dimension_numbers<[2], [1], [1], [2], [0, 0, 0, 1, 1, 2], [0], [0]>} : vector<8x5x5xf32>, vector<8x5x128xf32>, vector<8x5x128xf32> -> vector<8x5x128xf32>
    "tpu.trace_stop"() : () -> ()
    %cst_73 = arith.constant 8.500000e-01 : f32
    %146 = vector.broadcast %cst_73 : f32 to vector<8x5x128xf32>
    %147 = arith.mulf %146, %145 : vector<8x5x128xf32>
    %148 = vector.broadcast %1 : vector<1x5x128xf32> to vector<8x5x128xf32>
    %149 = arith.addf %148, %147 : vector<8x5x128xf32>
    %cst_74 = arith.constant 0.000000e+00 : f32
    %150 = vector.broadcast %cst_74 : f32 to vector<8x5x128xf32>
    %151 = arith.maximumf %149, %150 : vector<8x5x128xf32>
    %cst_75 = arith.constant dense<0.000000e+00> : vector<8x128xf32>
    %152 = vector.multi_reduction <add>, %151, %cst_75 [1] : vector<8x5x128xf32> to vector<8x128xf32>
    %153 = vector.shape_cast %152 : vector<8x128xf32> to vector<8x1x128xf32>
    %cst_76 = arith.constant 5.000000e+00 : f32
    %154 = vector.broadcast %cst_76 : f32 to vector<8x1x128xf32>
    %155 = arith.divf %153, %154 : vector<8x1x128xf32>
    %cst_77 = arith.constant 9.99999997E-7 : f32
    %156 = vector.broadcast %cst_77 : f32 to vector<8x1x128xf32>
    %157 = arith.addf %155, %156 : vector<8x1x128xf32>
    %158 = vector.broadcast %157 : vector<8x1x128xf32> to vector<8x5x128xf32>
    %159 = arith.divf %151, %158 : vector<8x5x128xf32>
    %cst_78 = arith.constant 0.000000e+00 : f32
    %160 = vector.broadcast %cst_78 : f32 to vector<8x5x128xf32>
    %161 = arith.maximumf %159, %160 : vector<8x5x128xf32>
    %162 = math.absf %159 : vector<8x5x128xf32>
    %cst_79 = arith.constant 0.000000e+00 : f32
    %163 = vector.broadcast %cst_79 : f32 to vector<8x5x128xf32>
    %164 = arith.subf %163, %162 : vector<8x5x128xf32>
    %165 = math.exp %164 : vector<8x5x128xf32>
    %cst_80 = arith.constant 1.000000e+00 : f32
    %166 = vector.broadcast %cst_80 : f32 to vector<8x5x128xf32>
    %167 = arith.addf %166, %165 : vector<8x5x128xf32>
    %168 = math.log %167 : vector<8x5x128xf32>
    %169 = arith.addf %161, %168 : vector<8x5x128xf32>
    %c0_81 = arith.constant 0 : index
    %c0_82 = arith.constant 0 : index
    %170 = vector.load %arg13[%c0_81, %c0_82] : memref<128x128xf32, #tpu.memory_space<vmem>>, vector<128x128xf32>
    %171 = vector.shape_cast %170 : vector<128x128xf32> to vector<1x128x128xf32>
    %172 = vector.broadcast %171 : vector<1x128x128xf32> to vector<8x128x128xf32>
    "tpu.trace_start"() <{level = 10 : i32, message = "bih,bhk->bik"}> : () -> ()
    %cst_83 = arith.constant dense<0.000000e+00> : vector<8x5x128xf32>
    %173 = tpu.matmul %169, %172, %cst_83 {dimension_numbers = #tpu.dot_dimension_numbers<[2], [1], [1], [2], [0, 0, 0, 1, 1, 2], [0], [0]>} : vector<8x5x128xf32>, vector<8x128x128xf32>, vector<8x5x128xf32> -> vector<8x5x128xf32>
    "tpu.trace_stop"() : () -> ()
    "tpu.trace_start"() <{level = 10 : i32, message = "bij,bjh->bih"}> : () -> ()
    %cst_84 = arith.constant dense<0.000000e+00> : vector<8x5x128xf32>
    %174 = tpu.matmul %112, %173, %cst_84 {dimension_numbers = #tpu.dot_dimension_numbers<[2], [1], [1], [2], [0, 0, 0, 1, 1, 2], [0], [0]>} : vector<8x5x5xf32>, vector<8x5x128xf32>, vector<8x5x128xf32> -> vector<8x5x128xf32>
    "tpu.trace_stop"() : () -> ()
    %cst_85 = arith.constant 8.500000e-01 : f32
    %175 = vector.broadcast %cst_85 : f32 to vector<8x5x128xf32>
    %176 = arith.mulf %175, %174 : vector<8x5x128xf32>
    %177 = vector.broadcast %1 : vector<1x5x128xf32> to vector<8x5x128xf32>
    %178 = arith.addf %177, %176 : vector<8x5x128xf32>
    %cst_86 = arith.constant 0.000000e+00 : f32
    %179 = vector.broadcast %cst_86 : f32 to vector<8x5x128xf32>
    %180 = arith.maximumf %178, %179 : vector<8x5x128xf32>
    %cst_87 = arith.constant dense<0.000000e+00> : vector<8x128xf32>
    %181 = vector.multi_reduction <add>, %180, %cst_87 [1] : vector<8x5x128xf32> to vector<8x128xf32>
    %182 = vector.shape_cast %181 : vector<8x128xf32> to vector<8x1x128xf32>
    %cst_88 = arith.constant 5.000000e+00 : f32
    %183 = vector.broadcast %cst_88 : f32 to vector<8x1x128xf32>
    %184 = arith.divf %182, %183 : vector<8x1x128xf32>
    %cst_89 = arith.constant 9.99999997E-7 : f32
    %185 = vector.broadcast %cst_89 : f32 to vector<8x1x128xf32>
    %186 = arith.addf %184, %185 : vector<8x1x128xf32>
    %187 = vector.broadcast %186 : vector<8x1x128xf32> to vector<8x5x128xf32>
    %188 = arith.divf %180, %187 : vector<8x5x128xf32>
    %cst_90 = arith.constant 0.000000e+00 : f32
    %189 = vector.broadcast %cst_90 : f32 to vector<8x5x128xf32>
    %190 = arith.maximumf %188, %189 : vector<8x5x128xf32>
    %191 = math.absf %188 : vector<8x5x128xf32>
    %cst_91 = arith.constant 0.000000e+00 : f32
    %192 = vector.broadcast %cst_91 : f32 to vector<8x5x128xf32>
    %193 = arith.subf %192, %191 : vector<8x5x128xf32>
    %194 = math.exp %193 : vector<8x5x128xf32>
    %cst_92 = arith.constant 1.000000e+00 : f32
    %195 = vector.broadcast %cst_92 : f32 to vector<8x5x128xf32>
    %196 = arith.addf %195, %194 : vector<8x5x128xf32>
    %197 = math.log %196 : vector<8x5x128xf32>
    %198 = arith.addf %190, %197 : vector<8x5x128xf32>
    %c0_93 = arith.constant 0 : index
    %c0_94 = arith.constant 0 : index
    %c0_95 = arith.constant 0 : index
    %199 = vector.load %arg15[%c0_93, %c0_94, %c0_95] : memref<8x5x128xf32, #tpu.memory_space<vmem>>, vector<8x5x128xf32>
    tpu.vector_store %arg15[%c0_93, %c0_94, %c0_95], %198 {strides = array<i32>} : memref<8x5x128xf32, #tpu.memory_space<vmem>>, vector<8x5x128xf32>,
    return
  }
  func.func @transform_0(%arg0: i32) -> (i32, i32) {
    %c0_i32 = arith.constant 0 : i32
    %c0_i32_0 = arith.constant 0 : i32
    return %arg0, %c0_i32 : i32, i32
  }
  func.func @transform_1(%arg0: i32) -> (i32, i32) {
    %c0_i32 = arith.constant 0 : i32
    %c0_i32_0 = arith.constant 0 : i32
    return %arg0, %c0_i32 : i32, i32
  }
  func.func @transform_2(%arg0: i32) -> (i32, i32) {
    %c0_i32 = arith.constant 0 : i32
    %c0_i32_0 = arith.constant 0 : i32
    %c0_i32_1 = arith.constant 0 : i32
    return %c0_i32, %c0_i32_0 : i32, i32
  }
  func.func @transform_3(%arg0: i32) -> (i32, i32) {
    %c0_i32 = arith.constant 0 : i32
    %c0_i32_0 = arith.constant 0 : i32
    %c0_i32_1 = arith.constant 0 : i32
    return %c0_i32, %c0_i32_0 : i32, i32
  }
  func.func @transform_4(%arg0: i32) -> (i32, i32) {
    %c0_i32 = arith.constant 0 : i32
    %c0_i32_0 = arith.constant 0 : i32
    %c0_i32_1 = arith.constant 0 : i32
    return %c0_i32, %c0_i32_0 : i32, i32
  }
  func.func @transform_5(%arg0: i32) -> (i32, i32) {
    %c0_i32 = arith.constant 0 : i32
    %c0_i32_0 = arith.constant 0 : i32
    %c0_i32_1 = arith.constant 0 : i32
    return %c0_i32, %c0_i32_0 : i32, i32
  }
  func.func @transform_6(%arg0: i32) -> (i32, i32) {
    %c0_i32 = arith.constant 0 : i32
    %c0_i32_0 = arith.constant 0 : i32
    %c0_i32_1 = arith.constant 0 : i32
    return %c0_i32, %c0_i32_0 : i32, i32
  }
  func.func @transform_7(%arg0: i32) -> (i32, i32) {
    %c0_i32 = arith.constant 0 : i32
    %c0_i32_0 = arith.constant 0 : i32
    %c0_i32_1 = arith.constant 0 : i32
    return %c0_i32, %c0_i32_0 : i32, i32
  }
  func.func @transform_8(%arg0: i32) -> (i32, i32) {
    %c0_i32 = arith.constant 0 : i32
    %c0_i32_0 = arith.constant 0 : i32
    %c0_i32_1 = arith.constant 0 : i32
    return %c0_i32, %c0_i32_0 : i32, i32
  }
  func.func @transform_9(%arg0: i32) -> (i32, i32) {
    %c0_i32 = arith.constant 0 : i32
    %c0_i32_0 = arith.constant 0 : i32
    %c0_i32_1 = arith.constant 0 : i32
    return %c0_i32, %c0_i32_0 : i32, i32
  }
  func.func @transform_10(%arg0: i32) -> (i32, i32) {
    %c0_i32 = arith.constant 0 : i32
    %c0_i32_0 = arith.constant 0 : i32
    %c0_i32_1 = arith.constant 0 : i32
    return %c0_i32, %c0_i32_0 : i32, i32
  }
  func.func @transform_11(%arg0: i32) -> (i32, i32) {
    %c0_i32 = arith.constant 0 : i32
    %c0_i32_0 = arith.constant 0 : i32
    %c0_i32_1 = arith.constant 0 : i32
    return %c0_i32, %c0_i32_0 : i32, i32
  }
  func.func @transform_12(%arg0: i32) -> (i32, i32) {
    %c0_i32 = arith.constant 0 : i32
    %c0_i32_0 = arith.constant 0 : i32
    %c0_i32_1 = arith.constant 0 : i32
    return %c0_i32, %c0_i32_0 : i32, i32
  }
  func.func @transform_13(%arg0: i32) -> (i32, i32, i32) {
    %c0_i32 = arith.constant 0 : i32
    %c0_i32_0 = arith.constant 0 : i32
    %c0_i32_1 = arith.constant 0 : i32
    return %arg0, %c0_i32, %c0_i32_0 : i32, i32, i32
  }
  func.func @transform_14(%arg0: i32) -> (i32, i32, i32) {
    %c0_i32 = arith.constant 0 : i32
    %c0_i32_0 = arith.constant 0 : i32
    %c0_i32_1 = arith.constant 0 : i32
    return %arg0, %c0_i32, %c0_i32_0 : i32, i32, i32
  }
}

</mosaic_0001>

<bundles_post_ra>
// kernel: my_higcn_forward.1
= control target key start
LH: loop header
LB: loop body
LE: loop exit
PB: predicated region body
PF: predicated region fallthrough
CT: control target
= control target key end

     0   :  { %vm69_vm0 = vcmask 130048   ;;  %v12065_v21 = vmov 0.0|0.0   ;;  %vm12066_vm1 = vmmov 0   ;;  %v12067_v22 = vmov 0.0   ;;  %s14014_s2 = inlined_call_operand.vmem [shape: f32[16,5], index: 2, kind: input, shape index: {}]   ;;  %s14015_s0 = inlined_call_operand.vmem [shape: f32[128,16], index: 0, kind: input, shape index: {}]   ;;  %s14016_s7 = inlined_call_operand.vmem [shape: f32[5,128], index: 7, kind: input, shape index: {}]   ;;  %s14017_s3 = inlined_call_operand.vmem [shape: f32[5,16], index: 3, kind: input, shape index: {}]   ;;  %s14018_s8 = inlined_call_operand.vmem [shape: f32[128,128], index: 8, kind: input, shape index: {}]   ;;  %s14019_s6 = inlined_call_operand.vmem [shape: f32[5,128], index: 6, kind: input, shape index: {}]   ;;  %s14020_s9 = inlined_call_operand.vmem [shape: f32[128,128], index: 9, kind: input, shape index: {}]   ;;  %s14021_s4 = inlined_call_operand.vmem [shape: f32[16,5], index: 4, kind: input, shape index: {}]   ;;  %s14022_s1 = inlined_call_operand.vmem [shape: f32[128,16], index: 1, kind: input, shape index: {}]   ;;  %s14023_s10 = inlined_call_operand.vmem [shape: f32[5,128], index: 10, kind: input, shape index: {}]   ;;  %s14024_s13 = inlined_call_operand.vmem [shape: f32[8,5,128], index: 13, kind: output, shape index: {0}]   ;;  %s14025_s5 = inlined_call_operand.vmem [shape: f32[5,16], index: 5, kind: input, shape index: {}]   ;;  %s14026_s11 = inlined_call_operand.vmem [shape: f32[128,128], index: 11, kind: input, shape index: {}]   ;;  %s14027_s12 = inlined_call_operand.vmem [shape: f32[128,128], index: 12, kind: input, shape index: {}]   ;;  %s14028_s14 = inlined_call_operand.vmem [shape: f32[8,5,128], index: 14, kind: output, shape index: {1}]  }
   0x1   :  { %v47_v0 = vld [vmem:[%s14014_s2] sm:$0xff]  ;;  %v48_v1 = vld [vmem:[%s14014_s2 + $0x8] sm:$0xff]  ;;  %v55_v7 = vld [vmem:[%s14015_s0 + $0x10] sm:$0xff]  ;;  %10951 = vmatprep.subr.bf16.mxu1 %v12065_v21  ;;  %9451 = vmatprep.mubr.msk.f32.mxu1 %vm12066_vm1, %v12067_v22  ;;  %vm831_vm2 = vcmask 1044480   ;;  %vm827_vm3 = vcmask 39936  }
   0x2   :  { %v53_v2 = vld [vmem:[%s14015_s0] sm:$0xff]  ;;  %v49_v3 = vmax.f32 %v47_v0, 0.0  ;;  %v50_v4 = vmax.f32 %v48_v1, 0.0  ;;  %v54_v6 = vld [vmem:[%s14015_s0 + $0x8] sm:$0xff]  ;;  %v56_v8 = vld [vmem:[%s14015_s0 + $0x18] sm:$0xff] }
   0x3   :  { %9423 = vmatprep.mubr.msk.f32.mxu0 %vm69_vm0, %v53_v2  ;;  %v57_v9 = vld [vmem:[%s14015_s0 + $0x20] sm:$0xff]  ;;  %v58_v10 = vld [vmem:[%s14015_s0 + $0x28] sm:$0xff]  ;;  %v59_v11 = vld [vmem:[%s14015_s0 + $0x30] sm:$0xff] }
   0x4   :  { %v10947_v5 = vpack.c.bf16 %v50_v4, %v49_v3  ;;  %v60_v12 = vld [vmem:[%s14015_s0 + $0x38] sm:$0xff]  ;;  %v61_v13 = vld [vmem:[%s14015_s0 + $0x40] sm:$0xff]  ;;  %v62_v14 = vld [vmem:[%s14015_s0 + $0x48] sm:$0xff] }
   0x5   :  { %v63_v15 = vld [vmem:[%s14015_s0 + $0x50] sm:$0xff]  ;;  %v64_v16 = vld [vmem:[%s14015_s0 + $0x58] sm:$0xff]  ;;  %v65_v17 = vld [vmem:[%s14015_s0 + $0x60] sm:$0xff] }
   0x6   :  { %10948 = vmatprep.subr.bf16.mxu0 %v10947_v5  ;;  %v66_v18 = vld [vmem:[%s14015_s0 + $0x68] sm:$0xff]  ;;  %v67_v19 = vld [vmem:[%s14015_s0 + $0x70] sm:$0xff]  ;;  %v68_v20 = vld [vmem:[%s14015_s0 + $0x78] sm:$0xff] }
   0x7   :  { %10950 = vmatpush3.bf16.msra.mxu0 %v10947_v5  ;;  %v12222_v23 = vld [vmem:[%s14016_s7] sm:$0x1f]  ;;  %v1602_v3 = vld [vmem:[%s14018_s8 + $0x8] sm:$0xff]  ;;  %v1603_v5 = vld [vmem:[%s14018_s8 + $0x10] sm:$0xff] }
   0x8   :  { %9503 = vmatprep.subr.mxu0 %v12067_v22  ;;  %v51_v25 = vld [vmem:[%s14017_s3] sm:$0x1f] }
   0x9   :  { %v52_v28 = vmax.f32 %v51_v25, 0.0  ;;  %v1601_v2 = vld [vmem:[%s14018_s8] sm:$0xff]  ;;  %v1615_v25 = vld [vmem:[%s14018_s8 + $0x70] sm:$0xff] }
   0xa   :  { %9424 = vmatmul.mubr.msk.f32.vlgmr.msra.gmra.mrb[0].mxu0 %vm69_vm0, %v54_v6  ;;  %v12337_v4 = vpack.c.bf16 %v1602_v3, %v1601_v2  ;;  %v1604_v6 = vld [vmem:[%s14018_s8 + $0x18] sm:$0xff] }
   0xb   :  { %9426 = vmatprep.mubr.msk.f32.mxu0 %vm69_vm0, %v55_v7  ;;  %9504 = vmatpush3.msk.msra.mxu0 %vm831_vm2, %v12222_v23  ;;  %v12349_v7 = vpack.c.bf16 %v1604_v6, %v1603_v5 }
   0xc   :  { %9513 = vmatprep.subr.mxu0 %v12067_v22 }
   0xe   :  { %9427 = vmatmul.mubr.msk.f32.gmra.mrb[2].mxu0 %vm69_vm0, %v56_v8  ;;  %v1605_v8 = vld [vmem:[%s14018_s8 + $0x20] sm:$0xff] }
   0xf   :  { %9429 = vmatprep.mubr.msk.f32.mxu0 %vm69_vm0, %v57_v9  ;;  %v1606_v9 = vld [vmem:[%s14018_s8 + $0x28] sm:$0xff] }
  0x12   :  { %9430 = vmatmul.mubr.msk.f32.gmra.mrb[4].mxu0 %vm69_vm0, %v58_v10  ;;  %v12361_v10 = vpack.c.bf16 %v1606_v9, %v1605_v8 }
  0x13   :  { %9432 = vmatprep.mubr.msk.f32.mxu0 %vm69_vm0, %v59_v11  ;;  %v1607_v11 = vld [vmem:[%s14018_s8 + $0x30] sm:$0xff] }
  0x16   :  { %9433 = vmatmul.mubr.msk.f32.gmra.mrb[6].mxu0 %vm69_vm0, %v60_v12  ;;  %v1608_v12 = vld [vmem:[%s14018_s8 + $0x38] sm:$0xff] }
  0x17   :  { %9435 = vmatprep.mubr.msk.f32.mxu0 %vm69_vm0, %v61_v13  ;;  %v12373_v13 = vpack.c.bf16 %v1608_v12, %v1607_v11 }
  0x1a   :  { %9436 = vmatmul.mubr.msk.f32.gmra.mrb[8].mxu0 %vm69_vm0, %v62_v14  ;;  %v1609_v14 = vld [vmem:[%s14018_s8 + $0x40] sm:$0xff] }
  0x1b   :  { %9438 = vmatprep.mubr.msk.f32.mxu0 %vm69_vm0, %v63_v15  ;;  %v1610_v15 = vld [vmem:[%s14018_s8 + $0x48] sm:$0xff] }
  0x1e   :  { %9439 = vmatmul.mubr.msk.f32.gmra.mrb[10].mxu0 %vm69_vm0, %v64_v16  ;;  %v12385_v16 = vpack.c.bf16 %v1610_v15, %v1609_v14 }
  0x1f   :  { %9441 = vmatprep.mubr.msk.f32.mxu0 %vm69_vm0, %v65_v17  ;;  %v1611_v17 = vld [vmem:[%s14018_s8 + $0x50] sm:$0xff] }
  0x22   :  { %9442 = vmatmul.mubr.msk.f32.gmra.mrb[12].mxu0 %vm69_vm0, %v66_v18  ;;  %v1612_v18 = vld [vmem:[%s14018_s8 + $0x58] sm:$0xff] }
  0x23   :  { %9444 = vmatprep.mubr.msk.f32.mxu0 %vm69_vm0, %v67_v19  ;;  %v12397_v19 = vpack.c.bf16 %v1612_v18, %v1611_v17 }
  0x26   :  { %9445 = vmatmul.mubr.msk.f32.gmra.mrb[14].mxu0 %vm69_vm0, %v68_v20  ;;  %v1613_v20 = vld [vmem:[%s14018_s8 + $0x60] sm:$0xff] }
  0x27   :  { %9505 = vmatprep.mubr.msk.f32.mxu0 %vm12066_vm1, %v12067_v22 }
  0xdd   :  { %v9425_v24 = vpop.f32.mrb[0].mxu0 }
  0xde   :  { %v184_v26 = vpop.f32.mrb[1].mxu0 }
  0xdf   :  { %v10952_v27 = vpack.c.bf16 %v9425_v24, %v184_v26  ;;  %v1616_v26 = vld [vmem:[%s14018_s8 + $0x78] sm:$0xff] }
  0xe1   :  { %v9428_v29 = vpop.f32.mrb[2].mxu0  ;;  %10953 = vmatpush3.bf16.msra.mxu1 %v10952_v27  ;;  %v12421_v27 = vpack.c.bf16 %v1616_v26, %v1615_v25 }
  0xe2   :  { %v194_v30 = vpop.f32.mrb[3].mxu0  ;;  %10954 = vmatprep.subr.bf16.mxu1 %v12065_v21 }
  0xe3   :  { %v10955_v31 = vpack.c.bf16 %v9428_v29, %v194_v30 }
  0xe4   :  { %9452 = vmatmul.mubr.msk.f32.vlgmr.msra.gmra.mrb[0].mxu1 %vm69_vm0, %v52_v28 }
  0xe5   :  { %v9431_v32 = vpop.f32.mrb[4].mxu0  ;;  %10956 = vmatpush3.bf16.msra.mxu1 %v10955_v31  ;;  %9458 = vmatprep.mubr.msk.f32.mxu1 %vm12066_vm1, %v12067_v22 }
  0xe6   :  { %v204_v33 = vpop.f32.mrb[5].mxu0  ;;  %10957 = vmatprep.subr.bf16.mxu1 %v12065_v21 }
  0xe7   :  { %v10958_v34 = vpack.c.bf16 %v9431_v32, %v204_v33 }
  0xe8   :  { %9459 = vmatmul.mubr.msk.f32.vlgmr.msra.gmra.mrb[2].mxu1 %vm69_vm0, %v52_v28 }
  0xe9   :  { %v9434_v35 = vpop.f32.mrb[6].mxu0  ;;  %10959 = vmatpush3.bf16.msra.mxu1 %v10958_v34  ;;  %9465 = vmatprep.mubr.msk.f32.mxu1 %vm12066_vm1, %v12067_v22 }
  0xea   :  { %v214_v36 = vpop.f32.mrb[7].mxu0  ;;  %10960 = vmatprep.subr.bf16.mxu1 %v12065_v21 }
  0xeb   :  { %v10961_v37 = vpack.c.bf16 %v9434_v35, %v214_v36 }
  0xec   :  { %9466 = vmatmul.mubr.msk.f32.vlgmr.msra.gmra.mrb[4].mxu1 %vm69_vm0, %v52_v28 }
  0xed   :  { %v9437_v38 = vpop.f32.mrb[8].mxu0  ;;  %10962 = vmatpush3.bf16.msra.mxu1 %v10961_v37  ;;  %9472 = vmatprep.mubr.msk.f32.mxu1 %vm12066_vm1, %v12067_v22 }
  0xee   :  { %v224_v39 = vpop.f32.mrb[9].mxu0  ;;  %10963 = vmatprep.subr.bf16.mxu1 %v12065_v21 }
  0xef   :  { %v10964_v40 = vpack.c.bf16 %v9437_v38, %v224_v39 }
  0xf0   :  { %9473 = vmatmul.mubr.msk.f32.vlgmr.msra.gmra.mrb[6].mxu1 %vm69_vm0, %v52_v28 }
  0xf1   :  { %10965 = vmatpush3.bf16.msra.mxu1 %v10964_v40  ;;  %9479 = vmatprep.mubr.msk.f32.mxu1 %vm12066_vm1, %v12067_v22  ;;  %v9440_v41 = vpop.f32.mrb[10].mxu0 }
  0xf2   :  { %v234_v42 = vpop.f32.mrb[11].mxu0  ;;  %10966 = vmatprep.subr.bf16.mxu1 %v12065_v21 }
  0xf3   :  { %v10967_v43 = vpack.c.bf16 %v9440_v41, %v234_v42 }
  0xf4   :  { %9480 = vmatmul.mubr.msk.f32.vlgmr.msra.gmra.mrb[8].mxu1 %vm69_vm0, %v52_v28 }
  0xf5   :  { %v9443_v44 = vpop.f32.mrb[12].mxu0  ;;  %10968 = vmatpush3.bf16.msra.mxu1 %v10967_v43  ;;  %9486 = vmatprep.mubr.msk.f32.mxu1 %vm12066_vm1, %v12067_v22 }
  0xf6   :  { %v244_v45 = vpop.f32.mrb[13].mxu0  ;;  %10969 = vmatprep.subr.bf16.mxu1 %v12065_v21 }
  0xf7   :  { %v10970_v46 = vpack.c.bf16 %v9443_v44, %v244_v45 }
  0xf8   :  { %9487 = vmatmul.mubr.msk.f32.vlgmr.msra.gmra.mrb[10].mxu1 %vm69_vm0, %v52_v28 }
  0xf9   :  { %10971 = vmatpush3.bf16.msra.mxu1 %v10970_v46  ;;  %9493 = vmatprep.mubr.msk.f32.mxu1 %vm12066_vm1, %v12067_v22  ;;  %v9446_v47 = vpop.f32.mrb[14].mxu0 }
  0xfa   :  { %v254_v48 = vpop.f32.mrb[15].mxu0  ;;  %10972 = vmatprep.subr.bf16.mxu1 %v12065_v21 }
  0xfb   :  { %v10973_v49 = vpack.c.bf16 %v9446_v47, %v254_v48 }
  0xfc   :  { %9494 = vmatmul.mubr.msk.f32.vlgmr.msra.gmra.mrb[12].mxu1 %vm69_vm0, %v52_v28 }
  0xfd   :  { %10974 = vmatpush3.bf16.msra.mxu1 %v10973_v49  ;;  %9500 = vmatprep.mubr.msk.f32.mxu1 %vm12066_vm1, %v12067_v22 }
  0xfe   :  { %9508 = vmatprep.subr.mxu1 %v12067_v22 }
 0x100   :  { %9501 = vmatmul.mubr.msk.f32.vlgmr.msra.gmra.mrb[14].mxu1 %vm69_vm0, %v52_v28  ;;  %v12430_v28 = vld [vmem:[%s14019_s6] sm:$0x1f] }
 0x101   :  { %9509 = vmatpush3.msk.msra.mxu1 %vm831_vm2, %v12222_v23  ;;  %9510 = vmatprep.mubr.msk.f32.mxu1 %vm12066_vm1, %v12067_v22 }
 0x102   :  { %9518 = vmatprep.subr.mxu1 %v12067_v22 }
 0x1b7   :  { %v12265_v50 = vpop.f32.mrb[0].mxu1 }
 0x1b8   :  { %v9453_v51 = vpop.f32.mrb[1].mxu1  ;;  %9506 = vmatmul.mubr.msk.f32.vlgmr.msra.gmra.mrb[16].mxu0 %vm827_vm3, %v12265_v50 }
 0x1b9   :  { %9514 = vmatpush3.msk.msra.mxu0 %vm831_vm2, %v12222_v23  ;;  %9515 = vmatprep.mubr.msk.f32.mxu0 %vm12066_vm1, %v12067_v22 }
 0x1ba   :  { %9523 = vmatprep.subr.mxu0 %v12067_v22 }
 0x1bb   :  { %v12274_v52 = vpop.f32.mrb[2].mxu1 }
 0x1bc   :  { %9511 = vmatmul.mubr.msk.f32.vlgmr.msra.gmra.mrb[16].mxu1 %vm827_vm3, %v12274_v52  ;;  %v9460_v53 = vpop.f32.mrb[3].mxu1 }
 0x1bd   :  { %9519 = vmatpush3.msk.msra.mxu1 %vm831_vm2, %v12222_v23  ;;  %9520 = vmatprep.mubr.msk.f32.mxu1 %vm12066_vm1, %v12067_v22 }
 0x1be   :  { %9528 = vmatprep.subr.mxu1 %v12067_v22 }
 0x1bf   :  { %v12283_v54 = vpop.f32.mrb[4].mxu1 }
 0x1c0   :  { %9516 = vmatmul.mubr.msk.f32.vlgmr.msra.gmra.mrb[18].mxu0 %vm827_vm3, %v12283_v54  ;;  %v9467_v55 = vpop.f32.mrb[5].mxu1 }
 0x1c1   :  { %9524 = vmatpush3.msk.msra.mxu0 %vm831_vm2, %v12222_v23  ;;  %9525 = vmatprep.mubr.msk.f32.mxu0 %vm12066_vm1, %v12067_v22 }
 0x1c2   :  { %9533 = vmatprep.subr.mxu0 %v12067_v22 }
 0x1c3   :  { %v12292_v56 = vpop.f32.mrb[6].mxu1 }
 0x1c4   :  { %9521 = vmatmul.mubr.msk.f32.vlgmr.msra.gmra.mrb[18].mxu1 %vm827_vm3, %v12292_v56  ;;  %v9474_v57 = vpop.f32.mrb[7].mxu1 }
 0x1c5   :  { %9529 = vmatpush3.msk.msra.mxu1 %vm831_vm2, %v12222_v23  ;;  %9530 = vmatprep.mubr.msk.f32.mxu1 %vm12066_vm1, %v12067_v22 }
 0x1c6   :  { %9538 = vmatprep.subr.mxu1 %v12067_v22 }
 0x1c7   :  { %v12301_v58 = vpop.f32.mrb[8].mxu1 }
 0x1c8   :  { %9526 = vmatmul.mubr.msk.f32.vlgmr.msra.gmra.mrb[20].mxu0 %vm827_vm3, %v12301_v58  ;;  %v9481_v59 = vpop.f32.mrb[9].mxu1 }
 0x1c9   :  { %9534 = vmatpush3.msk.msra.mxu0 %vm831_vm2, %v12222_v23  ;;  %9535 = vmatprep.mubr.msk.f32.mxu0 %vm12066_vm1, %v12067_v22 }
 0x1ca   :  { %10975 = vmatprep.subr.bf16.mxu0 %v12065_v21 }
 0x1cb   :  { %v12310_v60 = vpop.f32.mrb[10].mxu1 }
 0x1cc   :  { %9531 = vmatmul.mubr.msk.f32.vlgmr.msra.gmra.mrb[20].mxu1 %vm827_vm3, %v12310_v60  ;;  %v9488_v61 = vpop.f32.mrb[11].mxu1 }
 0x1cd   :  { %9539 = vmatpush3.msk.msra.mxu1 %vm831_vm2, %v12222_v23  ;;  %9540 = vmatprep.mubr.msk.f32.mxu1 %vm12066_vm1, %v12067_v22  ;;  %v1614_v23 = vld [vmem:[%s14018_s8 + $0x68] sm:$0xff] }
 0x1ce   :  { %10999 = vmatprep.subr.bf16.mxu1 %v12065_v21  ;;  %v12409_v24 = vpack.c.bf16 %v1614_v23, %v1613_v20 }
 0x1cf   :  { %v12319_v62 = vpop.f32.mrb[12].mxu1 }
 0x1d0   :  { %9536 = vmatmul.mubr.msk.f32.vlgmr.msra.gmra.mrb[22].mxu0 %vm827_vm3, %v12319_v62  ;;  %v9495_v63 = vpop.f32.mrb[13].mxu1 }
 0x1d1   :  { %9575 = vmatprep.mubr.msk.f32.mxu0 %vm12066_vm1, %v12067_v22  ;;  %10977 = vmatpush3.bf16.msra.mxu0 %v12337_v4 }
 0x1d2   :  { %10978 = vmatprep.subr.bf16.mxu0 %v12065_v21 }
 0x1d3   :  { %v12325_v0 = vpop.f32.mrb[14].mxu1 }
 0x1d4   :  { %9541 = vmatmul.mubr.msk.f32.vlgmr.msra.gmra.mrb[22].mxu1 %vm827_vm3, %v12325_v0  ;;  %v9502_v1 = vpop.f32.mrb[15].mxu1 }
 0x1d5   :  { %9610 = vmatprep.mubr.msk.f32.mxu1 %vm12066_vm1, %v12067_v22  ;;  %11001 = vmatpush3.bf16.msra.mxu1 %v12337_v4 }
 0x1d6   :  { %11002 = vmatprep.subr.bf16.mxu1 %v12065_v21  ;;  %10980 = vmatpush3.bf16.msra.mxu0 %v12349_v7 }
 0x1d7   :  { %10981 = vmatprep.subr.bf16.mxu0 %v12065_v21 }
 0x1d9   :  { %11004 = vmatpush3.bf16.msra.mxu1 %v12349_v7 }
 0x1da   :  { %11005 = vmatprep.subr.bf16.mxu1 %v12065_v21  ;;  %10983 = vmatpush3.bf16.msra.mxu0 %v12361_v10 }
 0x1db   :  { %10984 = vmatprep.subr.bf16.mxu0 %v12065_v21 }
 0x1dd   :  { %11007 = vmatpush3.bf16.msra.mxu1 %v12361_v10 }
 0x1de   :  { %11008 = vmatprep.subr.bf16.mxu1 %v12065_v21  ;;  %10986 = vmatpush3.bf16.msra.mxu0 %v12373_v13 }
 0x1df   :  { %10987 = vmatprep.subr.bf16.mxu0 %v12065_v21 }
 0x1e1   :  { %11010 = vmatpush3.bf16.msra.mxu1 %v12373_v13 }
 0x1e2   :  { %11011 = vmatprep.subr.bf16.mxu1 %v12065_v21  ;;  %10989 = vmatpush3.bf16.msra.mxu0 %v12385_v16 }
 0x1e3   :  { %10990 = vmatprep.subr.bf16.mxu0 %v12065_v21 }
 0x1e5   :  { %11013 = vmatpush3.bf16.msra.mxu1 %v12385_v16 }
 0x1e6   :  { %11014 = vmatprep.subr.bf16.mxu1 %v12065_v21  ;;  %10992 = vmatpush3.bf16.msra.mxu0 %v12397_v19 }
 0x1e7   :  { %10993 = vmatprep.subr.bf16.mxu0 %v12065_v21 }
 0x1e9   :  { %11016 = vmatpush3.bf16.msra.mxu1 %v12397_v19 }
 0x1ea   :  { %11017 = vmatprep.subr.bf16.mxu1 %v12065_v21  ;;  %10995 = vmatpush3.bf16.msra.mxu0 %v12409_v24 }
 0x1eb   :  { %10996 = vmatprep.subr.bf16.mxu0 %v12065_v21 }
 0x1ed   :  { %11019 = vmatpush3.bf16.msra.mxu1 %v12409_v24 }
 0x1ee   :  { %11020 = vmatprep.subr.bf16.mxu1 %v12065_v21  ;;  %10998 = vmatpush3.bf16.msra.mxu0 %v12421_v27 }
 0x1ef   :  { %11023 = vmatprep.subr.bf16.mxu0 %v12065_v21 }
 0x1f1   :  { %11022 = vmatpush3.bf16.msra.mxu1 %v12421_v27 }
 0x1f2   :  { %11047 = vmatprep.subr.bf16.mxu1 %v12065_v21 }
 0x28b   :  { %v901_v29 = vpop.f32.mrb[16].mxu0 }
 0x28c   :  { %v1416_v30 = vmul.f32 0.85, %v901_v29  ;;  %v9507_v31 = vpop.f32.mrb[17].mxu0 }
 0x28e   :  { %v12433_v32 = vadd.f32 %v1416_v30, %v12430_v28 }
 0x28f   :  { %v974_v33 = vpop.f32.mrb[16].mxu1 }
 0x290   :  { %v1432_v34 = vmax.f32 %v12433_v32, 0.0  ;;  %v1417_v35 = vmul.f32 0.85, %v974_v33  ;;  %v9512_v36 = vpop.f32.mrb[17].mxu1 }
 0x292   :  { %v1440_v37 = vsel %vm831_vm2, %v1432_v34, 0.0  ;;  %v12440_v38 = vadd.f32 %v1417_v35, %v12430_v28 }
 0x293   :  { %v1441_v39 = vrot.slane %v1440_v37, 4  ;;  %v1047_v40 = vpop.f32.mrb[18].mxu0 }
 0x294   :  { %v1433_v41 = vmax.f32 %v12440_v38, 0.0  ;;  %v1418_v42 = vmul.f32 0.85, %v1047_v40  ;;  %v9517_v43 = vpop.f32.mrb[19].mxu0 }
 0x295   :  { %v1442_v44 = vadd.f32 %v1441_v39, %v1440_v37 }
 0x296   :  { %v1447_v45 = vsel %vm831_vm2, %v1433_v41, 0.0  ;;  %v12447_v46 = vadd.f32 %v1418_v42, %v12430_v28 }
 0x297   :  { %v1443_v47 = vrot.slane %v1442_v44, 2  ;;  %v1448_v48 = vrot.slane %v1447_v45, 4  ;;  %v1120_v49 = vpop.f32.mrb[18].mxu1 }
 0x298   :  { %v1434_v51 = vmax.f32 %v12447_v46, 0.0  ;;  %v1419_v53 = vmul.f32 0.85, %v1120_v49  ;;  %v9522_v55 = vpop.f32.mrb[19].mxu1 }
 0x299   :  { %v1444_v57 = vadd.f32 %v1443_v47, %v1442_v44  ;;  %v1449_v59 = vadd.f32 %v1448_v48, %v1447_v45 }
 0x29a   :  { %v1454_v61 = vsel %vm831_vm2, %v1434_v51, 0.0  ;;  %v12454_v63 = vadd.f32 %v1419_v53, %v12430_v28 }
 0x29b   :  { %v1445_v1 = vrot.slane %v1444_v57, 1  ;;  %v1450_v2 = vrot.slane %v1449_v59, 2  ;;  %v1455_v3 = vrot.slane %v1454_v61, 4  ;;  %v1193_v5 = vpop.f32.mrb[20].mxu0 }
 0x29c   :  { %v1435_v6 = vmax.f32 %v12454_v63, 0.0  ;;  %v9527_v8 = vpop.f32.mrb[21].mxu0  ;;  %v1420_v33 = vmul.f32 0.85, %v1193_v5 }
 0x29d   :  { %v1446_v9 = vadd.f32 %v1445_v1, %v1444_v57  ;;  %v1451_v11 = vadd.f32 %v1450_v2, %v1449_v59  ;;  %v1456_v12 = vadd.f32 %v1455_v3, %v1454_v61 }
 0x29e   :  { %v1461_v14 = vsel %vm831_vm2, %v1435_v6, 0.0  ;;  %v12461_v45 = vadd.f32 %v1420_v33, %v12430_v28 }
 0x29f   :  { %v1497_v15 = vmul.f32 0.2, %v1446_v9  ;;  %v1452_v17 = vrot.slane %v1451_v11, 1  ;;  %v1457_v18 = vrot.slane %v1456_v12, 2  ;;  %v1462_v20 = vrot.slane %v1461_v14, 4  ;;  %v1266_v23 = vpop.f32.mrb[20].mxu1 }
 0x2a0   :  { %v9532_v25 = vpop.f32.mrb[21].mxu1  ;;  %v1421_v47 = vmul.f32 0.85, %v1266_v23  ;;  %v1436_v59 = vmax.f32 %v12461_v45, 0.0 }
 0x2a1   :  { %v1505_v26 = vadd.f32 1e-06, %v1497_v15  ;;  %v1453_v29 = vadd.f32 %v1452_v17, %v1451_v11  ;;  %v1458_v30 = vadd.f32 %v1457_v18, %v1456_v12  ;;  %v1463_v31 = vadd.f32 %v1462_v20, %v1461_v14 }
 0x2a2   :  { %v12465_v61 = vadd.f32 %v1421_v47, %v12430_v28  ;;  %v1468_v8 = vsel %vm831_vm2, %v1436_v59, 0.0 }
 0x2a3   :  { %11774 = vrcp.f32 %v1505_v26  ;;  %v1498_v35 = vmul.f32 0.2, %v1453_v29  ;;  %v1459_v36 = vrot.slane %v1458_v30, 1  ;;  %v1464_v37 = vrot.slane %v1463_v31, 2  ;;  %v1339_v39 = vpop.f32.mrb[22].mxu0 }
 0x2a4   :  { %v9537_v40 = vpop.f32.mrb[23].mxu0  ;;  %v1437_v9 = vmax.f32 %v12465_v61, 0.0  ;;  %v1469_v15 = vrot.slane %v1468_v8, 4 }
 0x2a5   :  { %v1506_v42 = vadd.f32 1e-06, %v1498_v35  ;;  %v1460_v43 = vadd.f32 %v1459_v36, %v1458_v30  ;;  %v1465_v44 = vadd.f32 %v1464_v37, %v1463_v31 }
 0x2a6   :  { %v1475_v32 = vsel %vm831_vm2, %v1437_v9, 0.0  ;;  %v1470_v23 = vadd.f32 %v1469_v15, %v1468_v8 }
 0x2a7   :  { %11776 = vrcp.f32 %v1506_v42  ;;  %v1466_v48 = vrot.slane %v1465_v44, 1  ;;  %v1412_v49 = vpop.f32.mrb[22].mxu1  ;;  %v1499_v55 = vmul.f32 0.2, %v1460_v43  ;;  %v1476_v25 = vrot.slane %v1475_v32, 4 }
 0x2a8   :  { %v9542_v53 = vpop.f32.mrb[23].mxu1  ;;  %v1471_v30 = vrot.slane %v1470_v23, 2 }
 0x2a9   :  { %v1467_v57 = vadd.f32 %v1466_v48, %v1465_v44  ;;  %v1507_v2 = vadd.f32 1e-06, %v1499_v55  ;;  %v1477_v31 = vadd.f32 %v1476_v25, %v1475_v32  ;;  %v1422_v44 = vmul.f32 0.85, %v1339_v39 }
 0x2aa   :  { %v1472_v38 = vadd.f32 %v1471_v30, %v1470_v23  ;;  %v1423_v55 = vmul.f32 0.85, %v1412_v49 }
 0x2ab   :  { %v1500_v3 = vmul.f32 0.2, %v1467_v57  ;;  %11778 = vrcp.f32 %v1507_v2 }
 0x2ac   :  { %v1473_v42 = vrot.slane %v1472_v38, 1  ;;  %v12495_v39 = vadd.f32 %v1423_v55, %v12430_v28 }
 0x2ad   :  { %v11775_v1 = vpop.eup %11774  ;;  %v1508_v14 = vadd.f32 1e-06, %v1500_v3 }
 0x2ae   :  { %v1514_v5 = vmul.f32 %v11775_v1, %v1432_v34  ;;  %v1474_v1 = vadd.f32 %v1473_v42, %v1472_v38  ;;  %v1439_v49 = vmax.f32 %v12495_v39, 0.0 }
 0x2af   :  { %11780 = vrcp.f32 %v1508_v14 }
 0x2b0   :  { %v1537_v11 = vand.u32 2147483647, %v1514_v5  ;;  %v1501_v8 = vmul.f32 0.2, %v1474_v1 }
 0x2b1   :  { %v11777_v12 = vpop.eup %11776 }
 0x2b2   :  { %v1545_v17 = vsub.f32 0.0, %v1537_v11  ;;  %v12475_v18 = vmul.f32 %v11777_v12, %v1433_v41  ;;  %v1478_v41 = vrot.slane %v1477_v31, 2  ;;  %v1509_v15 = vadd.f32 1e-06, %v1501_v8 }
 0x2b4   :  { %v1553_v34 = vmul.f32 1.442695, %v1545_v17  ;;  %v1538_v20 = vand.u32 2147483647, %v12475_v18  ;;  %v1479_v43 = vadd.f32 %v1478_v41, %v1477_v31 }
 0x2b5   :  { %v11779_v33 = vpop.eup %11778 }
 0x2b6   :  { %11782 = vpow2.f32 %v1553_v34  ;;  %v1546_v26 = vsub.f32 0.0, %v1538_v20  ;;  %v12483_v35 = vmul.f32 %v11779_v33, %v1434_v51  ;;  %v1480_v46 = vrot.slane %v1479_v43, 1 }
 0x2b7   :  { %v12491_v51 = vadd.f32 %v1422_v44, %v12430_v28  ;;  %v1529_v34 = vmax.f32 %v1514_v5, 0.0  ;;  %v1530_v33 = vmax.f32 %v12475_v18, 0.0 }
 0x2b8   :  { %v1555_v29 = vmul.f32 1.442695, %v1546_v26  ;;  %v1539_v47 = vand.u32 2147483647, %v12483_v35  ;;  %v1481_v63 = vadd.f32 %v1480_v46, %v1479_v43  ;;  %v1489_v26 = vsel %vm831_vm2, %v1439_v49, 0.0 }
 0x2b9   :  { %v11781_v36 = vpop.eup %11780  ;;  %v1490_v5 = vrot.slane %v1489_v26, 4 }
 0x2ba   :  { %11784 = vpow2.f32 %v1555_v29  ;;  %v12488_v48 = vmul.f32 %v11781_v36, %v1435_v6  ;;  %v1547_v2 = vsub.f32 0.0, %v1539_v47  ;;  %v1438_v6 = vmax.f32 %v12491_v51, 0.0 }
 0x2bb   :  { %v1502_v17 = vmul.f32 0.2, %v1481_v63  ;;  %v1491_v18 = vadd.f32 %v1490_v5, %v1489_v26 }
 0x2bc   :  { %v1540_v3 = vand.u32 2147483647, %v12488_v48  ;;  %v1557_v11 = vmul.f32 1.442695, %v1547_v2  ;;  %v1482_v32 = vsel %vm831_vm2, %v1438_v6, 0.0 }
 0x2bd   :  { %v1510_v30 = vadd.f32 1e-06, %v1502_v17  ;;  %v1483_v31 = vrot.slane %v1482_v32, 4  ;;  %v1492_v44 = vrot.slane %v1491_v18, 2 }
 0x2be   :  { %v1548_v12 = vsub.f32 0.0, %v1540_v3 }
 0x2bf   :  { %v1484_v36 = vadd.f32 %v1483_v31, %v1482_v32  ;;  %v1493_v46 = vadd.f32 %v1492_v44, %v1491_v18  ;;  %v1532_v31 = vmax.f32 %v12488_v48, 0.0 }
 0x2c0   :  { %v11783_v37 = vpop.eup %11782  ;;  %v1559_v20 = vmul.f32 1.442695, %v1548_v12 }
 0x2c1   :  { %v1569_v40 = vadd.f32 1.0, %v11783_v37 }
 0x2c3   :  { %11786 = vlog2.f32 %v1569_v40  ;;  %v1485_v40 = vrot.slane %v1484_v36, 2 }
 0x2c4   :  { %v11785_v53 = vpop.eup %11784 }
 0x2c5   :  { %v1570_v57 = vadd.f32 1.0, %v11785_v53  ;;  %v1486_v53 = vadd.f32 %v1485_v40, %v1484_v36 }
 0x2c7   :  { %11788 = vlog2.f32 %v1570_v57  ;;  %v1487_v2 = vrot.slane %v1486_v53, 1 }
 0x2c8   :  { %11790 = vpow2.f32 %v1557_v11 }
 0x2c9   :  { %11792 = vrcp.f32 %v1509_v15  ;;  %v1488_v8 = vadd.f32 %v1487_v2, %v1486_v53 }
 0x2ca   :  { %11794 = vpow2.f32 %v1559_v20 }
 0x2cb   :  { %11796 = vrcp.f32 %v1510_v30  ;;  %v1503_v12 = vmul.f32 0.2, %v1488_v8 }
 0x2cd   :  { %v11787_v14 = vpop.eup %11786  ;;  %v1511_v20 = vadd.f32 1e-06, %v1503_v12 }
 0x2ce   :  { %v1578_v23 = vmul.f32 0.6931472, %v11787_v14 }
 0x2d0   :  { %v1593_v25 = vadd.f32 %v1578_v23, %v1529_v34  ;;  %v1531_v23 = vmax.f32 %v12483_v35, 0.0 }
 0x2d1   :  { %v11789_v29 = vpop.eup %11788 }
 0x2d2   :  { %9576 = vmatmul.mubr.f32.vlgmr.msra.gmra.mrb[24].mxu0 %v1593_v25  ;;  %v1580_v38 = vmul.f32 0.6931472, %v11789_v29  ;;  %v11791_v37 = vpop.eup %11790 }
 0x2d3   :  { %11025 = vmatpush3.bf16.msra.mxu0 %v12337_v4  ;;  %9645 = vmatprep.mubr.msk.f32.mxu0 %vm12066_vm1, %v12067_v22  ;;  %v11793_v42 = vpop.eup %11792  ;;  %v1571_v43 = vadd.f32 1.0, %v11791_v37 }
 0x2d4   :  { %11026 = vmatprep.subr.bf16.mxu0 %v12065_v21  ;;  %v1594_v41 = vadd.f32 %v1580_v38, %v1530_v33  ;;  %v11795_v47 = vpop.eup %11794  ;;  %v12522_v55 = vmul.f32 %v11793_v42, %v1436_v59  ;;  %v1494_v59 = vrot.slane %v1493_v46, 1 }
 0x2d5   :  { %v11797_v57 = vpop.eup %11796  ;;  %11798 = vlog2.f32 %v1571_v43  ;;  %v1572_v1 = vadd.f32 1.0, %v11795_v47 }
 0x2d6   :  { %9611 = vmatmul.mubr.f32.vlgmr.msra.gmra.mrb[24].mxu1 %v1594_v41  ;;  %v1541_v3 = vand.u32 2147483647, %v12522_v55  ;;  %v12531_v45 = vmul.f32 %v11797_v57, %v1437_v9  ;;  %v1495_v61 = vadd.f32 %v1494_v59, %v1493_v46  ;;  %v1533_v53 = vmax.f32 %v12522_v55, 0.0 }
 0x2d7   :  { %11028 = vmatpush3.bf16.msra.mxu0 %v12349_v7  ;;  %11049 = vmatpush3.bf16.msra.mxu1 %v12337_v4  ;;  %11800 = vlog2.f32 %v1572_v1 }
 0x2d8   :  { %11029 = vmatprep.subr.bf16.mxu0 %v12065_v21  ;;  %11050 = vmatprep.subr.bf16.mxu1 %v12065_v21  ;;  %v1549_v63 = vsub.f32 0.0, %v1541_v3  ;;  %v1542_v11 = vand.u32 2147483647, %v12531_v45  ;;  %v1504_v17 = vmul.f32 0.2, %v1495_v61  ;;  %v1534_v57 = vmax.f32 %v12531_v45, 0.0 }
 0x2d9   :  { %9680 = vmatprep.mubr.msk.f32.mxu1 %vm12066_vm1, %v12067_v22 }
 0x2da   :  { %v1561_v14 = vmul.f32 1.442695, %v1549_v63  ;;  %v1550_v15 = vsub.f32 0.0, %v1542_v11  ;;  %v1512_v26 = vadd.f32 1e-06, %v1504_v17 }
 0x2db   :  { %11031 = vmatpush3.bf16.msra.mxu0 %v12361_v10  ;;  %11052 = vmatpush3.bf16.msra.mxu1 %v12349_v7 }
 0x2dc   :  { %11032 = vmatprep.subr.bf16.mxu0 %v12065_v21  ;;  %11053 = vmatprep.subr.bf16.mxu1 %v12065_v21  ;;  %11802 = vpow2.f32 %v1561_v14  ;;  %v1563_v25 = vmul.f32 1.442695, %v1550_v15 }
 0x2dd   :  { %11804 = vrcp.f32 %v1511_v20 }
 0x2de   :  { %11806 = vpow2.f32 %v1563_v25 }
 0x2df   :  { %11034 = vmatpush3.bf16.msra.mxu0 %v12373_v13  ;;  %11055 = vmatpush3.bf16.msra.mxu1 %v12361_v10  ;;  %v11799_v9 = vpop.eup %11798  ;;  %11808 = vrcp.f32 %v1512_v26 }
 0x2e0   :  { %11035 = vmatprep.subr.bf16.mxu0 %v12065_v21  ;;  %11056 = vmatprep.subr.bf16.mxu1 %v12065_v21  ;;  %v1582_v32 = vmul.f32 0.6931472, %v11799_v9 }
 0x2e1   :  { %v11801_v34 = vpop.eup %11800 }
 0x2e2   :  { %v1595_v29 = vadd.f32 %v1582_v32, %v1531_v23  ;;  %v1584_v30 = vmul.f32 0.6931472, %v11801_v34 }
 0x2e3   :  { %11037 = vmatpush3.bf16.msra.mxu0 %v12385_v16  ;;  %11058 = vmatpush3.bf16.msra.mxu1 %v12373_v13 }
 0x2e4   :  { %11038 = vmatprep.subr.bf16.mxu0 %v12065_v21  ;;  %11059 = vmatprep.subr.bf16.mxu1 %v12065_v21  ;;  %v1596_v35 = vadd.f32 %v1584_v30, %v1532_v31  ;;  %v2945_v30 = vld [vmem:[%s14020_s9] sm:$0xff]  ;;  %v2946_v31 = vld [vmem:[%s14020_s9 + $0x8] sm:$0xff] }
 0x2e6   :  { %v11803_v48 = vpop.eup %11802 }
 0x2e7   :  { %11040 = vmatpush3.bf16.msra.mxu0 %v12397_v19  ;;  %11061 = vmatpush3.bf16.msra.mxu1 %v12385_v16  ;;  %v11805_v33 = vpop.eup %11804  ;;  %v1573_v38 = vadd.f32 1.0, %v11803_v48  ;;  %v2947_v48 = vld [vmem:[%s14020_s9 + $0x10] sm:$0xff] }
 0x2e8   :  { %11041 = vmatprep.subr.bf16.mxu0 %v12065_v21  ;;  %11062 = vmatprep.subr.bf16.mxu1 %v12065_v21  ;;  %v11807_v5 = vpop.eup %11806  ;;  %v12570_v36 = vmul.f32 %v11805_v33, %v1438_v6  ;;  %v2948_v33 = vld [vmem:[%s14020_s9 + $0x18] sm:$0xff] }
 0x2e9   :  { %v11809_v41 = vpop.eup %11808  ;;  %11810 = vlog2.f32 %v1573_v38  ;;  %v1574_v18 = vadd.f32 1.0, %v11807_v5  ;;  %v12710_v38 = vpack.c.bf16 %v2948_v33, %v2947_v48  ;;  %v2949_v5 = vld [vmem:[%s14020_s9 + $0x20] sm:$0xff] }
 0x2ea   :  { %v12576_v37 = vmul.f32 %v11809_v41, %v1439_v49  ;;  %v1543_v40 = vand.u32 2147483647, %v12570_v36  ;;  %v2950_v41 = vld [vmem:[%s14020_s9 + $0x28] sm:$0xff] }
 0x2eb   :  { %11043 = vmatpush3.bf16.msra.mxu0 %v12409_v24  ;;  %11064 = vmatpush3.bf16.msra.mxu1 %v12397_v19  ;;  %11812 = vlog2.f32 %v1574_v18  ;;  %v2951_v18 = vld [vmem:[%s14020_s9 + $0x30] sm:$0xff] }
 0x2ec   :  { %11044 = vmatprep.subr.bf16.mxu0 %v12065_v21  ;;  %11065 = vmatprep.subr.bf16.mxu1 %v12065_v21  ;;  %v1544_v51 = vand.u32 2147483647, %v12576_v37  ;;  %v1551_v39 = vsub.f32 0.0, %v1543_v40  ;;  %v1536_v8 = vmax.f32 %v12576_v37, 0.0  ;;  %v2952_v37 = vld [vmem:[%s14020_s9 + $0x38] sm:$0xff] }
 0x2ed   :  { %v12734_v40 = vpack.c.bf16 %v2952_v37, %v2951_v18 }
 0x2ee   :  { %v1552_v6 = vsub.f32 0.0, %v1544_v51  ;;  %v1565_v42 = vmul.f32 1.442695, %v1551_v39  ;;  %v2953_v51 = vld [vmem:[%s14020_s9 + $0x40] sm:$0xff]  ;;  %v2954_v39 = vld [vmem:[%s14020_s9 + $0x48] sm:$0xff] }
 0x2ef   :  { %11046 = vmatpush3.bf16.msra.mxu0 %v12421_v27  ;;  %11067 = vmatpush3.bf16.msra.mxu1 %v12409_v24 }
 0x2f0   :  { %11068 = vmatprep.subr.bf16.mxu1 %v12065_v21  ;;  %11071 = vmatprep.subr.bf16.mxu0 %v12065_v21  ;;  %v1567_v43 = vmul.f32 1.442695, %v1552_v6  ;;  %11814 = vpow2.f32 %v1565_v42  ;;  %v12746_v6 = vpack.c.bf16 %v2954_v39, %v2953_v51  ;;  %v2956_v42 = vld [vmem:[%s14020_s9 + $0x58] sm:$0xff] }
 0x2f2   :  { %9646 = vmatmul.mubr.f32.vlgmr.msra.gmra.mrb[26].mxu0 %v1595_v29  ;;  %11816 = vpow2.f32 %v1567_v43 }
 0x2f3   :  { %11070 = vmatpush3.bf16.msra.mxu1 %v12421_v27  ;;  %11073 = vmatpush3.bf16.msra.mxu0 %v12337_v4  ;;  %v11811_v49 = vpop.eup %11810 }
 0x2f4   :  { %11074 = vmatprep.subr.bf16.mxu0 %v12065_v21  ;;  %11095 = vmatprep.subr.bf16.mxu1 %v12065_v21  ;;  %v1586_v44 = vmul.f32 0.6931472, %v11811_v49  ;;  %v2955_v49 = vld [vmem:[%s14020_s9 + $0x50] sm:$0xff] }
 0x2f5   :  { %9715 = vmatprep.mubr.msk.f32.mxu0 %vm12066_vm1, %v12067_v22  ;;  %v11813_v47 = vpop.eup %11812  ;;  %v12758_v43 = vpack.c.bf16 %v2956_v42, %v2955_v49 }
 0x2f6   :  { %9681 = vmatmul.mubr.f32.vlgmr.msra.gmra.mrb[26].mxu1 %v1596_v35  ;;  %v1597_v1 = vadd.f32 %v1586_v44, %v1533_v53  ;;  %v1588_v46 = vmul.f32 0.6931472, %v11813_v47  ;;  %v12698_v35 = vpack.c.bf16 %v2946_v31, %v2945_v30  ;;  %v2957_v44 = vld [vmem:[%s14020_s9 + $0x60] sm:$0xff]  ;;  %v2958_v47 = vld [vmem:[%s14020_s9 + $0x68] sm:$0xff] }
 0x2f7   :  { %11076 = vmatpush3.bf16.msra.mxu0 %v12349_v7  ;;  %11097 = vmatpush3.bf16.msra.mxu1 %v12337_v4  ;;  %v12770_v53 = vpack.c.bf16 %v2958_v47, %v2957_v44 }
 0x2f8   :  { %11077 = vmatprep.subr.bf16.mxu0 %v12065_v21  ;;  %11098 = vmatprep.subr.bf16.mxu1 %v12065_v21  ;;  %v1598_v55 = vadd.f32 %v1588_v46, %v1534_v57  ;;  %v2959_v57 = vld [vmem:[%s14020_s9 + $0x70] sm:$0xff] }
 0x2f9   :  { %9750 = vmatprep.mubr.msk.f32.mxu1 %vm12066_vm1, %v12067_v22 }
 0x2fa   :  { %v11815_v2 = vpop.eup %11814 }
 0x2fb   :  { %11079 = vmatpush3.bf16.msra.mxu0 %v12361_v10  ;;  %11100 = vmatpush3.bf16.msra.mxu1 %v12349_v7  ;;  %v1575_v45 = vadd.f32 1.0, %v11815_v2 }
 0x2fc   :  { %11080 = vmatprep.subr.bf16.mxu0 %v12065_v21  ;;  %11101 = vmatprep.subr.bf16.mxu1 %v12065_v21  ;;  %v11817_v3 = vpop.eup %11816 }
 0x2fd   :  { %v1576_v59 = vadd.f32 1.0, %v11817_v3  ;;  %11818 = vlog2.f32 %v1575_v45 }
 0x2ff   :  { %11082 = vmatpush3.bf16.msra.mxu0 %v12373_v13  ;;  %11103 = vmatpush3.bf16.msra.mxu1 %v12361_v10  ;;  %11820 = vlog2.f32 %v1576_v59 }
 0x300   :  { %11083 = vmatprep.subr.bf16.mxu0 %v12065_v21  ;;  %11104 = vmatprep.subr.bf16.mxu1 %v12065_v21 }
 0x303   :  { %11085 = vmatpush3.bf16.msra.mxu0 %v12385_v16  ;;  %11106 = vmatpush3.bf16.msra.mxu1 %v12373_v13 }
 0x304   :  { %11086 = vmatprep.subr.bf16.mxu0 %v12065_v21  ;;  %11107 = vmatprep.subr.bf16.mxu1 %v12065_v21 }
 0x307   :  { %11088 = vmatpush3.bf16.msra.mxu0 %v12397_v19  ;;  %11109 = vmatpush3.bf16.msra.mxu1 %v12385_v16 }
 0x308   :  { %11089 = vmatprep.subr.bf16.mxu0 %v12065_v21  ;;  %11110 = vmatprep.subr.bf16.mxu1 %v12065_v21 }
 0x30b   :  { %11091 = vmatpush3.bf16.msra.mxu0 %v12409_v24  ;;  %11112 = vmatpush3.bf16.msra.mxu1 %v12397_v19 }
 0x30c   :  { %11092 = vmatprep.subr.bf16.mxu0 %v12065_v21  ;;  %11113 = vmatprep.subr.bf16.mxu1 %v12065_v21 }
 0x30f   :  { %11094 = vmatpush3.bf16.msra.mxu0 %v12421_v27  ;;  %11115 = vmatpush3.bf16.msra.mxu1 %v12409_v24 }
 0x310   :  { %11116 = vmatprep.subr.bf16.mxu1 %v12065_v21  ;;  %11119 = vmatprep.subr.bf16.mxu0 %v12065_v21 }
 0x312   :  { %9716 = vmatmul.mubr.f32.vlgmr.msra.gmra.mrb[28].mxu0 %v1597_v1  ;;  %v2960_v1 = vld [vmem:[%s14020_s9 + $0x78] sm:$0xff] }
 0x313   :  { %11118 = vmatpush3.bf16.msra.mxu1 %v12421_v27  ;;  %11121 = vmatpush3.bf16.msra.mxu0 %v12337_v4  ;;  %v12782_v46 = vpack.c.bf16 %v2960_v1, %v2959_v57 }
 0x314   :  { %11122 = vmatprep.subr.bf16.mxu0 %v12065_v21  ;;  %11143 = vmatprep.subr.bf16.mxu1 %v12065_v21 }
 0x315   :  { %9785 = vmatprep.mubr.msk.f32.mxu0 %vm12066_vm1, %v12067_v22 }
 0x316   :  { %9751 = vmatmul.mubr.f32.vlgmr.msra.gmra.mrb[28].mxu1 %v1598_v55 }
 0x317   :  { %11124 = vmatpush3.bf16.msra.mxu0 %v12349_v7  ;;  %11145 = vmatpush3.bf16.msra.mxu1 %v12337_v4  ;;  %v11819_v4 = vpop.eup %11818 }
 0x318   :  { %11125 = vmatprep.subr.bf16.mxu0 %v12065_v21  ;;  %11146 = vmatprep.subr.bf16.mxu1 %v12065_v21 }
 0x319   :  { %9820 = vmatprep.mubr.msk.f32.mxu1 %vm12066_vm1, %v12067_v22 }
 0x31b   :  { %11127 = vmatpush3.bf16.msra.mxu0 %v12361_v10  ;;  %11148 = vmatpush3.bf16.msra.mxu1 %v12349_v7  ;;  %v11821_v7 = vpop.eup %11820 }
 0x31c   :  { %11128 = vmatprep.subr.bf16.mxu0 %v12065_v21  ;;  %11149 = vmatprep.subr.bf16.mxu1 %v12065_v21 }
 0x31f   :  { %11130 = vmatpush3.bf16.msra.mxu0 %v12373_v13  ;;  %11151 = vmatpush3.bf16.msra.mxu1 %v12361_v10  ;;  %v1535_v10 = vmax.f32 %v12570_v36, 0.0  ;;  %v12722_v36 = vpack.c.bf16 %v2950_v41, %v2949_v5 }
 0x320   :  { %11131 = vmatprep.subr.bf16.mxu0 %v12065_v21  ;;  %11152 = vmatprep.subr.bf16.mxu1 %v12065_v21 }
 0x323   :  { %11133 = vmatpush3.bf16.msra.mxu0 %v12385_v16  ;;  %11154 = vmatpush3.bf16.msra.mxu1 %v12373_v13  ;;  %v1590_v13 = vmul.f32 0.6931472, %v11819_v4 }
 0x324   :  { %11134 = vmatprep.subr.bf16.mxu0 %v12065_v21  ;;  %11155 = vmatprep.subr.bf16.mxu1 %v12065_v21 }
 0x325   :  { %v1599_v63 = vadd.f32 %v1590_v13, %v1535_v10 }
 0x327   :  { %11136 = vmatpush3.bf16.msra.mxu0 %v12397_v19  ;;  %11157 = vmatpush3.bf16.msra.mxu1 %v12385_v16  ;;  %v1592_v16 = vmul.f32 0.6931472, %v11821_v7 }
 0x328   :  { %11137 = vmatprep.subr.bf16.mxu0 %v12065_v21  ;;  %11158 = vmatprep.subr.bf16.mxu1 %v12065_v21 }
 0x32b   :  { %11139 = vmatpush3.bf16.msra.mxu0 %v12409_v24  ;;  %11160 = vmatpush3.bf16.msra.mxu1 %v12397_v19  ;;  %v1600_v19 = vadd.f32 %v1592_v16, %v1536_v8 }
 0x32c   :  { %11140 = vmatprep.subr.bf16.mxu0 %v12065_v21  ;;  %11161 = vmatprep.subr.bf16.mxu1 %v12065_v21 }
 0x32f   :  { %11142 = vmatpush3.bf16.msra.mxu0 %v12421_v27  ;;  %11163 = vmatpush3.bf16.msra.mxu1 %v12409_v24 }
 0x330   :  { %11164 = vmatprep.subr.bf16.mxu1 %v12065_v21  ;;  %9823 = vmatprep.subr.mxu0 %v12067_v22 }
 0x332   :  { %9786 = vmatmul.mubr.f32.vlgmr.msra.gmra.mrb[30].mxu0 %v1599_v63 }
 0x333   :  { %11166 = vmatpush3.bf16.msra.mxu1 %v12421_v27  ;;  %9825 = vmatprep.mubr.msk.f32.mxu0 %vm12066_vm1, %v12067_v22 }
 0x334   :  { %9828 = vmatprep.subr.mxu1 %v12067_v22 }
 0x336   :  { %9821 = vmatmul.mubr.f32.vlgmr.msra.gmra.mrb[30].mxu1 %v1600_v19 }
 0x337   :  { %9830 = vmatprep.mubr.msk.f32.mxu1 %vm12066_vm1, %v12067_v22 }
 0x3a5   :  { %v1683_v11 = vpop.f32.mrb[24].mxu0 }
 0x3a6   :  { %v9577_v24 = vpop.f32.mrb[25].mxu0  ;;  %9824 = vmatpush3.msk.msra.mxu0 %vm831_vm2, %v1683_v11 }
 0x3a7   :  { %9826 = vmatmul.mubr.msk.f32.vlgmr.msra.gmra.mrb[32].mxu0 %vm827_vm3, %v12265_v50  ;;  %9833 = vmatprep.subr.mxu0 %v12067_v22 }
 0x3a8   :  { %9835 = vmatprep.mubr.msk.f32.mxu0 %vm12066_vm1, %v12067_v22 }
 0x3a9   :  { %v1753_v27 = vpop.f32.mrb[24].mxu1 }
 0x3aa   :  { %v9612_v61 = vpop.f32.mrb[25].mxu1  ;;  %9829 = vmatpush3.msk.msra.mxu1 %vm831_vm2, %v1753_v27 }
 0x3ab   :  { %9831 = vmatmul.mubr.msk.f32.vlgmr.msra.gmra.mrb[32].mxu1 %vm827_vm3, %v12274_v52  ;;  %9838 = vmatprep.subr.mxu1 %v12067_v22 }
 0x3ac   :  { %9840 = vmatprep.mubr.msk.f32.mxu1 %vm12066_vm1, %v12067_v22 }
 0x3c5   :  { %v1823_v9 = vpop.f32.mrb[26].mxu0 }
 0x3c6   :  { %v9647_v12 = vpop.f32.mrb[27].mxu0  ;;  %9834 = vmatpush3.msk.msra.mxu0 %vm831_vm2, %v1823_v9 }
 0x3c7   :  { %9836 = vmatmul.mubr.msk.f32.vlgmr.msra.gmra.mrb[34].mxu0 %vm827_vm3, %v12283_v54  ;;  %9843 = vmatprep.subr.mxu0 %v12067_v22 }
 0x3c8   :  { %9845 = vmatprep.mubr.msk.f32.mxu0 %vm12066_vm1, %v12067_v22 }
 0x3c9   :  { %v1893_v14 = vpop.f32.mrb[26].mxu1 }
 0x3ca   :  { %v9682_v15 = vpop.f32.mrb[27].mxu1  ;;  %9839 = vmatpush3.msk.msra.mxu1 %vm831_vm2, %v1893_v14 }
 0x3cb   :  { %9841 = vmatmul.mubr.msk.f32.vlgmr.msra.gmra.mrb[34].mxu1 %vm827_vm3, %v12292_v56  ;;  %9848 = vmatprep.subr.mxu1 %v12067_v22 }
 0x3cc   :  { %9850 = vmatprep.mubr.msk.f32.mxu1 %vm12066_vm1, %v12067_v22 }
 0x3e5   :  { %v1963_v17 = vpop.f32.mrb[28].mxu0 }
 0x3e6   :  { %v9717_v32 = vpop.f32.mrb[29].mxu0  ;;  %9844 = vmatpush3.msk.msra.mxu0 %vm831_vm2, %v1963_v17 }
 0x3e7   :  { %9846 = vmatmul.mubr.msk.f32.vlgmr.msra.gmra.mrb[36].mxu0 %vm827_vm3, %v12301_v58  ;;  %9853 = vmatprep.subr.mxu0 %v12067_v22 }
 0x3e8   :  { %9855 = vmatprep.mubr.msk.f32.mxu0 %vm12066_vm1, %v12067_v22 }
 0x3e9   :  { %v2033_v34 = vpop.f32.mrb[28].mxu1 }
 0x3ea   :  { %v9752_v20 = vpop.f32.mrb[29].mxu1  ;;  %9849 = vmatpush3.msk.msra.mxu1 %vm831_vm2, %v2033_v34 }
 0x3eb   :  { %9851 = vmatmul.mubr.msk.f32.vlgmr.msra.gmra.mrb[36].mxu1 %vm827_vm3, %v12310_v60  ;;  %9858 = vmatprep.subr.mxu1 %v12067_v22 }
 0x3ec   :  { %9860 = vmatprep.mubr.msk.f32.mxu1 %vm12066_vm1, %v12067_v22 }
 0x405   :  { %v2103_v23 = vpop.f32.mrb[30].mxu0 }
 0x406   :  { %v9787_v25 = vpop.f32.mrb[31].mxu0  ;;  %9854 = vmatpush3.msk.msra.mxu0 %vm831_vm2, %v2103_v23 }
 0x407   :  { %9856 = vmatmul.mubr.msk.f32.vlgmr.msra.gmra.mrb[38].mxu0 %vm827_vm3, %v12319_v62  ;;  %11167 = vmatprep.subr.bf16.mxu0 %v12065_v21 }
 0x408   :  { %9895 = vmatprep.mubr.msk.f32.mxu0 %vm12066_vm1, %v12067_v22  ;;  %11169 = vmatpush3.bf16.msra.mxu0 %v12698_v35 }
 0x409   :  { %v2173_v26 = vpop.f32.mrb[30].mxu1  ;;  %11170 = vmatprep.subr.bf16.mxu0 %v12065_v21 }
 0x40a   :  { %9859 = vmatpush3.msk.msra.mxu1 %vm831_vm2, %v2173_v26  ;;  %v9822_v29 = vpop.f32.mrb[31].mxu1 }
 0x40b   :  { %9861 = vmatmul.mubr.msk.f32.vlgmr.msra.gmra.mrb[38].mxu1 %vm827_vm3, %v12325_v0  ;;  %11191 = vmatprep.subr.bf16.mxu1 %v12065_v21 }
 0x40c   :  { %9930 = vmatprep.mubr.msk.f32.mxu1 %vm12066_vm1, %v12067_v22  ;;  %11193 = vmatpush3.bf16.msra.mxu1 %v12698_v35 }
 0x40d   :  { %11194 = vmatprep.subr.bf16.mxu1 %v12065_v21  ;;  %11172 = vmatpush3.bf16.msra.mxu0 %v12710_v38 }
 0x40e   :  { %11173 = vmatprep.subr.bf16.mxu0 %v12065_v21 }
 0x410   :  { %11196 = vmatpush3.bf16.msra.mxu1 %v12710_v38 }
 0x411   :  { %11197 = vmatprep.subr.bf16.mxu1 %v12065_v21  ;;  %11175 = vmatpush3.bf16.msra.mxu0 %v12722_v36 }
 0x412   :  { %11176 = vmatprep.subr.bf16.mxu0 %v12065_v21 }
 0x414   :  { %11199 = vmatpush3.bf16.msra.mxu1 %v12722_v36 }
 0x415   :  { %11200 = vmatprep.subr.bf16.mxu1 %v12065_v21  ;;  %11178 = vmatpush3.bf16.msra.mxu0 %v12734_v40 }
 0x416   :  { %11179 = vmatprep.subr.bf16.mxu0 %v12065_v21 }
 0x418   :  { %11202 = vmatpush3.bf16.msra.mxu1 %v12734_v40 }
 0x419   :  { %11203 = vmatprep.subr.bf16.mxu1 %v12065_v21  ;;  %11181 = vmatpush3.bf16.msra.mxu0 %v12746_v6 }
 0x41a   :  { %11182 = vmatprep.subr.bf16.mxu0 %v12065_v21 }
 0x41c   :  { %11205 = vmatpush3.bf16.msra.mxu1 %v12746_v6 }
 0x41d   :  { %11206 = vmatprep.subr.bf16.mxu1 %v12065_v21  ;;  %11184 = vmatpush3.bf16.msra.mxu0 %v12758_v43 }
 0x41e   :  { %11185 = vmatprep.subr.bf16.mxu0 %v12065_v21 }
 0x420   :  { %11208 = vmatpush3.bf16.msra.mxu1 %v12758_v43 }
 0x421   :  { %11209 = vmatprep.subr.bf16.mxu1 %v12065_v21  ;;  %11187 = vmatpush3.bf16.msra.mxu0 %v12770_v53 }
 0x422   :  { %11188 = vmatprep.subr.bf16.mxu0 %v12065_v21 }
 0x424   :  { %11211 = vmatpush3.bf16.msra.mxu1 %v12770_v53 }
 0x425   :  { %11212 = vmatprep.subr.bf16.mxu1 %v12065_v21  ;;  %11190 = vmatpush3.bf16.msra.mxu0 %v12782_v46 }
 0x426   :  { %11215 = vmatprep.subr.bf16.mxu0 %v12065_v21 }
 0x428   :  { %11214 = vmatpush3.bf16.msra.mxu1 %v12782_v46 }
 0x429   :  { %11239 = vmatprep.subr.bf16.mxu1 %v12065_v21 }
 0x47a   :  { %v2246_v55 = vpop.f32.mrb[32].mxu0 }
 0x47b   :  { %v2761_v2 = vmul.f32 0.85, %v2246_v55  ;;  %v9827_v3 = vpop.f32.mrb[33].mxu0 }
 0x47d   :  { %v2769_v45 = vadd.f32 %v2761_v2, %v12430_v28 }
 0x47e   :  { %v2319_v59 = vpop.f32.mrb[32].mxu1 }
 0x47f   :  { %v2777_v4 = vmax.f32 %v2769_v45, 0.0  ;;  %v2762_v7 = vmul.f32 0.85, %v2319_v59  ;;  %v9832_v10 = vpop.f32.mrb[33].mxu1 }
 0x481   :  { %v2785_v13 = vsel %vm831_vm2, %v2777_v4, 0.0  ;;  %v2770_v8 = vadd.f32 %v2762_v7, %v12430_v28 }
 0x482   :  { %v2786_v16 = vrot.slane %v2785_v13, 4 }
 0x483   :  { %v2778_v63 = vmax.f32 %v2770_v8, 0.0 }
 0x484   :  { %v2787_v19 = vadd.f32 %v2786_v16, %v2785_v13 }
 0x485   :  { %v2792_v11 = vsel %vm831_vm2, %v2778_v63, 0.0 }
 0x486   :  { %v2788_v24 = vrot.slane %v2787_v19, 2  ;;  %v2793_v27 = vrot.slane %v2792_v11, 4 }
 0x488   :  { %v2789_v61 = vadd.f32 %v2788_v24, %v2787_v19  ;;  %v2794_v9 = vadd.f32 %v2793_v27, %v2792_v11 }
 0x48a   :  { %v2790_v12 = vrot.slane %v2789_v61, 1  ;;  %v2795_v14 = vrot.slane %v2794_v9, 2 }
 0x48c   :  { %v2791_v15 = vadd.f32 %v2790_v12, %v2789_v61  ;;  %v2796_v17 = vadd.f32 %v2795_v14, %v2794_v9 }
 0x48e   :  { %v2841_v32 = vmul.f32 0.2, %v2791_v15  ;;  %v2797_v34 = vrot.slane %v2796_v17, 1 }
 0x490   :  { %v2849_v20 = vadd.f32 1e-06, %v2841_v32  ;;  %v2798_v23 = vadd.f32 %v2797_v34, %v2796_v17 }
 0x492   :  { %11822 = vrcp.f32 %v2849_v20  ;;  %v2842_v25 = vmul.f32 0.2, %v2798_v23 }
 0x494   :  { %v2850_v26 = vadd.f32 1e-06, %v2842_v25 }
 0x496   :  { %11824 = vrcp.f32 %v2850_v26 }
 0x49a   :  { %v2392_v29 = vpop.f32.mrb[34].mxu0 }
 0x49b   :  { %v2763_v30 = vmul.f32 0.85, %v2392_v29  ;;  %v9837_v31 = vpop.f32.mrb[35].mxu0 }
 0x49c   :  { %v11823_v48 = vpop.eup %11822  ;;  %v12802_v31 = vld [vmem:[%s14019_s6] sm:$0x1f] }
 0x49d   :  { %v2858_v33 = vmul.f32 %v11823_v48, %v2777_v4  ;;  %v2771_v5 = vadd.f32 %v2763_v30, %v12430_v28 }
 0x49e   :  { %v2465_v41 = vpop.f32.mrb[34].mxu1 }
 0x49f   :  { %v2881_v18 = vand.u32 2147483647, %v2858_v33  ;;  %v2779_v37 = vmax.f32 %v2771_v5, 0.0  ;;  %v2764_v51 = vmul.f32 0.85, %v2465_v41  ;;  %v9842_v49 = vpop.f32.mrb[35].mxu1 }
 0x4a0   :  { %v11825_v39 = vpop.eup %11824  ;;  %v2873_v30 = vmax.f32 %v2858_v33, 0.0 }
 0x4a1   :  { %v2889_v42 = vsub.f32 0.0, %v2881_v18  ;;  %v12793_v44 = vmul.f32 %v11825_v39, %v2778_v63  ;;  %v2799_v47 = vsel %vm831_vm2, %v2779_v37, 0.0  ;;  %v2772_v57 = vadd.f32 %v2764_v51, %v12430_v28 }
 0x4a2   :  { %v2800_v1 = vrot.slane %v2799_v47, 4 }
 0x4a3   :  { %v2897_v55 = vmul.f32 1.442695, %v2889_v42  ;;  %v2882_v2 = vand.u32 2147483647, %v12793_v44  ;;  %v2780_v3 = vmax.f32 %v2772_v57, 0.0 }
 0x4a4   :  { %v2801_v45 = vadd.f32 %v2800_v1, %v2799_v47  ;;  %v2874_v1 = vmax.f32 %v12793_v44, 0.0 }
 0x4a5   :  { %11826 = vpow2.f32 %v2897_v55  ;;  %v2890_v59 = vsub.f32 0.0, %v2882_v2  ;;  %v2806_v4 = vsel %vm831_vm2, %v2780_v3, 0.0 }
 0x4a6   :  { %v2802_v7 = vrot.slane %v2801_v45, 2  ;;  %v2807_v10 = vrot.slane %v2806_v4, 4 }
 0x4a7   :  { %v2899_v13 = vmul.f32 1.442695, %v2890_v59 }
 0x4a8   :  { %v2803_v8 = vadd.f32 %v2802_v7, %v2801_v45  ;;  %v2808_v16 = vadd.f32 %v2807_v10, %v2806_v4 }
 0x4a9   :  { %11828 = vpow2.f32 %v2899_v13 }
 0x4aa   :  { %v2804_v63 = vrot.slane %v2803_v8, 1  ;;  %v2809_v19 = vrot.slane %v2808_v16, 2 }
 0x4ac   :  { %v2805_v11 = vadd.f32 %v2804_v63, %v2803_v8  ;;  %v2810_v28 = vadd.f32 %v2809_v19, %v2808_v16 }
 0x4ae   :  { %v2843_v24 = vmul.f32 0.2, %v2805_v11  ;;  %v2811_v27 = vrot.slane %v2810_v28, 1 }
 0x4af   :  { %v11827_v61 = vpop.eup %11826 }
 0x4b0   :  { %v2913_v9 = vadd.f32 1.0, %v11827_v61  ;;  %v2851_v12 = vadd.f32 1e-06, %v2843_v24  ;;  %v2812_v14 = vadd.f32 %v2811_v27, %v2810_v28 }
 0x4b2   :  { %11830 = vlog2.f32 %v2913_v9  ;;  %v2844_v15 = vmul.f32 0.2, %v2812_v14 }
 0x4b3   :  { %v11829_v17 = vpop.eup %11828  ;;  %11832 = vrcp.f32 %v2851_v12 }
 0x4b4   :  { %v2914_v32 = vadd.f32 1.0, %v11829_v17  ;;  %v2852_v34 = vadd.f32 1e-06, %v2844_v15 }
 0x4b6   :  { %11834 = vlog2.f32 %v2914_v32 }
 0x4b7   :  { %11836 = vrcp.f32 %v2852_v34 }
 0x4ba   :  { %v2538_v20 = vpop.f32.mrb[36].mxu0 }
 0x4bb   :  { %v2765_v23 = vmul.f32 0.85, %v2538_v20  ;;  %v9847_v25 = vpop.f32.mrb[37].mxu0 }
 0x4bc   :  { %v11831_v26 = vpop.eup %11830 }
 0x4bd   :  { %v11833_v29 = vpop.eup %11832  ;;  %v12805_v48 = vadd.f32 %v12802_v31, %v2765_v23  ;;  %v2922_v5 = vmul.f32 0.6931472, %v11831_v26 }
 0x4be   :  { %v12807_v41 = vmul.f32 %v11833_v29, %v2779_v37  ;;  %v2611_v18 = vpop.f32.mrb[36].mxu1 }
 0x4bf   :  { %v2781_v51 = vmax.f32 %v12805_v48, 0.0  ;;  %v2766_v39 = vmul.f32 0.85, %v2611_v18  ;;  %v9852_v49 = vpop.f32.mrb[37].mxu1  ;;  %v2937_v42 = vadd.f32 %v2922_v5, %v2873_v30 }
 0x4c0   :  { %v11835_v47 = vpop.eup %11834  ;;  %v2883_v33 = vand.u32 2147483647, %v12807_v41 }
 0x4c1   :  { %v11837_v57 = vpop.eup %11836  ;;  %v2813_v55 = vsel %vm831_vm2, %v2781_v51, 0.0  ;;  %v12816_v2 = vadd.f32 %v12802_v31, %v2766_v39  ;;  %9896 = vmatmul.mubr.f32.vlgmr.msra.gmra.mrb[40].mxu0 %v2937_v42  ;;  %v2924_v37 = vmul.f32 0.6931472, %v11835_v47 }
 0x4c2   :  { %v2891_v45 = vsub.f32 0.0, %v2883_v33  ;;  %v12818_v59 = vmul.f32 %v11837_v57, %v2780_v3  ;;  %v2814_v4 = vrot.slane %v2813_v55, 4  ;;  %11217 = vmatpush3.bf16.msra.mxu0 %v12698_v35  ;;  %9965 = vmatprep.mubr.msk.f32.mxu0 %vm12066_vm1, %v12067_v22  ;;  %v2875_v33 = vmax.f32 %v12807_v41, 0.0 }
 0x4c3   :  { %v2782_v44 = vmax.f32 %v12816_v2, 0.0  ;;  %11218 = vmatprep.subr.bf16.mxu0 %v12065_v21  ;;  %v2938_v7 = vadd.f32 %v2924_v37, %v2874_v1 }
 0x4c4   :  { %v2901_v10 = vmul.f32 1.442695, %v2891_v45  ;;  %v2884_v13 = vand.u32 2147483647, %v12818_v59  ;;  %v2815_v8 = vadd.f32 %v2814_v4, %v2813_v55 }
 0x4c5   :  { %v2820_v3 = vsel %vm831_vm2, %v2782_v44, 0.0  ;;  %9931 = vmatmul.mubr.f32.vlgmr.msra.gmra.mrb[40].mxu1 %v2938_v7 }
 0x4c6   :  { %11838 = vpow2.f32 %v2901_v10  ;;  %v2892_v16 = vsub.f32 0.0, %v2884_v13  ;;  %v2816_v63 = vrot.slane %v2815_v8, 2  ;;  %v2821_v19 = vrot.slane %v2820_v3, 4  ;;  %11220 = vmatpush3.bf16.msra.mxu0 %v12710_v38  ;;  %11241 = vmatpush3.bf16.msra.mxu1 %v12698_v35 }
 0x4c7   :  { %11221 = vmatprep.subr.bf16.mxu0 %v12065_v21  ;;  %11242 = vmatprep.subr.bf16.mxu1 %v12065_v21 }
 0x4c8   :  { %v2903_v11 = vmul.f32 1.442695, %v2892_v16  ;;  %v2817_v28 = vadd.f32 %v2816_v63, %v2815_v8  ;;  %v2822_v24 = vadd.f32 %v2821_v19, %v2820_v3  ;;  %10000 = vmatprep.mubr.msk.f32.mxu1 %vm12066_vm1, %v12067_v22  ;;  %v2876_v3 = vmax.f32 %v12818_v59, 0.0 }
 0x4ca   :  { %11840 = vpow2.f32 %v2903_v11  ;;  %v2818_v27 = vrot.slane %v2817_v28, 1  ;;  %v2823_v61 = vrot.slane %v2822_v24, 2  ;;  %11223 = vmatpush3.bf16.msra.mxu0 %v12722_v36  ;;  %11244 = vmatpush3.bf16.msra.mxu1 %v12710_v38 }
 0x4cb   :  { %11224 = vmatprep.subr.bf16.mxu0 %v12065_v21  ;;  %11245 = vmatprep.subr.bf16.mxu1 %v12065_v21 }
 0x4cc   :  { %v2819_v9 = vadd.f32 %v2818_v27, %v2817_v28  ;;  %v2824_v12 = vadd.f32 %v2823_v61, %v2822_v24 }
 0x4ce   :  { %v2845_v14 = vmul.f32 0.2, %v2819_v9  ;;  %v2825_v15 = vrot.slane %v2824_v12, 1  ;;  %11226 = vmatpush3.bf16.msra.mxu0 %v12734_v40  ;;  %11247 = vmatpush3.bf16.msra.mxu1 %v12722_v36 }
 0x4cf   :  { %11227 = vmatprep.subr.bf16.mxu0 %v12065_v21  ;;  %11248 = vmatprep.subr.bf16.mxu1 %v12065_v21 }
 0x4d0   :  { %v11839_v17 = vpop.eup %11838  ;;  %v2853_v32 = vadd.f32 1e-06, %v2845_v14  ;;  %v2826_v34 = vadd.f32 %v2825_v15, %v2824_v12 }
 0x4d1   :  { %v2915_v20 = vadd.f32 1.0, %v11839_v17 }
 0x4d2   :  { %11842 = vrcp.f32 %v2853_v32  ;;  %v2846_v23 = vmul.f32 0.2, %v2826_v34  ;;  %11229 = vmatpush3.bf16.msra.mxu0 %v12746_v6  ;;  %11250 = vmatpush3.bf16.msra.mxu1 %v12734_v40 }
 0x4d3   :  { %11844 = vlog2.f32 %v2915_v20  ;;  %11230 = vmatprep.subr.bf16.mxu0 %v12065_v21  ;;  %11251 = vmatprep.subr.bf16.mxu1 %v12065_v21 }
 0x4d4   :  { %v11841_v25 = vpop.eup %11840  ;;  %v2854_v26 = vadd.f32 1e-06, %v2846_v23 }
 0x4d5   :  { %v2916_v29 = vadd.f32 1.0, %v11841_v25 }
 0x4d6   :  { %11846 = vrcp.f32 %v2854_v26  ;;  %11232 = vmatpush3.bf16.msra.mxu0 %v12758_v43  ;;  %11253 = vmatpush3.bf16.msra.mxu1 %v12746_v6 }
 0x4d7   :  { %11848 = vlog2.f32 %v2916_v29  ;;  %11233 = vmatprep.subr.bf16.mxu0 %v12065_v21  ;;  %11254 = vmatprep.subr.bf16.mxu1 %v12065_v21 }
 0x4da   :  { %v2684_v30 = vpop.f32.mrb[38].mxu0  ;;  %11235 = vmatpush3.bf16.msra.mxu0 %v12770_v53  ;;  %11256 = vmatpush3.bf16.msra.mxu1 %v12758_v43 }
 0x4db   :  { %v2767_v5 = vmul.f32 0.85, %v2684_v30  ;;  %v9857_v18 = vpop.f32.mrb[39].mxu0  ;;  %11236 = vmatprep.subr.bf16.mxu0 %v12065_v21  ;;  %11257 = vmatprep.subr.bf16.mxu1 %v12065_v21 }
 0x4dc   :  { %v11843_v39 = vpop.eup %11842 }
 0x4dd   :  { %v11845_v49 = vpop.eup %11844  ;;  %v12857_v42 = vmul.f32 %v11843_v39, %v2781_v51  ;;  %v12860_v47 = vadd.f32 %v12802_v31, %v2767_v5 }
 0x4de   :  { %v2757_v57 = vpop.f32.mrb[38].mxu1  ;;  %11238 = vmatpush3.bf16.msra.mxu0 %v12782_v46  ;;  %11259 = vmatpush3.bf16.msra.mxu1 %v12770_v53  ;;  %v2926_v1 = vmul.f32 0.6931472, %v11845_v49 }
 0x4df   :  { %v2885_v55 = vand.u32 2147483647, %v12857_v42  ;;  %v2783_v37 = vmax.f32 %v12860_v47, 0.0  ;;  %v2768_v45 = vmul.f32 0.85, %v2757_v57  ;;  %11260 = vmatprep.subr.bf16.mxu1 %v12065_v21  ;;  %11263 = vmatprep.subr.bf16.mxu0 %v12065_v21  ;;  %v9862_v51 = vpop.f32.mrb[39].mxu1 }
 0x4e0   :  { %v11847_v48 = vpop.eup %11846  ;;  %v2939_v4 = vadd.f32 %v2926_v1, %v2875_v33  ;;  %v2877_v1 = vmax.f32 %v12857_v42, 0.0 }
 0x4e1   :  { %v11849_v7 = vpop.eup %11848  ;;  %v2893_v41 = vsub.f32 0.0, %v2885_v55  ;;  %v12871_v10 = vmul.f32 %v11847_v48, %v2782_v44  ;;  %v2827_v13 = vsel %vm831_vm2, %v2783_v37, 0.0  ;;  %v12877_v8 = vadd.f32 %v12802_v31, %v2768_v45 }
 0x4e2   :  { %v2828_v16 = vrot.slane %v2827_v13, 4  ;;  %9966 = vmatmul.mubr.f32.vlgmr.msra.gmra.mrb[42].mxu0 %v2939_v4  ;;  %11262 = vmatpush3.bf16.msra.mxu1 %v12782_v46  ;;  %v2928_v63 = vmul.f32 0.6931472, %v11849_v7 }
 0x4e3   :  { %v2905_v19 = vmul.f32 1.442695, %v2893_v41  ;;  %v2886_v11 = vand.u32 2147483647, %v12871_v10  ;;  %v2784_v2 = vmax.f32 %v12877_v8, 0.0  ;;  %11265 = vmatpush3.bf16.msra.mxu0 %v12698_v35  ;;  %11287 = vmatprep.subr.bf16.mxu1 %v12065_v21  ;;  %v2878_v42 = vmax.f32 %v12871_v10, 0.0 }
 0x4e4   :  { %v2829_v44 = vadd.f32 %v2828_v16, %v2827_v13  ;;  %v2940_v28 = vadd.f32 %v2928_v63, %v2876_v3  ;;  %11266 = vmatprep.subr.bf16.mxu0 %v12065_v21  ;;  %10035 = vmatprep.mubr.msk.f32.mxu0 %vm12066_vm1, %v12067_v22 }
 0x4e5   :  { %11850 = vpow2.f32 %v2905_v19  ;;  %v2894_v59 = vsub.f32 0.0, %v2886_v11  ;;  %v2834_v24 = vsel %vm831_vm2, %v2784_v2, 0.0 }
 0x4e6   :  { %v2830_v27 = vrot.slane %v2829_v44, 2  ;;  %v2835_v61 = vrot.slane %v2834_v24, 4  ;;  %10001 = vmatmul.mubr.f32.vlgmr.msra.gmra.mrb[42].mxu1 %v2940_v28 }
 0x4e7   :  { %v2907_v9 = vmul.f32 1.442695, %v2894_v59  ;;  %11268 = vmatpush3.bf16.msra.mxu0 %v12710_v38  ;;  %11289 = vmatpush3.bf16.msra.mxu1 %v12698_v35 }
 0x4e8   :  { %v2831_v12 = vadd.f32 %v2830_v27, %v2829_v44  ;;  %v2836_v14 = vadd.f32 %v2835_v61, %v2834_v24  ;;  %11269 = vmatprep.subr.bf16.mxu0 %v12065_v21  ;;  %11290 = vmatprep.subr.bf16.mxu1 %v12065_v21 }
 0x4e9   :  { %11852 = vpow2.f32 %v2907_v9  ;;  %10070 = vmatprep.mubr.msk.f32.mxu1 %vm12066_vm1, %v12067_v22 }
 0x4ea   :  { %v2832_v15 = vrot.slane %v2831_v12, 1  ;;  %v2837_v17 = vrot.slane %v2836_v14, 2 }
 0x4eb   :  { %11271 = vmatpush3.bf16.msra.mxu0 %v12722_v36  ;;  %11292 = vmatpush3.bf16.msra.mxu1 %v12710_v38 }
 0x4ec   :  { %v2833_v32 = vadd.f32 %v2832_v15, %v2831_v12  ;;  %v2838_v34 = vadd.f32 %v2837_v17, %v2836_v14  ;;  %11272 = vmatprep.subr.bf16.mxu0 %v12065_v21  ;;  %11293 = vmatprep.subr.bf16.mxu1 %v12065_v21 }
 0x4ee   :  { %v2847_v20 = vmul.f32 0.2, %v2833_v32  ;;  %v2839_v23 = vrot.slane %v2838_v34, 1 }
 0x4ef   :  { %v11851_v25 = vpop.eup %11850  ;;  %11274 = vmatpush3.bf16.msra.mxu0 %v12734_v40  ;;  %11295 = vmatpush3.bf16.msra.mxu1 %v12722_v36 }
 0x4f0   :  { %v2917_v26 = vadd.f32 1.0, %v11851_v25  ;;  %v2855_v29 = vadd.f32 1e-06, %v2847_v20  ;;  %v2840_v30 = vadd.f32 %v2839_v23, %v2838_v34  ;;  %11275 = vmatprep.subr.bf16.mxu0 %v12065_v21  ;;  %11296 = vmatprep.subr.bf16.mxu1 %v12065_v21  ;;  %v4304_v23 = vld [vmem:[%s14022_s1 + $0x8] sm:$0xff] }
 0x4f2   :  { %11854 = vlog2.f32 %v2917_v26  ;;  %v2848_v5 = vmul.f32 0.2, %v2840_v30  ;;  %v4305_v26 = vld [vmem:[%s14022_s1 + $0x10] sm:$0xff]  ;;  %v4307_v30 = vld [vmem:[%s14022_s1 + $0x20] sm:$0xff] }
 0x4f3   :  { %v11853_v18 = vpop.eup %11852  ;;  %11856 = vrcp.f32 %v2855_v29  ;;  %11277 = vmatpush3.bf16.msra.mxu0 %v12746_v6  ;;  %11298 = vmatpush3.bf16.msra.mxu1 %v12734_v40 }
 0x4f4   :  { %v2918_v39 = vadd.f32 1.0, %v11853_v18  ;;  %v2856_v49 = vadd.f32 1e-06, %v2848_v5  ;;  %11278 = vmatprep.subr.bf16.mxu0 %v12065_v21  ;;  %11299 = vmatprep.subr.bf16.mxu1 %v12065_v21  ;;  %v4309_v5 = vld [vmem:[%s14022_s1 + $0x30] sm:$0xff]  ;;  %v4310_v18 = vld [vmem:[%s14022_s1 + $0x38] sm:$0xff] }
 0x4f6   :  { %11858 = vlog2.f32 %v2918_v39  ;;  %v4311_v39 = vld [vmem:[%s14022_s1 + $0x40] sm:$0xff] }
 0x4f7   :  { %11860 = vrcp.f32 %v2856_v49  ;;  %11280 = vmatpush3.bf16.msra.mxu0 %v12758_v43  ;;  %11301 = vmatpush3.bf16.msra.mxu1 %v12746_v6  ;;  %v4312_v49 = vld [vmem:[%s14022_s1 + $0x48] sm:$0xff] }
 0x4f8   :  { %11281 = vmatprep.subr.bf16.mxu0 %v12065_v21  ;;  %11302 = vmatprep.subr.bf16.mxu1 %v12065_v21 }
 0x4fb   :  { %11283 = vmatpush3.bf16.msra.mxu0 %v12770_v53  ;;  %11304 = vmatpush3.bf16.msra.mxu1 %v12758_v43 }
 0x4fc   :  { %v11855_v33 = vpop.eup %11854  ;;  %11284 = vmatprep.subr.bf16.mxu0 %v12065_v21  ;;  %11305 = vmatprep.subr.bf16.mxu1 %v12065_v21 }
 0x4fd   :  { %v11857_v57 = vpop.eup %11856  ;;  %v2930_v55 = vmul.f32 0.6931472, %v11855_v33  ;;  %v4313_v33 = vld [vmem:[%s14022_s1 + $0x50] sm:$0xff] }
 0x4fe   :  { %v12920_v45 = vmul.f32 %v11857_v57, %v2783_v37  ;;  %v4314_v57 = vld [vmem:[%s14022_s1 + $0x58] sm:$0xff] }
 0x4ff   :  { %11286 = vmatpush3.bf16.msra.mxu0 %v12782_v46  ;;  %11307 = vmatpush3.bf16.msra.mxu1 %v12770_v53  ;;  %v2941_v48 = vadd.f32 %v2930_v55, %v2877_v1  ;;  %v4315_v1 = vld [vmem:[%s14022_s1 + $0x60] sm:$0xff]  ;;  %v4316_v55 = vld [vmem:[%s14022_s1 + $0x68] sm:$0xff] }
 0x500   :  { %v11859_v51 = vpop.eup %11858  ;;  %v2887_v4 = vand.u32 2147483647, %v12920_v45  ;;  %11308 = vmatprep.subr.bf16.mxu1 %v12065_v21  ;;  %11311 = vmatprep.subr.bf16.mxu0 %v12065_v21 }
 0x501   :  { %v11861_v7 = vpop.eup %11860  ;;  %v2932_v41 = vmul.f32 0.6931472, %v11859_v51 }
 0x502   :  { %v2895_v13 = vsub.f32 0.0, %v2887_v4  ;;  %v2872_v47 = vmul.f32 %v11861_v7, %v2784_v2  ;;  %10036 = vmatmul.mubr.f32.vlgmr.msra.gmra.mrb[44].mxu0 %v2941_v48  ;;  %v4318_v48 = vld [vmem:[%s14022_s1 + $0x78] sm:$0xff] }
 0x503   :  { %11310 = vmatpush3.bf16.msra.mxu1 %v12782_v46  ;;  %11313 = vmatpush3.bf16.msra.mxu0 %v12698_v35  ;;  %v2942_v37 = vadd.f32 %v2932_v41, %v2878_v42 }
 0x504   :  { %v2909_v3 = vmul.f32 1.442695, %v2895_v13  ;;  %v2888_v16 = vand.u32 2147483647, %v2872_v47  ;;  %11314 = vmatprep.subr.bf16.mxu0 %v12065_v21  ;;  %11335 = vmatprep.subr.bf16.mxu1 %v12065_v21  ;;  %v2880_v44 = vmax.f32 %v2872_v47, 0.0 }
 0x505   :  { %10105 = vmatprep.mubr.msk.f32.mxu0 %vm12066_vm1, %v12067_v22 }
 0x506   :  { %11862 = vpow2.f32 %v2909_v3  ;;  %v2896_v10 = vsub.f32 0.0, %v2888_v16  ;;  %10071 = vmatmul.mubr.f32.vlgmr.msra.gmra.mrb[44].mxu1 %v2942_v37 }
 0x507   :  { %11316 = vmatpush3.bf16.msra.mxu0 %v12710_v38  ;;  %11337 = vmatpush3.bf16.msra.mxu1 %v12698_v35 }
 0x508   :  { %v2911_v8 = vmul.f32 1.442695, %v2896_v10  ;;  %11317 = vmatprep.subr.bf16.mxu0 %v12065_v21  ;;  %11338 = vmatprep.subr.bf16.mxu1 %v12065_v21 }
 0x509   :  { %10140 = vmatprep.mubr.msk.f32.mxu1 %vm12066_vm1, %v12067_v22 }
 0x50a   :  { %11864 = vpow2.f32 %v2911_v8 }
 0x50b   :  { %11319 = vmatpush3.bf16.msra.mxu0 %v12722_v36  ;;  %11340 = vmatpush3.bf16.msra.mxu1 %v12710_v38 }
 0x50c   :  { %11320 = vmatprep.subr.bf16.mxu0 %v12065_v21  ;;  %11341 = vmatprep.subr.bf16.mxu1 %v12065_v21 }
 0x50f   :  { %11322 = vmatpush3.bf16.msra.mxu0 %v12734_v40  ;;  %11343 = vmatpush3.bf16.msra.mxu1 %v12722_v36 }
 0x510   :  { %v11863_v35 = vpop.eup %11862  ;;  %11323 = vmatprep.subr.bf16.mxu0 %v12065_v21  ;;  %11344 = vmatprep.subr.bf16.mxu1 %v12065_v21 }
 0x511   :  { %v2919_v63 = vadd.f32 1.0, %v11863_v35 }
 0x513   :  { %11866 = vlog2.f32 %v2919_v63  ;;  %11325 = vmatpush3.bf16.msra.mxu0 %v12746_v6  ;;  %11346 = vmatpush3.bf16.msra.mxu1 %v12734_v40  ;;  %v2879_v40 = vmax.f32 %v12920_v45, 0.0  ;;  %v4317_v45 = vld [vmem:[%s14022_s1 + $0x70] sm:$0xff] }
 0x514   :  { %v11865_v38 = vpop.eup %11864  ;;  %11326 = vmatprep.subr.bf16.mxu0 %v12065_v21  ;;  %11347 = vmatprep.subr.bf16.mxu1 %v12065_v21 }
 0x515   :  { %v2920_v19 = vadd.f32 1.0, %v11865_v38 }
 0x517   :  { %11868 = vlog2.f32 %v2920_v19  ;;  %11328 = vmatpush3.bf16.msra.mxu0 %v12758_v43  ;;  %11349 = vmatpush3.bf16.msra.mxu1 %v12746_v6 }
 0x518   :  { %11329 = vmatprep.subr.bf16.mxu0 %v12065_v21  ;;  %11350 = vmatprep.subr.bf16.mxu1 %v12065_v21 }
 0x51b   :  { %11331 = vmatpush3.bf16.msra.mxu0 %v12770_v53  ;;  %11352 = vmatpush3.bf16.msra.mxu1 %v12758_v43 }
 0x51c   :  { %11332 = vmatprep.subr.bf16.mxu0 %v12065_v21  ;;  %11353 = vmatprep.subr.bf16.mxu1 %v12065_v21 }
 0x51d   :  { %v11867_v36 = vpop.eup %11866 }
 0x51e   :  { %v2934_v11 = vmul.f32 0.6931472, %v11867_v36 }
 0x51f   :  { %11334 = vmatpush3.bf16.msra.mxu0 %v12782_v46  ;;  %11355 = vmatpush3.bf16.msra.mxu1 %v12770_v53 }
 0x520   :  { %v2943_v6 = vadd.f32 %v2934_v11, %v2879_v40  ;;  %11356 = vmatprep.subr.bf16.mxu1 %v12065_v21  ;;  %10143 = vmatprep.subr.mxu0 %v12067_v22 }
 0x521   :  { %v11869_v2 = vpop.eup %11868 }
 0x522   :  { %10106 = vmatmul.mubr.f32.vlgmr.msra.gmra.mrb[46].mxu0 %v2943_v6  ;;  %v2936_v43 = vmul.f32 0.6931472, %v11869_v2 }
 0x523   :  { %11358 = vmatpush3.bf16.msra.mxu1 %v12782_v46  ;;  %10145 = vmatprep.mubr.msk.f32.mxu0 %vm12066_vm1, %v12067_v22 }
 0x524   :  { %v2944_v28 = vadd.f32 %v2936_v43, %v2880_v44  ;;  %10148 = vmatprep.subr.mxu1 %v12067_v22 }
 0x526   :  { %10141 = vmatmul.mubr.f32.vlgmr.msra.gmra.mrb[46].mxu1 %v2944_v28 }
 0x527   :  { %10150 = vmatprep.mubr.msk.f32.mxu1 %vm12066_vm1, %v12067_v22 }
 0x594   :  { %v3027_v53 = vpop.f32.mrb[40].mxu0 }
 0x595   :  { %v9897_v59 = vpop.f32.mrb[41].mxu0  ;;  %10144 = vmatpush3.msk.msra.mxu0 %vm831_vm2, %v3027_v53 }
 0x596   :  { %10146 = vmatmul.mubr.msk.f32.vlgmr.msra.gmra.mrb[48].mxu0 %vm827_vm3, %v12265_v50  ;;  %10153 = vmatprep.subr.mxu0 %v12067_v22 }
 0x597   :  { %10155 = vmatprep.mubr.msk.f32.mxu0 %vm12066_vm1, %v12067_v22 }
 0x598   :  { %v3097_v46 = vpop.f32.mrb[40].mxu1 }
 0x599   :  { %v9932_v24 = vpop.f32.mrb[41].mxu1  ;;  %10149 = vmatpush3.msk.msra.mxu1 %vm831_vm2, %v3097_v46 }
 0x59a   :  { %10151 = vmatmul.mubr.msk.f32.vlgmr.msra.gmra.mrb[48].mxu1 %vm827_vm3, %v12274_v52  ;;  %10158 = vmatprep.subr.mxu1 %v12067_v22 }
 0x59b   :  { %10160 = vmatprep.mubr.msk.f32.mxu1 %vm12066_vm1, %v12067_v22 }
 0x5b5   :  { %v3167_v27 = vpop.f32.mrb[42].mxu0 }
 0x5b6   :  { %v9967_v61 = vpop.f32.mrb[43].mxu0  ;;  %10154 = vmatpush3.msk.msra.mxu0 %vm831_vm2, %v3167_v27 }
 0x5b7   :  { %10156 = vmatmul.mubr.msk.f32.vlgmr.msra.gmra.mrb[50].mxu0 %vm827_vm3, %v12283_v54  ;;  %10163 = vmatprep.subr.mxu0 %v12067_v22 }
 0x5b8   :  { %10165 = vmatprep.mubr.msk.f32.mxu0 %vm12066_vm1, %v12067_v22 }
 0x5b9   :  { %v3237_v50 = vpop.f32.mrb[42].mxu1 }
 0x5ba   :  { %v10002_v9 = vpop.f32.mrb[43].mxu1  ;;  %10159 = vmatpush3.msk.msra.mxu1 %vm831_vm2, %v3237_v50 }
 0x5bb   :  { %10161 = vmatmul.mubr.msk.f32.vlgmr.msra.gmra.mrb[50].mxu1 %vm827_vm3, %v12292_v56  ;;  %10168 = vmatprep.subr.mxu1 %v12067_v22  ;;  %v4297_v56 = vld [vmem:[%s14021_s4] sm:$0xff] }
 0x5bc   :  { %10170 = vmatprep.mubr.msk.f32.mxu1 %vm12066_vm1, %v12067_v22  ;;  %v4299_v15 = vmax.f32 %v4297_v56, 0.0 }
 0x5d5   :  { %v3307_v52 = vpop.f32.mrb[44].mxu0 }
 0x5d6   :  { %v10037_v12 = vpop.f32.mrb[45].mxu0  ;;  %10164 = vmatpush3.msk.msra.mxu0 %vm831_vm2, %v3307_v52 }
 0x5d7   :  { %10166 = vmatmul.mubr.msk.f32.vlgmr.msra.gmra.mrb[52].mxu0 %vm827_vm3, %v12301_v58  ;;  %10173 = vmatprep.subr.mxu0 %v12067_v22  ;;  %v4298_v58 = vld [vmem:[%s14021_s4 + $0x8] sm:$0xff] }
 0x5d8   :  { %10175 = vmatprep.mubr.msk.f32.mxu0 %vm12066_vm1, %v12067_v22  ;;  %v4300_v17 = vmax.f32 %v4298_v58, 0.0 }
 0x5d9   :  { %v3377_v54 = vpop.f32.mrb[44].mxu1 }
 0x5da   :  { %v10072_v14 = vpop.f32.mrb[45].mxu1  ;;  %10169 = vmatpush3.msk.msra.mxu1 %vm831_vm2, %v3377_v54  ;;  %v11359_v32 = vpack.c.bf16 %v4300_v17, %v4299_v15 }
 0x5db   :  { %10171 = vmatmul.mubr.msk.f32.vlgmr.msra.gmra.mrb[52].mxu1 %vm827_vm3, %v12310_v60  ;;  %10178 = vmatprep.subr.mxu1 %v12067_v22  ;;  %v4303_v60 = vld [vmem:[%s14022_s1] sm:$0xff] }
 0x5dc   :  { %10180 = vmatprep.mubr.msk.f32.mxu1 %vm12066_vm1, %v12067_v22 }
 0x5f5   :  { %v3447_v34 = vpop.f32.mrb[46].mxu0 }
 0x5f6   :  { %v10107_v20 = vpop.f32.mrb[47].mxu0  ;;  %10174 = vmatpush3.msk.msra.mxu0 %vm831_vm2, %v3447_v34 }
 0x5f7   :  { %10176 = vmatmul.mubr.msk.f32.vlgmr.msra.gmra.mrb[54].mxu0 %vm827_vm3, %v12319_v62  ;;  %11360 = vmatprep.subr.bf16.mxu0 %v11359_v32  ;;  %v4306_v62 = vld [vmem:[%s14022_s1 + $0x18] sm:$0xff] }
 0x5f8   :  { %11362 = vmatpush3.bf16.msra.mxu0 %v11359_v32  ;;  %10187 = vmatprep.mubr.msk.f32.mxu0 %vm69_vm0, %v4303_v60 }
 0x5f9   :  { %v3517_v25 = vpop.f32.mrb[46].mxu1  ;;  %10267 = vmatprep.subr.mxu0 %v12067_v22 }
 0x5fa   :  { %v10142_v29 = vpop.f32.mrb[47].mxu1  ;;  %10179 = vmatpush3.msk.msra.mxu1 %vm831_vm2, %v3517_v25 }
 0x5fb   :  { %10181 = vmatmul.mubr.msk.f32.vlgmr.msra.gmra.mrb[54].mxu1 %vm827_vm3, %v12325_v0  ;;  %10188 = vmatmul.mubr.msk.f32.vlgmr.msra.gmra.mrb[56].mxu0 %vm69_vm0, %v4304_v23  ;;  %v4308_v0 = vld [vmem:[%s14022_s1 + $0x28] sm:$0xff] }
 0x5fc   :  { %10190 = vmatprep.mubr.msk.f32.mxu0 %vm69_vm0, %v4305_v26  ;;  %11363 = vmatprep.subr.bf16.mxu1 %v12065_v21 }
 0x5fd   :  { %10215 = vmatprep.mubr.msk.f32.mxu1 %vm12066_vm1, %v12067_v22 }
 0x5ff   :  { %10191 = vmatmul.mubr.msk.f32.gmra.mrb[58].mxu0 %vm69_vm0, %v4306_v62 }
 0x600   :  { %10193 = vmatprep.mubr.msk.f32.mxu0 %vm69_vm0, %v4307_v30 }
 0x603   :  { %10194 = vmatmul.mubr.msk.f32.gmra.mrb[60].mxu0 %vm69_vm0, %v4308_v0 }
 0x604   :  { %10196 = vmatprep.mubr.msk.f32.mxu0 %vm69_vm0, %v4309_v5 }
 0x607   :  { %10197 = vmatmul.mubr.msk.f32.gmra.mrb[62].mxu0 %vm69_vm0, %v4310_v18 }
 0x608   :  { %10199 = vmatprep.mubr.msk.f32.mxu0 %vm69_vm0, %v4311_v39 }
 0x60b   :  { %10200 = vmatmul.mubr.msk.f32.gmra.mrb[64].mxu0 %vm69_vm0, %v4312_v49  ;;  %v13105_v49 = vld [vmem:[%s14023_s10] sm:$0x1f] }
 0x60c   :  { %10202 = vmatprep.mubr.msk.f32.mxu0 %vm69_vm0, %v4313_v33  ;;  %10268 = vmatpush3.msk.msra.mxu0 %vm831_vm2, %v13105_v49 }
 0x60d   :  { %10277 = vmatprep.subr.mxu0 %v12067_v22 }
 0x60f   :  { %10203 = vmatmul.mubr.msk.f32.gmra.mrb[66].mxu0 %vm69_vm0, %v4314_v57 }
 0x610   :  { %10205 = vmatprep.mubr.msk.f32.mxu0 %vm69_vm0, %v4315_v1 }
 0x613   :  { %10206 = vmatmul.mubr.msk.f32.gmra.mrb[68].mxu0 %vm69_vm0, %v4316_v55 }
 0x614   :  { %10208 = vmatprep.mubr.msk.f32.mxu0 %vm69_vm0, %v4317_v45 }
 0x617   :  { %10209 = vmatmul.mubr.msk.f32.gmra.mrb[70].mxu0 %vm69_vm0, %v4318_v48 }
 0x618   :  { %10269 = vmatprep.mubr.msk.f32.mxu0 %vm12066_vm1, %v12067_v22 }
 0x669   :  { %v3590_v51 = vpop.f32.mrb[48].mxu0 }
 0x66a   :  { %v4105_v4 = vmul.f32 0.85, %v3590_v51  ;;  %v10147_v7 = vpop.f32.mrb[49].mxu0 }
 0x66c   :  { %v4113_v42 = vadd.f32 %v12802_v31, %v4105_v4 }
 0x66d   :  { %v3663_v41 = vpop.f32.mrb[48].mxu1 }
 0x66e   :  { %v4121_v13 = vmax.f32 %v4113_v42, 0.0  ;;  %v4106_v47 = vmul.f32 0.85, %v3663_v41  ;;  %v10152_v37 = vpop.f32.mrb[49].mxu1 }
 0x670   :  { %v4129_v3 = vsel %vm831_vm2, %v4121_v13, 0.0  ;;  %v4114_v16 = vadd.f32 %v12802_v31, %v4106_v47 }
 0x671   :  { %v4130_v10 = vrot.slane %v4129_v3, 4 }
 0x672   :  { %v4122_v8 = vmax.f32 %v4114_v16, 0.0 }
 0x673   :  { %v4131_v35 = vadd.f32 %v4130_v10, %v4129_v3 }
 0x674   :  { %v4136_v63 = vsel %vm831_vm2, %v4122_v8, 0.0 }
 0x675   :  { %v4132_v38 = vrot.slane %v4131_v35, 2  ;;  %v4137_v19 = vrot.slane %v4136_v63, 4 }
 0x677   :  { %v4133_v36 = vadd.f32 %v4132_v38, %v4131_v35  ;;  %v4138_v40 = vadd.f32 %v4137_v19, %v4136_v63 }
 0x679   :  { %v4134_v11 = vrot.slane %v4133_v36, 1  ;;  %v4139_v6 = vrot.slane %v4138_v40, 2 }
 0x67b   :  { %v4135_v2 = vadd.f32 %v4134_v11, %v4133_v36  ;;  %v4140_v44 = vadd.f32 %v4139_v6, %v4138_v40 }
 0x67d   :  { %v4185_v43 = vmul.f32 0.2, %v4135_v2  ;;  %v4141_v28 = vrot.slane %v4140_v44, 1 }
 0x67f   :  { %v4193_v53 = vadd.f32 1e-06, %v4185_v43  ;;  %v4142_v59 = vadd.f32 %v4141_v28, %v4140_v44 }
 0x681   :  { %11870 = vrcp.f32 %v4193_v53  ;;  %v4186_v46 = vmul.f32 0.2, %v4142_v59 }
 0x683   :  { %v4194_v24 = vadd.f32 1e-06, %v4186_v46 }
 0x685   :  { %11872 = vrcp.f32 %v4194_v24 }
 0x68a   :  { %v3736_v27 = vpop.f32.mrb[50].mxu0 }
 0x68b   :  { %v11871_v61 = vpop.eup %11870  ;;  %v4107_v50 = vmul.f32 0.85, %v3736_v27  ;;  %v10157_v9 = vpop.f32.mrb[51].mxu0 }
 0x68c   :  { %v4202_v52 = vmul.f32 %v11871_v61, %v4121_v13 }
 0x68d   :  { %v4115_v12 = vadd.f32 %v12802_v31, %v4107_v50 }
 0x68e   :  { %v4225_v54 = vand.u32 2147483647, %v4202_v52  ;;  %v3809_v14 = vpop.f32.mrb[50].mxu1  ;;  %v4217_v19 = vmax.f32 %v4202_v52, 0.0 }
 0x68f   :  { %v11873_v56 = vpop.eup %11872  ;;  %v4123_v58 = vmax.f32 %v4115_v12, 0.0  ;;  %v4108_v15 = vmul.f32 0.85, %v3809_v14  ;;  %v10162_v17 = vpop.f32.mrb[51].mxu1 }
 0x690   :  { %v4233_v32 = vsub.f32 0.0, %v4225_v54  ;;  %v13096_v34 = vmul.f32 %v11873_v56, %v4122_v8 }
 0x691   :  { %v4143_v60 = vsel %vm831_vm2, %v4123_v58, 0.0  ;;  %v4116_v20 = vadd.f32 %v12802_v31, %v4108_v15 }
 0x692   :  { %v4241_v23 = vmul.f32 1.442695, %v4233_v32  ;;  %v4226_v25 = vand.u32 2147483647, %v13096_v34  ;;  %v4144_v26 = vrot.slane %v4143_v60, 4  ;;  %v4218_v46 = vmax.f32 %v13096_v34, 0.0 }
 0x693   :  { %v4124_v29 = vmax.f32 %v4116_v20, 0.0 }
 0x694   :  { %11874 = vpow2.f32 %v4241_v23  ;;  %v4234_v62 = vsub.f32 0.0, %v4226_v25  ;;  %v4145_v30 = vadd.f32 %v4144_v26, %v4143_v60 }
 0x695   :  { %v4150_v0 = vsel %vm831_vm2, %v4124_v29, 0.0 }
 0x696   :  { %v4243_v5 = vmul.f32 1.442695, %v4234_v62  ;;  %v4146_v18 = vrot.slane %v4145_v30, 2  ;;  %v4151_v39 = vrot.slane %v4150_v0, 4 }
 0x698   :  { %11876 = vpow2.f32 %v4243_v5  ;;  %v4147_v33 = vadd.f32 %v4146_v18, %v4145_v30  ;;  %v4152_v57 = vadd.f32 %v4151_v39, %v4150_v0 }
 0x69a   :  { %v4148_v1 = vrot.slane %v4147_v33, 1  ;;  %v4153_v55 = vrot.slane %v4152_v57, 2 }
 0x69c   :  { %v4149_v45 = vadd.f32 %v4148_v1, %v4147_v33  ;;  %v4154_v48 = vadd.f32 %v4153_v55, %v4152_v57 }
 0x69e   :  { %v11875_v51 = vpop.eup %11874  ;;  %v4187_v4 = vmul.f32 0.2, %v4149_v45  ;;  %v4155_v7 = vrot.slane %v4154_v48, 1 }
 0x69f   :  { %v4257_v42 = vadd.f32 1.0, %v11875_v51 }
 0x6a0   :  { %v4195_v41 = vadd.f32 1e-06, %v4187_v4  ;;  %v4156_v13 = vadd.f32 %v4155_v7, %v4154_v48 }
 0x6a1   :  { %11878 = vlog2.f32 %v4257_v42 }
 0x6a2   :  { %v11877_v47 = vpop.eup %11876  ;;  %11880 = vrcp.f32 %v4195_v41  ;;  %v4188_v37 = vmul.f32 0.2, %v4156_v13 }
 0x6a3   :  { %v4258_v3 = vadd.f32 1.0, %v11877_v47 }
 0x6a4   :  { %v4196_v16 = vadd.f32 1e-06, %v4188_v37 }
 0x6a5   :  { %11882 = vlog2.f32 %v4258_v3  ;;  %v4301_v3 = vld [vmem:[%s14025_s5] sm:$0x1f] }
 0x6a6   :  { %11884 = vrcp.f32 %v4196_v16 }
 0x6aa   :  { %v3882_v10 = vpop.f32.mrb[52].mxu0 }
 0x6ab   :  { %v11879_v8 = vpop.eup %11878  ;;  %v4109_v35 = vmul.f32 0.85, %v3882_v10  ;;  %v10167_v63 = vpop.f32.mrb[53].mxu0 }
 0x6ac   :  { %v11881_v38 = vpop.eup %11880  ;;  %v4266_v36 = vmul.f32 0.6931472, %v11879_v8 }
 0x6ad   :  { %v13110_v40 = vmul.f32 %v11881_v38, %v4123_v58  ;;  %v4117_v11 = vadd.f32 %v12802_v31, %v4109_v35 }
 0x6ae   :  { %v4281_v6 = vadd.f32 %v4266_v36, %v4217_v19  ;;  %v3955_v2 = vpop.f32.mrb[52].mxu1 }
 0x6af   :  { %v11883_v44 = vpop.eup %11882  ;;  %v4227_v43 = vand.u32 2147483647, %v13110_v40  ;;  %v4125_v28 = vmax.f32 %v4117_v11, 0.0  ;;  %v4110_v53 = vmul.f32 0.85, %v3955_v2  ;;  %v10172_v27 = vpop.f32.mrb[53].mxu1 }
 0x6b0   :  { %v11885_v59 = vpop.eup %11884  ;;  %4289 = vst [vmem:[%s14024_s13] sm:$0x1f] %v4281_v6  ;;  %v4268_v24 = vmul.f32 0.6931472, %v11883_v44  ;;  %v4219_v13 = vmax.f32 %v13110_v40, 0.0  ;;  %v13141_v2 = vmax.f32 %v4301_v3, 0.0 }
 0x6b1   :  { %v4235_v61 = vsub.f32 0.0, %v4227_v43  ;;  %v13118_v50 = vmul.f32 %v11885_v59, %v4124_v29  ;;  %v4157_v9 = vsel %vm831_vm2, %v4125_v28, 0.0  ;;  %v13122_v52 = vadd.f32 %v12802_v31, %v4110_v53 }
 0x6b2   :  { %v4282_v12 = vadd.f32 %v4268_v24, %v4218_v46  ;;  %v4158_v54 = vrot.slane %v4157_v9, 4 }
 0x6b3   :  { %v4245_v14 = vmul.f32 1.442695, %v4235_v61  ;;  %v4228_v56 = vand.u32 2147483647, %v13118_v50  ;;  %v4126_v58 = vmax.f32 %v13122_v52, 0.0  ;;  %v4220_v43 = vmax.f32 %v13118_v50, 0.0 }
 0x6b4   :  { %4290 = vst [vmem:[%s14024_s13 + $0x8] sm:$0x1f] %v4282_v12  ;;  %v4159_v15 = vadd.f32 %v4158_v54, %v4157_v9 }
 0x6b5   :  { %11886 = vpow2.f32 %v4245_v14  ;;  %v4236_v17 = vsub.f32 0.0, %v4228_v56  ;;  %v4164_v32 = vsel %vm831_vm2, %v4126_v58, 0.0 }
 0x6b6   :  { %v4160_v34 = vrot.slane %v4159_v15, 2  ;;  %v4165_v60 = vrot.slane %v4164_v32, 4 }
 0x6b7   :  { %v4247_v20 = vmul.f32 1.442695, %v4236_v17 }
 0x6b8   :  { %v4161_v23 = vadd.f32 %v4160_v34, %v4159_v15  ;;  %v4166_v25 = vadd.f32 %v4165_v60, %v4164_v32 }
 0x6b9   :  { %11888 = vpow2.f32 %v4247_v20 }
 0x6ba   :  { %v4162_v26 = vrot.slane %v4161_v23, 1  ;;  %v4167_v29 = vrot.slane %v4166_v25, 2 }
 0x6bc   :  { %v4163_v62 = vadd.f32 %v4162_v26, %v4161_v23  ;;  %v4168_v30 = vadd.f32 %v4167_v29, %v4166_v25 }
 0x6be   :  { %v4189_v0 = vmul.f32 0.2, %v4163_v62  ;;  %v4169_v5 = vrot.slane %v4168_v30, 1 }
 0x6bf   :  { %v11887_v18 = vpop.eup %11886 }
 0x6c0   :  { %v4259_v39 = vadd.f32 1.0, %v11887_v18  ;;  %v4197_v33 = vadd.f32 1e-06, %v4189_v0  ;;  %v4170_v57 = vadd.f32 %v4169_v5, %v4168_v30 }
 0x6c2   :  { %11890 = vlog2.f32 %v4259_v39  ;;  %v4190_v1 = vmul.f32 0.2, %v4170_v57 }
 0x6c3   :  { %v11889_v55 = vpop.eup %11888  ;;  %11892 = vrcp.f32 %v4197_v33 }
 0x6c4   :  { %v4260_v45 = vadd.f32 1.0, %v11889_v55  ;;  %v4198_v48 = vadd.f32 1e-06, %v4190_v1 }
 0x6c6   :  { %11894 = vlog2.f32 %v4260_v45 }
 0x6c7   :  { %11896 = vrcp.f32 %v4198_v48 }
 0x6ca   :  { %v4028_v51 = vpop.f32.mrb[54].mxu0 }
 0x6cb   :  { %v4111_v4 = vmul.f32 0.85, %v4028_v51  ;;  %v10177_v7 = vpop.f32.mrb[55].mxu0 }
 0x6cc   :  { %v11891_v42 = vpop.eup %11890 }
 0x6cd   :  { %v11893_v41 = vpop.eup %11892  ;;  %v4270_v47 = vmul.f32 0.6931472, %v11891_v42  ;;  %v13132_v37 = vadd.f32 %v12802_v31, %v4111_v4 }
 0x6ce   :  { %v13137_v16 = vmul.f32 %v11893_v41, %v4125_v28  ;;  %v4101_v10 = vpop.f32.mrb[54].mxu1  ;;  %v10189_v8 = vpop.f32.mrb[56].mxu0 }
 0x6cf   :  { %v4283_v35 = vadd.f32 %v4270_v47, %v4219_v13  ;;  %v4127_v63 = vmax.f32 %v13132_v37, 0.0  ;;  %v4112_v38 = vmul.f32 0.85, %v4101_v10  ;;  %v10182_v19 = vpop.f32.mrb[55].mxu1  ;;  %v4433_v36 = vpop.f32.mrb[57].mxu0 }
 0x6d0   :  { %v11895_v11 = vpop.eup %11894  ;;  %v4229_v40 = vand.u32 2147483647, %v13137_v16  ;;  %v11364_v6 = vpack.c.bf16 %v10189_v8, %v4433_v36 }
 0x6d1   :  { %v11897_v44 = vpop.eup %11896  ;;  %4291 = vst [vmem:[%s14024_s13 + $0x10] sm:$0x1f] %v4283_v35  ;;  %v4272_v28 = vmul.f32 0.6931472, %v11895_v11  ;;  %v4171_v53 = vsel %vm831_vm2, %v4127_v63, 0.0  ;;  %v13151_v59 = vadd.f32 %v12802_v31, %v4112_v38 }
 0x6d2   :  { %v4237_v46 = vsub.f32 0.0, %v4229_v40  ;;  %v13153_v24 = vmul.f32 %v11897_v44, %v4126_v58  ;;  %v4172_v27 = vrot.slane %v4171_v53, 4  ;;  %v10192_v61 = vpop.f32.mrb[58].mxu0  ;;  %11365 = vmatpush3.bf16.msra.mxu1 %v11364_v6 }
 0x6d3   :  { %v4284_v9 = vadd.f32 %v4272_v28, %v4220_v43  ;;  %v4128_v52 = vmax.f32 %v13151_v59, 0.0  ;;  %v4443_v12 = vpop.f32.mrb[59].mxu0  ;;  %11366 = vmatprep.subr.bf16.mxu1 %v12065_v21  ;;  %v4221_v43 = vmax.f32 %v13137_v16, 0.0 }
 0x6d4   :  { %v4249_v50 = vmul.f32 1.442695, %v4237_v46  ;;  %v4230_v54 = vand.u32 2147483647, %v13153_v24  ;;  %v4173_v14 = vadd.f32 %v4172_v27, %v4171_v53  ;;  %v11367_v56 = vpack.c.bf16 %v10192_v61, %v4443_v12 }
 0x6d5   :  { %4292 = vst [vmem:[%s14024_s13 + $0x18] sm:$0x1f] %v4284_v9  ;;  %v4178_v31 = vsel %vm831_vm2, %v4128_v52, 0.0  ;;  %10216 = vmatmul.mubr.msk.f32.vlgmr.msra.gmra.mrb[56].mxu1 %vm69_vm0, %v13141_v2  ;;  %v4222_v16 = vmax.f32 %v13153_v24, 0.0 }
 0x6d6   :  { %11898 = vpow2.f32 %v4249_v50  ;;  %v4238_v58 = vsub.f32 0.0, %v4230_v54  ;;  %v4174_v15 = vrot.slane %v4173_v14, 2  ;;  %v4179_v17 = vrot.slane %v4178_v31, 4  ;;  %v10195_v32 = vpop.f32.mrb[60].mxu0  ;;  %10222 = vmatprep.mubr.msk.f32.mxu1 %vm12066_vm1, %v12067_v22  ;;  %11368 = vmatpush3.bf16.msra.mxu1 %v11367_v56 }
 0x6d7   :  { %v4453_v34 = vpop.f32.mrb[61].mxu0  ;;  %11369 = vmatprep.subr.bf16.mxu1 %v12065_v21 }
 0x6d8   :  { %v4251_v60 = vmul.f32 1.442695, %v4238_v58  ;;  %v4175_v20 = vadd.f32 %v4174_v15, %v4173_v14  ;;  %v4180_v23 = vadd.f32 %v4179_v17, %v4178_v31  ;;  %v11370_v25 = vpack.c.bf16 %v10195_v32, %v4453_v34 }
 0x6d9   :  { %10223 = vmatmul.mubr.msk.f32.vlgmr.msra.gmra.mrb[58].mxu1 %vm69_vm0, %v13141_v2 }
 0x6da   :  { %11900 = vpow2.f32 %v4251_v60  ;;  %v4176_v26 = vrot.slane %v4175_v20, 1  ;;  %v4181_v29 = vrot.slane %v4180_v23, 2  ;;  %v10198_v62 = vpop.f32.mrb[62].mxu0  ;;  %11371 = vmatpush3.bf16.msra.mxu1 %v11370_v25  ;;  %10229 = vmatprep.mubr.msk.f32.mxu1 %vm12066_vm1, %v12067_v22 }
 0x6db   :  { %v4463_v30 = vpop.f32.mrb[63].mxu0  ;;  %11372 = vmatprep.subr.bf16.mxu1 %v12065_v21 }
 0x6dc   :  { %v4177_v0 = vadd.f32 %v4176_v26, %v4175_v20  ;;  %v4182_v5 = vadd.f32 %v4181_v29, %v4180_v23  ;;  %v11373_v18 = vpack.c.bf16 %v10198_v62, %v4463_v30 }
 0x6dd   :  { %10230 = vmatmul.mubr.msk.f32.vlgmr.msra.gmra.mrb[60].mxu1 %vm69_vm0, %v13141_v2 }
 0x6de   :  { %v4191_v39 = vmul.f32 0.2, %v4177_v0  ;;  %v4183_v33 = vrot.slane %v4182_v5, 1  ;;  %v10201_v57 = vpop.f32.mrb[64].mxu0  ;;  %11374 = vmatpush3.bf16.msra.mxu1 %v11373_v18  ;;  %10236 = vmatprep.mubr.msk.f32.mxu1 %vm12066_vm1, %v12067_v22 }
 0x6df   :  { %v4473_v1 = vpop.f32.mrb[65].mxu0  ;;  %11375 = vmatprep.subr.bf16.mxu1 %v12065_v21 }
 0x6e0   :  { %v11899_v55 = vpop.eup %11898  ;;  %v4199_v45 = vadd.f32 1e-06, %v4191_v39  ;;  %v4184_v48 = vadd.f32 %v4183_v33, %v4182_v5  ;;  %v11376_v51 = vpack.c.bf16 %v10201_v57, %v4473_v1 }
 0x6e1   :  { %v4261_v4 = vadd.f32 1.0, %v11899_v55  ;;  %10237 = vmatmul.mubr.msk.f32.vlgmr.msra.gmra.mrb[62].mxu1 %vm69_vm0, %v13141_v2 }
 0x6e2   :  { %11902 = vrcp.f32 %v4199_v45  ;;  %v4192_v7 = vmul.f32 0.2, %v4184_v48  ;;  %v10204_v42 = vpop.f32.mrb[66].mxu0  ;;  %11377 = vmatpush3.bf16.msra.mxu1 %v11376_v51  ;;  %10243 = vmatprep.mubr.msk.f32.mxu1 %vm12066_vm1, %v12067_v22  ;;  %v5847_v48 = vld [vmem:[%s14026_s11] sm:$0xff]  ;;  %v5848_v51 = vld [vmem:[%s14026_s11 + $0x8] sm:$0xff] }
 0x6e3   :  { %11904 = vlog2.f32 %v4261_v4  ;;  %v4483_v41 = vpop.f32.mrb[67].mxu0  ;;  %11378 = vmatprep.subr.bf16.mxu1 %v12065_v21  ;;  %v13296_v4 = vpack.c.bf16 %v5848_v51, %v5847_v48 }
 0x6e4   :  { %v11901_v13 = vpop.eup %11900  ;;  %v4200_v47 = vadd.f32 1e-06, %v4192_v7  ;;  %v11379_v3 = vpack.c.bf16 %v10204_v42, %v4483_v41  ;;  %v5849_v7 = vld [vmem:[%s14026_s11 + $0x10] sm:$0xff]  ;;  %v5850_v42 = vld [vmem:[%s14026_s11 + $0x18] sm:$0xff] }
 0x6e5   :  { %v4262_v10 = vadd.f32 1.0, %v11901_v13  ;;  %10244 = vmatmul.mubr.msk.f32.vlgmr.msra.gmra.mrb[64].mxu1 %vm69_vm0, %v13141_v2  ;;  %v13308_v41 = vpack.c.bf16 %v5850_v42, %v5849_v7  ;;  %v5851_v13 = vld [vmem:[%s14026_s11 + $0x20] sm:$0xff] }
 0x6e6   :  { %11906 = vrcp.f32 %v4200_v47  ;;  %v10207_v8 = vpop.f32.mrb[68].mxu0  ;;  %11380 = vmatpush3.bf16.msra.mxu1 %v11379_v3  ;;  %10250 = vmatprep.mubr.msk.f32.mxu1 %vm12066_vm1, %v12067_v22  ;;  %v5852_v47 = vld [vmem:[%s14026_s11 + $0x28] sm:$0xff] }
 0x6e7   :  { %11908 = vlog2.f32 %v4262_v10  ;;  %v4493_v35 = vpop.f32.mrb[69].mxu0  ;;  %11381 = vmatprep.subr.bf16.mxu1 %v12065_v21  ;;  %v13320_v3 = vpack.c.bf16 %v5852_v47, %v5851_v13  ;;  %v5853_v10 = vld [vmem:[%s14026_s11 + $0x30] sm:$0xff] }
 0x6e8   :  { %v11382_v38 = vpack.c.bf16 %v10207_v8, %v4493_v35  ;;  %v5854_v8 = vld [vmem:[%s14026_s11 + $0x38] sm:$0xff] }
 0x6e9   :  { %10251 = vmatmul.mubr.msk.f32.vlgmr.msra.gmra.mrb[66].mxu1 %vm69_vm0, %v13141_v2  ;;  %v13332_v35 = vpack.c.bf16 %v5854_v8, %v5853_v10 }
 0x6ea   :  { %v10210_v19 = vpop.f32.mrb[70].mxu0  ;;  %11383 = vmatpush3.bf16.msra.mxu1 %v11382_v38  ;;  %10257 = vmatprep.mubr.msk.f32.mxu1 %vm12066_vm1, %v12067_v22  ;;  %v5855_v38 = vld [vmem:[%s14026_s11 + $0x40] sm:$0xff] }
 0x6eb   :  { %v4503_v36 = vpop.f32.mrb[71].mxu0  ;;  %11384 = vmatprep.subr.bf16.mxu1 %v12065_v21 }
 0x6ec   :  { %v11903_v11 = vpop.eup %11902  ;;  %v11385_v40 = vpack.c.bf16 %v10210_v19, %v4503_v36  ;;  %v5856_v19 = vld [vmem:[%s14026_s11 + $0x48] sm:$0xff] }
 0x6ed   :  { %v11905_v6 = vpop.eup %11904  ;;  %v4214_v44 = vmul.f32 %v11903_v11, %v4127_v63  ;;  %10258 = vmatmul.mubr.msk.f32.vlgmr.msra.gmra.mrb[68].mxu1 %vm69_vm0, %v13141_v2  ;;  %v13344_v36 = vpack.c.bf16 %v5856_v19, %v5855_v38  ;;  %v5857_v11 = vld [vmem:[%s14026_s11 + $0x50] sm:$0xff] }
 0x6ee   :  { %v4274_v28 = vmul.f32 0.6931472, %v11905_v6  ;;  %11386 = vmatpush3.bf16.msra.mxu1 %v11385_v40  ;;  %10264 = vmatprep.mubr.msk.f32.mxu1 %vm12066_vm1, %v12067_v22  ;;  %v5858_v40 = vld [vmem:[%s14026_s11 + $0x58] sm:$0xff] }
 0x6ef   :  { %v4231_v53 = vand.u32 2147483647, %v4214_v44  ;;  %10272 = vmatprep.subr.mxu1 %v12067_v22  ;;  %v4223_v58 = vmax.f32 %v4214_v44, 0.0  ;;  %v13356_v6 = vpack.c.bf16 %v5858_v40, %v5857_v11  ;;  %v5859_v44 = vld [vmem:[%s14026_s11 + $0x60] sm:$0xff] }
 0x6f0   :  { %v11907_v46 = vpop.eup %11906  ;;  %v4285_v27 = vadd.f32 %v4274_v28, %v4221_v43  ;;  %v5860_v43 = vld [vmem:[%s14026_s11 + $0x68] sm:$0xff] }
 0x6f1   :  { %v11909_v61 = vpop.eup %11908  ;;  %v4239_v9 = vsub.f32 0.0, %v4231_v53  ;;  %v4216_v37 = vmul.f32 %v11907_v46, %v4128_v52  ;;  %10265 = vmatmul.mubr.msk.f32.vlgmr.msra.gmra.mrb[70].mxu1 %vm69_vm0, %v13141_v2  ;;  %v13368_v28 = vpack.c.bf16 %v5860_v43, %v5859_v44  ;;  %v5861_v53 = vld [vmem:[%s14026_s11 + $0x70] sm:$0xff]  ;;  %v5862_v46 = vld [vmem:[%s14026_s11 + $0x78] sm:$0xff] }
 0x6f2   :  { %4293 = vst [vmem:[%s14024_s13 + $0x20] sm:$0x1f] %v4285_v27  ;;  %v4276_v63 = vmul.f32 0.6931472, %v11909_v61  ;;  %10273 = vmatpush3.msk.msra.mxu1 %vm831_vm2, %v13105_v49  ;;  %10274 = vmatprep.mubr.msk.f32.mxu1 %vm12066_vm1, %v12067_v22  ;;  %v13380_v27 = vpack.c.bf16 %v5862_v46, %v5861_v53 }
 0x6f3   :  { %v4253_v12 = vmul.f32 1.442695, %v4239_v9  ;;  %v4232_v50 = vand.u32 2147483647, %v4216_v37  ;;  %10282 = vmatprep.subr.mxu1 %v12067_v22  ;;  %v4224_v34 = vmax.f32 %v4216_v37, 0.0 }
 0x6f4   :  { %v4286_v59 = vadd.f32 %v4276_v63, %v4222_v16  ;;  %v13389_v16 = vld [vmem:[%s14019_s6] sm:$0x1f] }
 0x6f5   :  { %11910 = vpow2.f32 %v4253_v12  ;;  %v4240_v52 = vsub.f32 0.0, %v4232_v50 }
 0x6f6   :  { %4294 = vst [vmem:[%s14024_s13 + $0x28] sm:$0x1f] %v4286_v59 }
 0x6f7   :  { %v4255_v24 = vmul.f32 1.442695, %v4240_v52 }
 0x6f9   :  { %11912 = vpow2.f32 %v4255_v24 }
 0x6ff   :  { %v11911_v2 = vpop.eup %11910 }
 0x700   :  { %v4263_v54 = vadd.f32 1.0, %v11911_v2 }
 0x702   :  { %11914 = vlog2.f32 %v4263_v54 }
 0x703   :  { %v11913_v14 = vpop.eup %11912 }
 0x704   :  { %v4264_v31 = vadd.f32 1.0, %v11913_v14 }
 0x706   :  { %11916 = vlog2.f32 %v4264_v31 }
 0x70c   :  { %v11915_v56 = vpop.eup %11914 }
 0x70d   :  { %v4278_v15 = vmul.f32 0.6931472, %v11915_v56 }
 0x70f   :  { %v4287_v17 = vadd.f32 %v4278_v15, %v4223_v58 }
 0x710   :  { %v11917_v32 = vpop.eup %11916 }
 0x711   :  { %4295 = vst [vmem:[%s14024_s13 + $0x30] sm:$0x1f] %v4287_v17  ;;  %v4280_v60 = vmul.f32 0.6931472, %v11917_v32 }
 0x713   :  { %v4288_v20 = vadd.f32 %v4280_v60, %v4224_v34 }
 0x715   :  { %4296 = vst [vmem:[%s14024_s13 + $0x38] sm:$0x1f] %v4288_v20 }
 0x7a8   :  { %v13224_v23 = vpop.f32.mrb[56].mxu1 }
 0x7a9   :  { %v10217_v25 = vpop.f32.mrb[57].mxu1  ;;  %10270 = vmatmul.mubr.msk.f32.vlgmr.msra.gmra.mrb[72].mxu0 %vm827_vm3, %v13224_v23 }
 0x7aa   :  { %10278 = vmatpush3.msk.msra.mxu0 %vm831_vm2, %v13105_v49  ;;  %10279 = vmatprep.mubr.msk.f32.mxu0 %vm12066_vm1, %v12067_v22 }
 0x7ab   :  { %10287 = vmatprep.subr.mxu0 %v12067_v22 }
 0x7ac   :  { %v13233_v26 = vpop.f32.mrb[58].mxu1 }
 0x7ad   :  { %v10224_v29 = vpop.f32.mrb[59].mxu1  ;;  %10275 = vmatmul.mubr.msk.f32.vlgmr.msra.gmra.mrb[72].mxu1 %vm827_vm3, %v13233_v26 }
 0x7ae   :  { %10283 = vmatpush3.msk.msra.mxu1 %vm831_vm2, %v13105_v49  ;;  %10284 = vmatprep.mubr.msk.f32.mxu1 %vm12066_vm1, %v12067_v22 }
 0x7af   :  { %10292 = vmatprep.subr.mxu1 %v12067_v22 }
 0x7b0   :  { %v13242_v62 = vpop.f32.mrb[60].mxu1 }
 0x7b1   :  { %10280 = vmatmul.mubr.msk.f32.vlgmr.msra.gmra.mrb[74].mxu0 %vm827_vm3, %v13242_v62  ;;  %v10231_v30 = vpop.f32.mrb[61].mxu1 }
 0x7b2   :  { %10288 = vmatpush3.msk.msra.mxu0 %vm831_vm2, %v13105_v49  ;;  %10289 = vmatprep.mubr.msk.f32.mxu0 %vm12066_vm1, %v12067_v22 }
 0x7b3   :  { %10297 = vmatprep.subr.mxu0 %v12067_v22 }
 0x7b4   :  { %v13251_v0 = vpop.f32.mrb[62].mxu1 }
 0x7b5   :  { %10285 = vmatmul.mubr.msk.f32.vlgmr.msra.gmra.mrb[74].mxu1 %vm827_vm3, %v13251_v0  ;;  %v10238_v5 = vpop.f32.mrb[63].mxu1 }
 0x7b6   :  { %10293 = vmatpush3.msk.msra.mxu1 %vm831_vm2, %v13105_v49  ;;  %10294 = vmatprep.mubr.msk.f32.mxu1 %vm12066_vm1, %v12067_v22 }
 0x7b7   :  { %10302 = vmatprep.subr.mxu1 %v12067_v22 }
 0x7b8   :  { %v13260_v18 = vpop.f32.mrb[64].mxu1 }
 0x7b9   :  { %10290 = vmatmul.mubr.msk.f32.vlgmr.msra.gmra.mrb[76].mxu0 %vm827_vm3, %v13260_v18  ;;  %v10245_v39 = vpop.f32.mrb[65].mxu1 }
 0x7ba   :  { %10298 = vmatpush3.msk.msra.mxu0 %vm831_vm2, %v13105_v49  ;;  %10299 = vmatprep.mubr.msk.f32.mxu0 %vm12066_vm1, %v12067_v22 }
 0x7bb   :  { %11387 = vmatprep.subr.bf16.mxu0 %v12065_v21 }
 0x7bc   :  { %v13269_v33 = vpop.f32.mrb[66].mxu1 }
 0x7bd   :  { %10295 = vmatmul.mubr.msk.f32.vlgmr.msra.gmra.mrb[76].mxu1 %vm827_vm3, %v13269_v33  ;;  %v10252_v57 = vpop.f32.mrb[67].mxu1 }
 0x7be   :  { %10303 = vmatpush3.msk.msra.mxu1 %vm831_vm2, %v13105_v49  ;;  %10304 = vmatprep.mubr.msk.f32.mxu1 %vm12066_vm1, %v12067_v22 }
 0x7bf   :  { %11411 = vmatprep.subr.bf16.mxu1 %v12065_v21 }
 0x7c0   :  { %v13278_v1 = vpop.f32.mrb[68].mxu1 }
 0x7c1   :  { %10300 = vmatmul.mubr.msk.f32.vlgmr.msra.gmra.mrb[78].mxu0 %vm827_vm3, %v13278_v1  ;;  %v10259_v55 = vpop.f32.mrb[69].mxu1 }
 0x7c2   :  { %10339 = vmatprep.mubr.msk.f32.mxu0 %vm12066_vm1, %v12067_v22  ;;  %11389 = vmatpush3.bf16.msra.mxu0 %v13296_v4 }
 0x7c3   :  { %11390 = vmatprep.subr.bf16.mxu0 %v12065_v21 }
 0x7c4   :  { %v13284_v45 = vpop.f32.mrb[70].mxu1 }
 0x7c5   :  { %10305 = vmatmul.mubr.msk.f32.vlgmr.msra.gmra.mrb[78].mxu1 %vm827_vm3, %v13284_v45  ;;  %v10266_v49 = vpop.f32.mrb[71].mxu1 }
 0x7c6   :  { %10374 = vmatprep.mubr.msk.f32.mxu1 %vm12066_vm1, %v12067_v22  ;;  %11413 = vmatpush3.bf16.msra.mxu1 %v13296_v4 }
 0x7c7   :  { %11414 = vmatprep.subr.bf16.mxu1 %v12065_v21  ;;  %11392 = vmatpush3.bf16.msra.mxu0 %v13308_v41 }
 0x7c8   :  { %11393 = vmatprep.subr.bf16.mxu0 %v12065_v21 }
 0x7ca   :  { %11416 = vmatpush3.bf16.msra.mxu1 %v13308_v41 }
 0x7cb   :  { %11417 = vmatprep.subr.bf16.mxu1 %v12065_v21  ;;  %11395 = vmatpush3.bf16.msra.mxu0 %v13320_v3 }
 0x7cc   :  { %11396 = vmatprep.subr.bf16.mxu0 %v12065_v21 }
 0x7ce   :  { %11419 = vmatpush3.bf16.msra.mxu1 %v13320_v3 }
 0x7cf   :  { %11420 = vmatprep.subr.bf16.mxu1 %v12065_v21  ;;  %11398 = vmatpush3.bf16.msra.mxu0 %v13332_v35 }
 0x7d0   :  { %11399 = vmatprep.subr.bf16.mxu0 %v12065_v21 }
 0x7d2   :  { %11422 = vmatpush3.bf16.msra.mxu1 %v13332_v35 }
 0x7d3   :  { %11423 = vmatprep.subr.bf16.mxu1 %v12065_v21  ;;  %11401 = vmatpush3.bf16.msra.mxu0 %v13344_v36 }
 0x7d4   :  { %11402 = vmatprep.subr.bf16.mxu0 %v12065_v21 }
 0x7d6   :  { %11425 = vmatpush3.bf16.msra.mxu1 %v13344_v36 }
 0x7d7   :  { %11426 = vmatprep.subr.bf16.mxu1 %v12065_v21  ;;  %11404 = vmatpush3.bf16.msra.mxu0 %v13356_v6 }
 0x7d8   :  { %11405 = vmatprep.subr.bf16.mxu0 %v12065_v21 }
 0x7da   :  { %11428 = vmatpush3.bf16.msra.mxu1 %v13356_v6 }
 0x7db   :  { %11429 = vmatprep.subr.bf16.mxu1 %v12065_v21  ;;  %11407 = vmatpush3.bf16.msra.mxu0 %v13368_v28 }
 0x7dc   :  { %11408 = vmatprep.subr.bf16.mxu0 %v12065_v21 }
 0x7de   :  { %11431 = vmatpush3.bf16.msra.mxu1 %v13368_v28 }
 0x7df   :  { %11432 = vmatprep.subr.bf16.mxu1 %v12065_v21  ;;  %11410 = vmatpush3.bf16.msra.mxu0 %v13380_v27 }
 0x7e0   :  { %11435 = vmatprep.subr.bf16.mxu0 %v12065_v21 }
 0x7e2   :  { %11434 = vmatpush3.bf16.msra.mxu1 %v13380_v27 }
 0x7e3   :  { %11459 = vmatprep.subr.bf16.mxu1 %v12065_v21 }
 0x87c   :  { %v5148_v61 = vpop.f32.mrb[72].mxu0 }
 0x87d   :  { %v5663_v9 = vmul.f32 0.85, %v5148_v61  ;;  %v10271_v37 = vpop.f32.mrb[73].mxu0 }
 0x87f   :  { %v13392_v63 = vadd.f32 %v13389_v16, %v5663_v9 }
 0x880   :  { %v5221_v50 = vpop.f32.mrb[72].mxu1 }
 0x881   :  { %v5679_v12 = vmax.f32 %v13392_v63, 0.0  ;;  %v5664_v59 = vmul.f32 0.85, %v5221_v50  ;;  %v10276_v52 = vpop.f32.mrb[73].mxu1 }
 0x883   :  { %v5687_v24 = vsel %vm831_vm2, %v5679_v12, 0.0  ;;  %v13399_v54 = vadd.f32 %v13389_v16, %v5664_v59 }
 0x884   :  { %v5688_v2 = vrot.slane %v5687_v24, 4  ;;  %v5294_v14 = vpop.f32.mrb[74].mxu0 }
 0x885   :  { %v5680_v56 = vmax.f32 %v13399_v54, 0.0  ;;  %v5665_v58 = vmul.f32 0.85, %v5294_v14  ;;  %v10281_v15 = vpop.f32.mrb[75].mxu0 }
 0x886   :  { %v5689_v31 = vadd.f32 %v5688_v2, %v5687_v24 }
 0x887   :  { %v5694_v32 = vsel %vm831_vm2, %v5680_v56, 0.0  ;;  %v13406_v34 = vadd.f32 %v13389_v16, %v5665_v58 }
 0x888   :  { %v5690_v17 = vrot.slane %v5689_v31, 2  ;;  %v5695_v60 = vrot.slane %v5694_v32, 4  ;;  %v5367_v20 = vpop.f32.mrb[74].mxu1 }
 0x889   :  { %v5681_v29 = vmax.f32 %v13406_v34, 0.0  ;;  %v5666_v30 = vmul.f32 0.85, %v5367_v20  ;;  %v10286_v5 = vpop.f32.mrb[75].mxu1 }
 0x88a   :  { %v5691_v25 = vadd.f32 %v5690_v17, %v5689_v31  ;;  %v5696_v39 = vadd.f32 %v5695_v60, %v5694_v32 }
 0x88b   :  { %v5701_v55 = vsel %vm831_vm2, %v5681_v29, 0.0  ;;  %v13413_v49 = vadd.f32 %v13389_v16, %v5666_v30 }
 0x88c   :  { %v5692_v57 = vrot.slane %v5691_v25, 1  ;;  %v5697_v48 = vrot.slane %v5696_v39, 2  ;;  %v5702_v51 = vrot.slane %v5701_v55, 4  ;;  %v5440_v7 = vpop.f32.mrb[76].mxu0 }
 0x88d   :  { %v5682_v13 = vmax.f32 %v13413_v49, 0.0  ;;  %v10291_v47 = vpop.f32.mrb[77].mxu0  ;;  %v5667_v50 = vmul.f32 0.85, %v5440_v7 }
 0x88e   :  { %v5693_v42 = vadd.f32 %v5692_v57, %v5691_v25  ;;  %v5698_v10 = vadd.f32 %v5697_v48, %v5696_v39  ;;  %v5703_v8 = vadd.f32 %v5702_v51, %v5701_v55 }
 0x88f   :  { %v5708_v19 = vsel %vm831_vm2, %v5682_v13, 0.0  ;;  %v13420_v17 = vadd.f32 %v13389_v16, %v5667_v50 }
 0x890   :  { %v5743_v38 = vmul.f32 0.2, %v5693_v42  ;;  %v5699_v11 = vrot.slane %v5698_v10, 1  ;;  %v5704_v40 = vrot.slane %v5703_v8, 2  ;;  %v5709_v44 = vrot.slane %v5708_v19, 4  ;;  %v5513_v43 = vpop.f32.mrb[76].mxu1 }
 0x891   :  { %v10296_v46 = vpop.f32.mrb[77].mxu1  ;;  %v5668_v32 = vmul.f32 0.85, %v5513_v43  ;;  %v5683_v39 = vmax.f32 %v13420_v17, 0.0 }
 0x892   :  { %v5751_v53 = vadd.f32 1e-06, %v5743_v38  ;;  %v5700_v61 = vadd.f32 %v5699_v11, %v5698_v10  ;;  %v5705_v9 = vadd.f32 %v5704_v40, %v5703_v8  ;;  %v5710_v37 = vadd.f32 %v5709_v44, %v5708_v19 }
 0x893   :  { %v13424_v57 = vadd.f32 %v13389_v16, %v5668_v32  ;;  %v5715_v42 = vsel %vm831_vm2, %v5683_v39, 0.0 }
 0x894   :  { %11918 = vrcp.f32 %v5751_v53  ;;  %v5744_v59 = vmul.f32 0.2, %v5700_v61  ;;  %v5706_v52 = vrot.slane %v5705_v9, 1  ;;  %v5711_v24 = vrot.slane %v5710_v37, 2  ;;  %v5586_v2 = vpop.f32.mrb[78].mxu0 }
 0x895   :  { %v10301_v14 = vpop.f32.mrb[79].mxu0  ;;  %v5684_v47 = vmax.f32 %v13424_v57, 0.0  ;;  %v5716_v38 = vrot.slane %v5715_v42, 4 }
 0x896   :  { %v5752_v31 = vadd.f32 1e-06, %v5744_v59  ;;  %v5707_v58 = vadd.f32 %v5706_v52, %v5705_v9  ;;  %v5712_v15 = vadd.f32 %v5711_v24, %v5710_v37 }
 0x897   :  { %v5722_v63 = vsel %vm831_vm2, %v5684_v47, 0.0  ;;  %v5717_v43 = vadd.f32 %v5716_v38, %v5715_v42 }
 0x898   :  { %11920 = vrcp.f32 %v5752_v31  ;;  %v5713_v60 = vrot.slane %v5712_v15, 1  ;;  %v5659_v20 = vpop.f32.mrb[78].mxu1  ;;  %v5745_v25 = vmul.f32 0.2, %v5707_v58  ;;  %v5723_v53 = vrot.slane %v5722_v63, 4 }
 0x899   :  { %v10306_v30 = vpop.f32.mrb[79].mxu1  ;;  %v5718_v9 = vrot.slane %v5717_v43, 2  ;;  %v5669_v58 = vmul.f32 0.85, %v5586_v2 }
 0x89a   :  { %v5714_v5 = vadd.f32 %v5713_v60, %v5712_v15  ;;  %v5753_v48 = vadd.f32 1e-06, %v5745_v25  ;;  %v5724_v37 = vadd.f32 %v5723_v53, %v5722_v63 }
 0x89b   :  { %v5719_v54 = vadd.f32 %v5718_v9, %v5717_v43  ;;  %v13450_v34 = vadd.f32 %v13389_v16, %v5669_v58 }
 0x89c   :  { %v5746_v51 = vmul.f32 0.2, %v5714_v5  ;;  %11922 = vrcp.f32 %v5753_v48  ;;  %v5725_v59 = vrot.slane %v5724_v37, 2 }
 0x89d   :  { %v5720_v31 = vrot.slane %v5719_v54, 1  ;;  %v5685_v42 = vmax.f32 %v13450_v34, 0.0 }
 0x89e   :  { %v11919_v55 = vpop.eup %11918  ;;  %v5754_v8 = vadd.f32 1e-06, %v5746_v51  ;;  %v5726_v32 = vadd.f32 %v5725_v59, %v5724_v37  ;;  %v5670_v51 = vmul.f32 0.85, %v5659_v20 }
 0x89f   :  { %v5760_v7 = vmul.f32 %v11919_v55, %v5679_v12  ;;  %v5721_v30 = vadd.f32 %v5720_v31, %v5719_v54 }
 0x8a0   :  { %11924 = vrcp.f32 %v5754_v8  ;;  %v5727_v55 = vrot.slane %v5726_v32, 1 }
 0x8a1   :  { %v5783_v10 = vand.u32 2147483647, %v5760_v7  ;;  %v5747_v2 = vmul.f32 0.2, %v5721_v30  ;;  %v5775_v63 = vmax.f32 %v5760_v7, 0.0 }
 0x8a2   :  { %v11921_v19 = vpop.eup %11920  ;;  %v5728_v8 = vadd.f32 %v5727_v55, %v5726_v32 }
 0x8a3   :  { %v5791_v11 = vsub.f32 0.0, %v5783_v10  ;;  %v13434_v40 = vmul.f32 %v11921_v19, %v5680_v56  ;;  %v5755_v19 = vadd.f32 1e-06, %v5747_v2 }
 0x8a5   :  { %v5799_v12 = vmul.f32 1.442695, %v5791_v11  ;;  %v5784_v44 = vand.u32 2147483647, %v13434_v40  ;;  %v5729_v11 = vsel %vm831_vm2, %v5685_v42, 0.0  ;;  %v5776_v37 = vmax.f32 %v13434_v40, 0.0 }
 0x8a6   :  { %v11923_v50 = vpop.eup %11922 }
 0x8a7   :  { %11926 = vpow2.f32 %v5799_v12  ;;  %v5792_v46 = vsub.f32 0.0, %v5784_v44  ;;  %v13442_v56 = vmul.f32 %v11923_v50, %v5681_v29  ;;  %v5748_v12 = vmul.f32 0.2, %v5728_v8 }
 0x8a9   :  { %v5801_v61 = vmul.f32 1.442695, %v5792_v46  ;;  %v5785_v15 = vand.u32 2147483647, %v13442_v56  ;;  %v5730_v46 = vrot.slane %v5729_v11, 4 }
 0x8aa   :  { %v11925_v52 = vpop.eup %11924  ;;  %v5756_v9 = vadd.f32 1e-06, %v5748_v12 }
 0x8ab   :  { %11928 = vpow2.f32 %v5801_v61  ;;  %v13447_v60 = vmul.f32 %v11925_v52, %v5682_v13  ;;  %v5793_v5 = vsub.f32 0.0, %v5785_v15  ;;  %v13455_v13 = vadd.f32 %v13389_v16, %v5670_v51 }
 0x8ac   :  { %v5731_v54 = vadd.f32 %v5730_v46, %v5729_v11 }
 0x8ad   :  { %v5786_v48 = vand.u32 2147483647, %v13447_v60  ;;  %v5803_v10 = vmul.f32 1.442695, %v5793_v5  ;;  %v5686_v43 = vmax.f32 %v13455_v13, 0.0 }
 0x8af   :  { %v5794_v49 = vsub.f32 0.0, %v5786_v48  ;;  %v5736_v50 = vsel %vm831_vm2, %v5686_v43, 0.0 }
 0x8b0   :  { %v5737_v52 = vrot.slane %v5736_v50, 4 }
 0x8b1   :  { %v11927_v24 = vpop.eup %11926  ;;  %v5805_v44 = vmul.f32 1.442695, %v5794_v49 }
 0x8b2   :  { %v5815_v14 = vadd.f32 1.0, %v11927_v24  ;;  %v5732_v24 = vrot.slane %v5731_v54, 2 }
 0x8b4   :  { %11930 = vlog2.f32 %v5815_v14  ;;  %v5738_v14 = vadd.f32 %v5737_v52, %v5736_v50  ;;  %v5733_v32 = vadd.f32 %v5732_v24, %v5731_v54 }
 0x8b5   :  { %v11929_v25 = vpop.eup %11928 }
 0x8b6   :  { %v5816_v29 = vadd.f32 1.0, %v11929_v25  ;;  %v5739_v30 = vrot.slane %v5738_v14, 2  ;;  %v5734_v55 = vrot.slane %v5733_v32, 1 }
 0x8b8   :  { %11932 = vlog2.f32 %v5816_v29  ;;  %v5740_v51 = vadd.f32 %v5739_v30, %v5738_v14 }
 0x8b9   :  { %11934 = vpow2.f32 %v5803_v10 }
 0x8ba   :  { %11936 = vrcp.f32 %v5755_v19  ;;  %v5741_v10 = vrot.slane %v5740_v51, 1 }
 0x8bb   :  { %11938 = vpow2.f32 %v5805_v44 }
 0x8bc   :  { %11940 = vrcp.f32 %v5756_v9 }
 0x8be   :  { %v11931_v38 = vpop.eup %11930 }
 0x8bf   :  { %v5824_v20 = vmul.f32 0.6931472, %v11931_v38  ;;  %v5742_v38 = vadd.f32 %v5741_v10, %v5740_v51 }
 0x8c1   :  { %v5839_v53 = vadd.f32 %v5824_v20, %v5775_v63  ;;  %v5777_v20 = vmax.f32 %v13442_v56, 0.0  ;;  %v5750_v44 = vmul.f32 0.2, %v5742_v38 }
 0x8c2   :  { %v11933_v61 = vpop.eup %11932 }
 0x8c3   :  { %10340 = vmatmul.mubr.f32.vlgmr.msra.gmra.mrb[80].mxu0 %v5839_v53  ;;  %v5826_v7 = vmul.f32 0.6931472, %v11933_v61  ;;  %v11935_v40 = vpop.eup %11934  ;;  %v5758_v9 = vadd.f32 1e-06, %v5750_v44 }
 0x8c4   :  { %11437 = vmatpush3.bf16.msra.mxu0 %v13296_v4  ;;  %10409 = vmatprep.mubr.msk.f32.mxu0 %vm12066_vm1, %v12067_v22  ;;  %v11937_v31 = vpop.eup %11936  ;;  %v5817_v58 = vadd.f32 1.0, %v11935_v40 }
 0x8c5   :  { %11438 = vmatprep.subr.bf16.mxu0 %v12065_v21  ;;  %v5840_v59 = vadd.f32 %v5826_v7, %v5776_v37  ;;  %v11939_v15 = vpop.eup %11938  ;;  %v13481_v25 = vmul.f32 %v11937_v31, %v5683_v39  ;;  %v5735_v39 = vadd.f32 %v5734_v55, %v5733_v32  ;;  %v5778_v37 = vmax.f32 %v13447_v60, 0.0 }
 0x8c6   :  { %11942 = vlog2.f32 %v5817_v58  ;;  %v11941_v29 = vpop.eup %11940  ;;  %v5818_v5 = vadd.f32 1.0, %v11939_v15 }
 0x8c7   :  { %10375 = vmatmul.mubr.f32.vlgmr.msra.gmra.mrb[80].mxu1 %v5840_v59  ;;  %v5787_v48 = vand.u32 2147483647, %v13481_v25  ;;  %v13490_v17 = vmul.f32 %v11941_v29, %v5684_v47  ;;  %v5749_v47 = vmul.f32 0.2, %v5735_v39  ;;  %v5779_v32 = vmax.f32 %v13481_v25, 0.0 }
 0x8c8   :  { %11440 = vmatpush3.bf16.msra.mxu0 %v13308_v41  ;;  %11461 = vmatpush3.bf16.msra.mxu1 %v13296_v4  ;;  %11944 = vlog2.f32 %v5818_v5 }
 0x8c9   :  { %11441 = vmatprep.subr.bf16.mxu0 %v12065_v21  ;;  %11462 = vmatprep.subr.bf16.mxu1 %v12065_v21  ;;  %v5795_v2 = vsub.f32 0.0, %v5787_v48  ;;  %v5788_v8 = vand.u32 2147483647, %v13490_v17  ;;  %v5757_v63 = vadd.f32 1e-06, %v5749_v47  ;;  %v5780_v55 = vmax.f32 %v13490_v17, 0.0 }
 0x8ca   :  { %10444 = vmatprep.mubr.msk.f32.mxu1 %vm12066_vm1, %v12067_v22 }
 0x8cb   :  { %v5807_v49 = vmul.f32 1.442695, %v5795_v2  ;;  %v5796_v19 = vsub.f32 0.0, %v5788_v8 }
 0x8cc   :  { %11443 = vmatpush3.bf16.msra.mxu0 %v13320_v3  ;;  %11464 = vmatpush3.bf16.msra.mxu1 %v13308_v41 }
 0x8cd   :  { %11444 = vmatprep.subr.bf16.mxu0 %v12065_v21  ;;  %11465 = vmatprep.subr.bf16.mxu1 %v12065_v21  ;;  %11946 = vpow2.f32 %v5807_v49  ;;  %v5809_v53 = vmul.f32 1.442695, %v5796_v19 }
 0x8ce   :  { %11948 = vrcp.f32 %v5757_v63 }
 0x8cf   :  { %11950 = vpow2.f32 %v5809_v53 }
 0x8d0   :  { %11446 = vmatpush3.bf16.msra.mxu0 %v13332_v35  ;;  %11467 = vmatpush3.bf16.msra.mxu1 %v13320_v3  ;;  %v11943_v57 = vpop.eup %11942  ;;  %11952 = vrcp.f32 %v5758_v9  ;;  %v7191_v9 = vld [vmem:[%s14027_s12] sm:$0xff] }
 0x8d1   :  { %11447 = vmatprep.subr.bf16.mxu0 %v12065_v21  ;;  %11468 = vmatprep.subr.bf16.mxu1 %v12065_v21  ;;  %v5828_v11 = vmul.f32 0.6931472, %v11943_v57 }
 0x8d2   :  { %v11945_v12 = vpop.eup %11944 }
 0x8d3   :  { %v5841_v46 = vadd.f32 %v5828_v11, %v5777_v20  ;;  %v5830_v61 = vmul.f32 0.6931472, %v11945_v12 }
 0x8d4   :  { %11449 = vmatpush3.bf16.msra.mxu0 %v13344_v36  ;;  %11470 = vmatpush3.bf16.msra.mxu1 %v13332_v35 }
 0x8d5   :  { %11450 = vmatprep.subr.bf16.mxu0 %v12065_v21  ;;  %11471 = vmatprep.subr.bf16.mxu1 %v12065_v21  ;;  %v5842_v56 = vadd.f32 %v5830_v61, %v5778_v37  ;;  %v7192_v37 = vld [vmem:[%s14027_s12 + $0x8] sm:$0xff] }
 0x8d7   :  { %v11947_v50 = vpop.eup %11946 }
 0x8d8   :  { %11452 = vmatpush3.bf16.msra.mxu0 %v13356_v6  ;;  %11473 = vmatpush3.bf16.msra.mxu1 %v13344_v36  ;;  %v11949_v60 = vpop.eup %11948  ;;  %v5819_v7 = vadd.f32 1.0, %v11947_v50  ;;  %v7193_v50 = vld [vmem:[%s14027_s12 + $0x10] sm:$0xff] }
 0x8d9   :  { %11453 = vmatprep.subr.bf16.mxu0 %v12065_v21  ;;  %11474 = vmatprep.subr.bf16.mxu1 %v12065_v21  ;;  %v11951_v54 = vpop.eup %11950  ;;  %v13529_v59 = vmul.f32 %v11949_v60, %v5685_v42  ;;  %v7194_v60 = vld [vmem:[%s14027_s12 + $0x18] sm:$0xff] }
 0x8da   :  { %11954 = vlog2.f32 %v5819_v7  ;;  %v11953_v52 = vpop.eup %11952  ;;  %v5820_v40 = vadd.f32 1.0, %v11951_v54  ;;  %v13669_v7 = vpack.c.bf16 %v7194_v60, %v7193_v50  ;;  %v7195_v54 = vld [vmem:[%s14027_s12 + $0x20] sm:$0xff] }
 0x8db   :  { %v5789_v24 = vand.u32 2147483647, %v13529_v59  ;;  %v13538_v14 = vmul.f32 %v11953_v52, %v5686_v43 }
 0x8dc   :  { %11455 = vmatpush3.bf16.msra.mxu0 %v13368_v28  ;;  %11476 = vmatpush3.bf16.msra.mxu1 %v13356_v6  ;;  %11956 = vlog2.f32 %v5820_v40  ;;  %v7197_v40 = vld [vmem:[%s14027_s12 + $0x30] sm:$0xff] }
 0x8dd   :  { %11456 = vmatprep.subr.bf16.mxu0 %v12065_v21  ;;  %11477 = vmatprep.subr.bf16.mxu1 %v12065_v21  ;;  %v5797_v34 = vsub.f32 0.0, %v5789_v24  ;;  %v5790_v42 = vand.u32 2147483647, %v13538_v14  ;;  %v5782_v2 = vmax.f32 %v13538_v14, 0.0  ;;  %v7198_v24 = vld [vmem:[%s14027_s12 + $0x38] sm:$0xff] }
 0x8de   :  { %v13693_v14 = vpack.c.bf16 %v7198_v24, %v7197_v40 }
 0x8df   :  { %v5811_v43 = vmul.f32 1.442695, %v5797_v34  ;;  %v5798_v31 = vsub.f32 0.0, %v5790_v42  ;;  %v7199_v34 = vld [vmem:[%s14027_s12 + $0x40] sm:$0xff]  ;;  %v7200_v42 = vld [vmem:[%s14027_s12 + $0x48] sm:$0xff] }
 0x8e0   :  { %11458 = vmatpush3.bf16.msra.mxu0 %v13380_v27  ;;  %11479 = vmatpush3.bf16.msra.mxu1 %v13368_v28 }
 0x8e1   :  { %11483 = vmatprep.subr.bf16.mxu0 %v12065_v21  ;;  %11480 = vmatprep.subr.bf16.mxu1 %v12065_v21  ;;  %11958 = vpow2.f32 %v5811_v43  ;;  %v5813_v30 = vmul.f32 1.442695, %v5798_v31  ;;  %v7201_v43 = vld [vmem:[%s14027_s12 + $0x50] sm:$0xff]  ;;  %v7202_v31 = vld [vmem:[%s14027_s12 + $0x58] sm:$0xff] }
 0x8e3   :  { %10410 = vmatmul.mubr.f32.vlgmr.msra.gmra.mrb[82].mxu0 %v5841_v46  ;;  %11960 = vpow2.f32 %v5813_v30 }
 0x8e4   :  { %11485 = vmatpush3.bf16.msra.mxu0 %v13296_v4  ;;  %10479 = vmatprep.mubr.msk.f32.mxu0 %vm12066_vm1, %v12067_v22  ;;  %v11955_v13 = vpop.eup %11954 }
 0x8e5   :  { %11482 = vmatpush3.bf16.msra.mxu1 %v13380_v27  ;;  %11486 = vmatprep.subr.bf16.mxu0 %v12065_v21  ;;  %v5832_v58 = vmul.f32 0.6931472, %v11955_v13  ;;  %v13705_v13 = vpack.c.bf16 %v7200_v42, %v7199_v34 }
 0x8e6   :  { %11507 = vmatprep.subr.bf16.mxu1 %v12065_v21  ;;  %v11957_v15 = vpop.eup %11956 }
 0x8e7   :  { %v5843_v29 = vadd.f32 %v5832_v58, %v5779_v32  ;;  %v5834_v5 = vmul.f32 0.6931472, %v11957_v15  ;;  %v13717_v58 = vpack.c.bf16 %v7202_v31, %v7201_v43  ;;  %v7203_v15 = vld [vmem:[%s14027_s12 + $0x60] sm:$0xff]  ;;  %v7204_v32 = vld [vmem:[%s14027_s12 + $0x68] sm:$0xff] }
 0x8e8   :  { %10445 = vmatmul.mubr.f32.vlgmr.msra.gmra.mrb[82].mxu1 %v5842_v56  ;;  %11488 = vmatpush3.bf16.msra.mxu0 %v13308_v41  ;;  %v13657_v56 = vpack.c.bf16 %v7192_v37, %v7191_v9  ;;  %v13729_v30 = vpack.c.bf16 %v7204_v32, %v7203_v15 }
 0x8e9   :  { %11509 = vmatpush3.bf16.msra.mxu1 %v13296_v4  ;;  %11489 = vmatprep.subr.bf16.mxu0 %v12065_v21  ;;  %v5844_v25 = vadd.f32 %v5834_v5, %v5780_v55  ;;  %v7206_v5 = vld [vmem:[%s14027_s12 + $0x78] sm:$0xff] }
 0x8ea   :  { %11510 = vmatprep.subr.bf16.mxu1 %v12065_v21  ;;  %10514 = vmatprep.mubr.msk.f32.mxu1 %vm12066_vm1, %v12067_v22 }
 0x8eb   :  { %v11959_v48 = vpop.eup %11958 }
 0x8ec   :  { %11491 = vmatpush3.bf16.msra.mxu0 %v13320_v3  ;;  %v5821_v51 = vadd.f32 1.0, %v11959_v48 }
 0x8ed   :  { %11512 = vmatpush3.bf16.msra.mxu1 %v13308_v41  ;;  %11492 = vmatprep.subr.bf16.mxu0 %v12065_v21  ;;  %v11961_v17 = vpop.eup %11960 }
 0x8ee   :  { %11513 = vmatprep.subr.bf16.mxu1 %v12065_v21  ;;  %11962 = vlog2.f32 %v5821_v51 }
 0x8f0   :  { %11494 = vmatpush3.bf16.msra.mxu0 %v13332_v35 }
 0x8f1   :  { %11515 = vmatpush3.bf16.msra.mxu1 %v13320_v3  ;;  %11495 = vmatprep.subr.bf16.mxu0 %v12065_v21 }
 0x8f2   :  { %11516 = vmatprep.subr.bf16.mxu1 %v12065_v21 }
 0x8f4   :  { %11497 = vmatpush3.bf16.msra.mxu0 %v13344_v36 }
 0x8f5   :  { %11518 = vmatpush3.bf16.msra.mxu1 %v13332_v35  ;;  %11498 = vmatprep.subr.bf16.mxu0 %v12065_v21 }
 0x8f6   :  { %11519 = vmatprep.subr.bf16.mxu1 %v12065_v21 }
 0x8f8   :  { %11500 = vmatpush3.bf16.msra.mxu0 %v13356_v6 }
 0x8f9   :  { %11521 = vmatpush3.bf16.msra.mxu1 %v13344_v36  ;;  %11501 = vmatprep.subr.bf16.mxu0 %v12065_v21 }
 0x8fa   :  { %11522 = vmatprep.subr.bf16.mxu1 %v12065_v21 }
 0x8fc   :  { %11503 = vmatpush3.bf16.msra.mxu0 %v13368_v28 }
 0x8fd   :  { %11524 = vmatpush3.bf16.msra.mxu1 %v13356_v6  ;;  %11504 = vmatprep.subr.bf16.mxu0 %v12065_v21 }
 0x8fe   :  { %11525 = vmatprep.subr.bf16.mxu1 %v12065_v21 }
 0x900   :  { %11506 = vmatpush3.bf16.msra.mxu0 %v13380_v27 }
 0x901   :  { %11527 = vmatpush3.bf16.msra.mxu1 %v13368_v28  ;;  %11531 = vmatprep.subr.bf16.mxu0 %v12065_v21 }
 0x902   :  { %11528 = vmatprep.subr.bf16.mxu1 %v12065_v21 }
 0x903   :  { %10480 = vmatmul.mubr.f32.vlgmr.msra.gmra.mrb[84].mxu0 %v5843_v29  ;;  %v7205_v29 = vld [vmem:[%s14027_s12 + $0x70] sm:$0xff] }
 0x904   :  { %11533 = vmatpush3.bf16.msra.mxu0 %v13296_v4  ;;  %10549 = vmatprep.mubr.msk.f32.mxu0 %vm12066_vm1, %v12067_v22  ;;  %v13741_v55 = vpack.c.bf16 %v7206_v5, %v7205_v29 }
 0x905   :  { %11530 = vmatpush3.bf16.msra.mxu1 %v13380_v27  ;;  %11534 = vmatprep.subr.bf16.mxu0 %v12065_v21 }
 0x906   :  { %11555 = vmatprep.subr.bf16.mxu1 %v12065_v21 }
 0x908   :  { %10515 = vmatmul.mubr.f32.vlgmr.msra.gmra.mrb[84].mxu1 %v5844_v25  ;;  %11536 = vmatpush3.bf16.msra.mxu0 %v13308_v41 }
 0x909   :  { %11557 = vmatpush3.bf16.msra.mxu1 %v13296_v4  ;;  %11537 = vmatprep.subr.bf16.mxu0 %v12065_v21  ;;  %v5822_v4 = vadd.f32 1.0, %v11961_v17 }
 0x90a   :  { %11558 = vmatprep.subr.bf16.mxu1 %v12065_v21  ;;  %10584 = vmatprep.mubr.msk.f32.mxu1 %vm12066_vm1, %v12067_v22 }
 0x90b   :  { %11964 = vlog2.f32 %v5822_v4 }
 0x90c   :  { %11539 = vmatpush3.bf16.msra.mxu0 %v13320_v3 }
 0x90d   :  { %11560 = vmatpush3.bf16.msra.mxu1 %v13308_v41  ;;  %11540 = vmatprep.subr.bf16.mxu0 %v12065_v21  ;;  %v11963_v41 = vpop.eup %11962 }
 0x90e   :  { %11561 = vmatprep.subr.bf16.mxu1 %v12065_v21 }
 0x910   :  { %11542 = vmatpush3.bf16.msra.mxu0 %v13332_v35 }
 0x911   :  { %11563 = vmatpush3.bf16.msra.mxu1 %v13320_v3  ;;  %11543 = vmatprep.subr.bf16.mxu0 %v12065_v21  ;;  %v5781_v3 = vmax.f32 %v13529_v59, 0.0  ;;  %v7196_v59 = vld [vmem:[%s14027_s12 + $0x28] sm:$0xff] }
 0x912   :  { %11564 = vmatprep.subr.bf16.mxu1 %v12065_v21  ;;  %v13681_v52 = vpack.c.bf16 %v7196_v59, %v7195_v54 }
 0x914   :  { %11545 = vmatpush3.bf16.msra.mxu0 %v13344_v36 }
 0x915   :  { %11566 = vmatpush3.bf16.msra.mxu1 %v13332_v35  ;;  %11546 = vmatprep.subr.bf16.mxu0 %v12065_v21  ;;  %v5836_v35 = vmul.f32 0.6931472, %v11963_v41  ;;  %v11965_v39 = vpop.eup %11964 }
 0x916   :  { %11567 = vmatprep.subr.bf16.mxu1 %v12065_v21  ;;  %v5838_v10 = vmul.f32 0.6931472, %v11965_v39 }
 0x918   :  { %11548 = vmatpush3.bf16.msra.mxu0 %v13356_v6 }
 0x919   :  { %11569 = vmatpush3.bf16.msra.mxu1 %v13344_v36  ;;  %11549 = vmatprep.subr.bf16.mxu0 %v12065_v21  ;;  %v5845_v36 = vadd.f32 %v5836_v35, %v5781_v3 }
 0x91a   :  { %11570 = vmatprep.subr.bf16.mxu1 %v12065_v21 }
 0x91c   :  { %11551 = vmatpush3.bf16.msra.mxu0 %v13368_v28 }
 0x91d   :  { %11572 = vmatpush3.bf16.msra.mxu1 %v13356_v6  ;;  %11552 = vmatprep.subr.bf16.mxu0 %v12065_v21  ;;  %v5846_v6 = vadd.f32 %v5838_v10, %v5782_v2 }
 0x91e   :  { %11573 = vmatprep.subr.bf16.mxu1 %v12065_v21 }
 0x920   :  { %11554 = vmatpush3.bf16.msra.mxu0 %v13380_v27 }
 0x921   :  { %11575 = vmatpush3.bf16.msra.mxu1 %v13368_v28  ;;  %10587 = vmatprep.subr.mxu0 %v12067_v22 }
 0x922   :  { %11576 = vmatprep.subr.bf16.mxu1 %v12065_v21 }
 0x923   :  { %10550 = vmatmul.mubr.f32.vlgmr.msra.gmra.mrb[86].mxu0 %v5845_v36 }
 0x924   :  { %10589 = vmatprep.mubr.msk.f32.mxu0 %vm12066_vm1, %v12067_v22 }
 0x925   :  { %11578 = vmatpush3.bf16.msra.mxu1 %v13380_v27 }
 0x926   :  { %10592 = vmatprep.subr.mxu1 %v12067_v22 }
 0x928   :  { %10585 = vmatmul.mubr.f32.vlgmr.msra.gmra.mrb[86].mxu1 %v5846_v6 }
 0x929   :  { %10594 = vmatprep.mubr.msk.f32.mxu1 %vm12066_vm1, %v12067_v22 }
 0x996   :  { %v5929_v28 = vpop.f32.mrb[80].mxu0 }
 0x997   :  { %v10341_v8 = vpop.f32.mrb[81].mxu0  ;;  %10588 = vmatpush3.msk.msra.mxu0 %vm831_vm2, %v5929_v28 }
 0x998   :  { %10590 = vmatmul.mubr.msk.f32.vlgmr.msra.gmra.mrb[88].mxu0 %vm827_vm3, %v13224_v23  ;;  %10597 = vmatprep.subr.mxu0 %v12067_v22 }
 0x999   :  { %10599 = vmatprep.mubr.msk.f32.mxu0 %vm12066_vm1, %v12067_v22 }
 0x99a   :  { %v5999_v27 = vpop.f32.mrb[80].mxu1 }
 0x99b   :  { %v10376_v57 = vpop.f32.mrb[81].mxu1  ;;  %10593 = vmatpush3.msk.msra.mxu1 %vm831_vm2, %v5999_v27 }
 0x99c   :  { %10595 = vmatmul.mubr.msk.f32.vlgmr.msra.gmra.mrb[88].mxu1 %vm827_vm3, %v13233_v26  ;;  %10602 = vmatprep.subr.mxu1 %v12067_v22 }
 0x99d   :  { %10604 = vmatprep.mubr.msk.f32.mxu1 %vm12066_vm1, %v12067_v22 }
 0x9b6   :  { %v6069_v47 = vpop.f32.mrb[82].mxu0 }
 0x9b7   :  { %v10411_v49 = vpop.f32.mrb[83].mxu0  ;;  %10598 = vmatpush3.msk.msra.mxu0 %vm831_vm2, %v6069_v47 }
 0x9b8   :  { %10600 = vmatmul.mubr.msk.f32.vlgmr.msra.gmra.mrb[90].mxu0 %vm827_vm3, %v13242_v62  ;;  %10607 = vmatprep.subr.mxu0 %v12067_v22 }
 0x9b9   :  { %10609 = vmatprep.mubr.msk.f32.mxu0 %vm12066_vm1, %v12067_v22 }
 0x9bb   :  { %v6139_v38 = vpop.f32.mrb[82].mxu1 }
 0x9bc   :  { %v10446_v19 = vpop.f32.mrb[83].mxu1  ;;  %10603 = vmatpush3.msk.msra.mxu1 %vm831_vm2, %v6139_v38 }
 0x9bd   :  { %10605 = vmatmul.mubr.msk.f32.vlgmr.msra.gmra.mrb[90].mxu1 %vm827_vm3, %v13251_v0  ;;  %10612 = vmatprep.subr.mxu1 %v12067_v22 }
 0x9be   :  { %10614 = vmatprep.mubr.msk.f32.mxu1 %vm12066_vm1, %v12067_v22 }
 0x9d6   :  { %v6209_v11 = vpop.f32.mrb[84].mxu0 }
 0x9d7   :  { %v10481_v63 = vpop.f32.mrb[85].mxu0  ;;  %10608 = vmatpush3.msk.msra.mxu0 %vm831_vm2, %v6209_v11 }
 0x9d8   :  { %10610 = vmatmul.mubr.msk.f32.vlgmr.msra.gmra.mrb[92].mxu0 %vm827_vm3, %v13260_v18  ;;  %10617 = vmatprep.subr.mxu0 %v12067_v22 }
 0x9d9   :  { %10619 = vmatprep.mubr.msk.f32.mxu0 %vm12066_vm1, %v12067_v22 }
 0x9db   :  { %v6279_v12 = vpop.f32.mrb[84].mxu1 }
 0x9dc   :  { %v10516_v20 = vpop.f32.mrb[85].mxu1  ;;  %10613 = vmatpush3.msk.msra.mxu1 %vm831_vm2, %v6279_v12 }
 0x9dd   :  { %10615 = vmatmul.mubr.msk.f32.vlgmr.msra.gmra.mrb[92].mxu1 %vm827_vm3, %v13269_v33  ;;  %10622 = vmatprep.subr.mxu1 %v12067_v22 }
 0x9de   :  { %10624 = vmatprep.mubr.msk.f32.mxu1 %vm12066_vm1, %v12067_v22 }
 0x9f6   :  { %v6349_v44 = vpop.f32.mrb[86].mxu0 }
 0x9f7   :  { %v10551_v53 = vpop.f32.mrb[87].mxu0  ;;  %10618 = vmatpush3.msk.msra.mxu0 %vm831_vm2, %v6349_v44 }
 0x9f8   :  { %10620 = vmatmul.mubr.msk.f32.vlgmr.msra.gmra.mrb[94].mxu0 %vm827_vm3, %v13278_v1  ;;  %11579 = vmatprep.subr.bf16.mxu0 %v12065_v21 }
 0x9f9   :  { %10659 = vmatprep.mubr.msk.f32.mxu0 %vm12066_vm1, %v12067_v22  ;;  %11581 = vmatpush3.bf16.msra.mxu0 %v13657_v56 }
 0x9fa   :  { %11582 = vmatprep.subr.bf16.mxu0 %v12065_v21 }
 0x9fb   :  { %v6419_v46 = vpop.f32.mrb[86].mxu1 }
 0x9fc   :  { %v10586_v61 = vpop.f32.mrb[87].mxu1  ;;  %10623 = vmatpush3.msk.msra.mxu1 %vm831_vm2, %v6419_v46 }
 0x9fd   :  { %10625 = vmatmul.mubr.msk.f32.vlgmr.msra.gmra.mrb[94].mxu1 %vm827_vm3, %v13284_v45  ;;  %11603 = vmatprep.subr.bf16.mxu1 %v12065_v21 }
 0x9fe   :  { %10694 = vmatprep.mubr.msk.f32.mxu1 %vm12066_vm1, %v12067_v22  ;;  %11605 = vmatpush3.bf16.msra.mxu1 %v13657_v56 }
 0x9ff   :  { %11606 = vmatprep.subr.bf16.mxu1 %v12065_v21  ;;  %11584 = vmatpush3.bf16.msra.mxu0 %v13669_v7 }
 0xa00   :  { %11585 = vmatprep.subr.bf16.mxu0 %v12065_v21 }
 0xa02   :  { %11608 = vmatpush3.bf16.msra.mxu1 %v13669_v7 }
 0xa03   :  { %11609 = vmatprep.subr.bf16.mxu1 %v12065_v21  ;;  %11587 = vmatpush3.bf16.msra.mxu0 %v13681_v52 }
 0xa04   :  { %11588 = vmatprep.subr.bf16.mxu0 %v12065_v21 }
 0xa06   :  { %11611 = vmatpush3.bf16.msra.mxu1 %v13681_v52 }
 0xa07   :  { %11612 = vmatprep.subr.bf16.mxu1 %v12065_v21  ;;  %11590 = vmatpush3.bf16.msra.mxu0 %v13693_v14 }
 0xa08   :  { %11591 = vmatprep.subr.bf16.mxu0 %v12065_v21 }
 0xa0a   :  { %11614 = vmatpush3.bf16.msra.mxu1 %v13693_v14 }
 0xa0b   :  { %11615 = vmatprep.subr.bf16.mxu1 %v12065_v21  ;;  %11593 = vmatpush3.bf16.msra.mxu0 %v13705_v13 }
 0xa0c   :  { %11594 = vmatprep.subr.bf16.mxu0 %v12065_v21 }
 0xa0e   :  { %11617 = vmatpush3.bf16.msra.mxu1 %v13705_v13 }
 0xa0f   :  { %11618 = vmatprep.subr.bf16.mxu1 %v12065_v21  ;;  %11596 = vmatpush3.bf16.msra.mxu0 %v13717_v58 }
 0xa10   :  { %11597 = vmatprep.subr.bf16.mxu0 %v12065_v21 }
 0xa12   :  { %11620 = vmatpush3.bf16.msra.mxu1 %v13717_v58 }
 0xa13   :  { %11621 = vmatprep.subr.bf16.mxu1 %v12065_v21  ;;  %11599 = vmatpush3.bf16.msra.mxu0 %v13729_v30 }
 0xa14   :  { %11600 = vmatprep.subr.bf16.mxu0 %v12065_v21 }
 0xa16   :  { %11623 = vmatpush3.bf16.msra.mxu1 %v13729_v30 }
 0xa17   :  { %11624 = vmatprep.subr.bf16.mxu1 %v12065_v21  ;;  %11602 = vmatpush3.bf16.msra.mxu0 %v13741_v55 }
 0xa18   :  { %11627 = vmatprep.subr.bf16.mxu0 %v12065_v21 }
 0xa1a   :  { %11626 = vmatpush3.bf16.msra.mxu1 %v13741_v55 }
 0xa1b   :  { %11651 = vmatprep.subr.bf16.mxu1 %v12065_v21 }
 0xa6b   :  { %v6492_v25 = vpop.f32.mrb[88].mxu0 }
 0xa6c   :  { %v7007_v48 = vmul.f32 0.85, %v6492_v25  ;;  %v10591_v51 = vpop.f32.mrb[89].mxu0 }
 0xa6e   :  { %v7015_v17 = vadd.f32 %v13389_v16, %v7007_v48 }
 0xa6f   :  { %v6565_v41 = vpop.f32.mrb[88].mxu1 }
 0xa70   :  { %v7023_v4 = vmax.f32 %v7015_v17, 0.0  ;;  %v7008_v3 = vmul.f32 0.85, %v6565_v41  ;;  %v10596_v35 = vpop.f32.mrb[89].mxu1 }
 0xa72   :  { %v7031_v39 = vsel %vm831_vm2, %v7023_v4, 0.0  ;;  %v7016_v2 = vadd.f32 %v13389_v16, %v7008_v3 }
 0xa73   :  { %v7032_v36 = vrot.slane %v7031_v39, 4 }
 0xa74   :  { %v7024_v6 = vmax.f32 %v7016_v2, 0.0 }
 0xa75   :  { %v7033_v10 = vadd.f32 %v7032_v36, %v7031_v39 }
 0xa76   :  { %v7038_v8 = vsel %vm831_vm2, %v7024_v6, 0.0 }
 0xa77   :  { %v7034_v28 = vrot.slane %v7033_v10, 2  ;;  %v7039_v27 = vrot.slane %v7038_v8, 4 }
 0xa79   :  { %v7035_v57 = vadd.f32 %v7034_v28, %v7033_v10  ;;  %v7040_v47 = vadd.f32 %v7039_v27, %v7038_v8 }
 0xa7b   :  { %v7036_v49 = vrot.slane %v7035_v57, 1  ;;  %v7041_v38 = vrot.slane %v7040_v47, 2 }
 0xa7d   :  { %v7037_v19 = vadd.f32 %v7036_v49, %v7035_v57  ;;  %v7042_v11 = vadd.f32 %v7041_v38, %v7040_v47 }
 0xa7f   :  { %v7087_v63 = vmul.f32 0.2, %v7037_v19  ;;  %v7043_v12 = vrot.slane %v7042_v11, 1 }
 0xa81   :  { %v7095_v20 = vadd.f32 1e-06, %v7087_v63  ;;  %v7044_v44 = vadd.f32 %v7043_v12, %v7042_v11 }
 0xa83   :  { %11966 = vrcp.f32 %v7095_v20  ;;  %v7088_v53 = vmul.f32 0.2, %v7044_v44 }
 0xa85   :  { %v7096_v46 = vadd.f32 1e-06, %v7088_v53 }
 0xa87   :  { %11968 = vrcp.f32 %v7096_v46 }
 0xa8b   :  { %v6638_v61 = vpop.f32.mrb[90].mxu0 }
 0xa8c   :  { %v7009_v9 = vmul.f32 0.85, %v6638_v61  ;;  %v10601_v37 = vpop.f32.mrb[91].mxu0 }
 0xa8d   :  { %v11967_v50 = vpop.eup %11966  ;;  %v13761_v37 = vld [vmem:[%s14019_s6] sm:$0x1f] }
 0xa8e   :  { %v7104_v60 = vmul.f32 %v11967_v50, %v7023_v4  ;;  %v7017_v54 = vadd.f32 %v13389_v16, %v7009_v9 }
 0xa90   :  { %v7127_v59 = vand.u32 2147483647, %v7104_v60  ;;  %v7025_v40 = vmax.f32 %v7017_v54, 0.0  ;;  %v6711_v24 = vpop.f32.mrb[90].mxu1  ;;  %v7119_v9 = vmax.f32 %v7104_v60, 0.0 }
 0xa91   :  { %v7010_v34 = vmul.f32 0.85, %v6711_v24  ;;  %v10606_v42 = vpop.f32.mrb[91].mxu1  ;;  %v11969_v43 = vpop.eup %11968 }
 0xa92   :  { %v7135_v31 = vsub.f32 0.0, %v7127_v59  ;;  %v7045_v15 = vsel %vm831_vm2, %v7025_v40, 0.0  ;;  %v13753_v32 = vmul.f32 %v11969_v43, %v7024_v6 }
 0xa93   :  { %v7046_v29 = vrot.slane %v7045_v15, 4  ;;  %v7018_v5 = vadd.f32 %v13389_v16, %v7010_v34 }
 0xa94   :  { %v7143_v25 = vmul.f32 1.442695, %v7135_v31  ;;  %v7128_v48 = vand.u32 2147483647, %v13753_v32 }
 0xa95   :  { %v7047_v51 = vadd.f32 %v7046_v29, %v7045_v15  ;;  %v7026_v17 = vmax.f32 %v7018_v5, 0.0  ;;  %v7120_v29 = vmax.f32 %v13753_v32, 0.0 }
 0xa96   :  { %11970 = vpow2.f32 %v7143_v25  ;;  %v7136_v4 = vsub.f32 0.0, %v7128_v48 }
 0xa97   :  { %v7048_v41 = vrot.slane %v7047_v51, 2  ;;  %v7052_v3 = vsel %vm831_vm2, %v7026_v17, 0.0 }
 0xa98   :  { %v7053_v35 = vrot.slane %v7052_v3, 4  ;;  %v7145_v39 = vmul.f32 1.442695, %v7136_v4 }
 0xa99   :  { %v7049_v36 = vadd.f32 %v7048_v41, %v7047_v51 }
 0xa9a   :  { %v7054_v2 = vadd.f32 %v7053_v35, %v7052_v3  ;;  %11972 = vpow2.f32 %v7145_v39 }
 0xa9b   :  { %v7050_v10 = vrot.slane %v7049_v36, 1 }
 0xa9c   :  { %v7055_v6 = vrot.slane %v7054_v2, 2 }
 0xa9d   :  { %v7051_v28 = vadd.f32 %v7050_v10, %v7049_v36 }
 0xa9e   :  { %v7056_v8 = vadd.f32 %v7055_v6, %v7054_v2 }
 0xa9f   :  { %v7089_v16 = vmul.f32 0.2, %v7051_v28 }
 0xaa0   :  { %v11971_v27 = vpop.eup %11970  ;;  %v7057_v57 = vrot.slane %v7056_v8, 1 }
 0xaa1   :  { %v7159_v47 = vadd.f32 1.0, %v11971_v27  ;;  %v7097_v49 = vadd.f32 1e-06, %v7089_v16 }
 0xaa2   :  { %v7058_v38 = vadd.f32 %v7057_v57, %v7056_v8 }
 0xaa3   :  { %11974 = vlog2.f32 %v7159_v47 }
 0xaa4   :  { %11976 = vrcp.f32 %v7097_v49  ;;  %v7090_v19 = vmul.f32 0.2, %v7058_v38  ;;  %v11973_v11 = vpop.eup %11972 }
 0xaa5   :  { %v7160_v63 = vadd.f32 1.0, %v11973_v11 }
 0xaa6   :  { %v7098_v12 = vadd.f32 1e-06, %v7090_v19 }
 0xaa7   :  { %11978 = vlog2.f32 %v7160_v63 }
 0xaa8   :  { %11980 = vrcp.f32 %v7098_v12 }
 0xaab   :  { %v6784_v20 = vpop.f32.mrb[92].mxu0 }
 0xaac   :  { %v7011_v44 = vmul.f32 0.85, %v6784_v20  ;;  %v10611_v53 = vpop.f32.mrb[93].mxu0 }
 0xaad   :  { %v11975_v46 = vpop.eup %11974 }
 0xaae   :  { %v11977_v61 = vpop.eup %11976  ;;  %v13764_v50 = vadd.f32 %v13761_v37, %v7011_v44  ;;  %v7168_v54 = vmul.f32 0.6931472, %v11975_v46 }
 0xaaf   :  { %v13766_v59 = vmul.f32 %v11977_v61, %v7025_v40 }
 0xab0   :  { %v7027_v24 = vmax.f32 %v13764_v50, 0.0  ;;  %v6857_v34 = vpop.f32.mrb[92].mxu1  ;;  %v7183_v42 = vadd.f32 %v7168_v54, %v7119_v9 }
 0xab1   :  { %v7129_v43 = vand.u32 2147483647, %v13766_v59  ;;  %v7012_v31 = vmul.f32 0.85, %v6857_v34  ;;  %v10616_v15 = vpop.f32.mrb[93].mxu1  ;;  %v11979_v60 = vpop.eup %11978 }
 0xab2   :  { %v7059_v5 = vsel %vm831_vm2, %v7027_v24, 0.0  ;;  %10660 = vmatmul.mubr.f32.vlgmr.msra.gmra.mrb[96].mxu0 %v7183_v42  ;;  %v11981_v25 = vpop.eup %11980  ;;  %v7170_v4 = vmul.f32 0.6931472, %v11979_v60  ;;  %v7121_v60 = vmax.f32 %v13766_v59, 0.0 }
 0xab3   :  { %v7137_v48 = vsub.f32 0.0, %v7129_v43  ;;  %v7060_v40 = vrot.slane %v7059_v5, 4  ;;  %v13775_v51 = vadd.f32 %v13761_v37, %v7012_v31  ;;  %11629 = vmatpush3.bf16.msra.mxu0 %v13657_v56  ;;  %10729 = vmatprep.mubr.msk.f32.mxu0 %vm12066_vm1, %v12067_v22  ;;  %v13780_v41 = vmul.f32 %v11981_v25, %v7026_v17 }
 0xab4   :  { %11630 = vmatprep.subr.bf16.mxu0 %v12065_v21  ;;  %v7184_v39 = vadd.f32 %v7170_v4, %v7120_v29 }
 0xab5   :  { %v7147_v32 = vmul.f32 1.442695, %v7137_v48  ;;  %v7061_v3 = vadd.f32 %v7060_v40, %v7059_v5  ;;  %v7028_v35 = vmax.f32 %v13775_v51, 0.0  ;;  %v7130_v36 = vand.u32 2147483647, %v13780_v41 }
 0xab6   :  { %10695 = vmatmul.mubr.f32.vlgmr.msra.gmra.mrb[96].mxu1 %v7184_v39 }
 0xab7   :  { %11982 = vpow2.f32 %v7147_v32  ;;  %v7062_v2 = vrot.slane %v7061_v3, 2  ;;  %v7066_v10 = vsel %vm831_vm2, %v7028_v35, 0.0  ;;  %11632 = vmatpush3.bf16.msra.mxu0 %v13669_v7  ;;  %v7138_v17 = vsub.f32 0.0, %v7130_v36  ;;  %11653 = vmatpush3.bf16.msra.mxu1 %v13657_v56 }
 0xab8   :  { %v7067_v6 = vrot.slane %v7066_v10, 4  ;;  %11633 = vmatprep.subr.bf16.mxu0 %v12065_v21  ;;  %11654 = vmatprep.subr.bf16.mxu1 %v12065_v21 }
 0xab9   :  { %v7063_v28 = vadd.f32 %v7062_v2, %v7061_v3  ;;  %10764 = vmatprep.mubr.msk.f32.mxu1 %vm12066_vm1, %v12067_v22  ;;  %v7149_v8 = vmul.f32 1.442695, %v7138_v17 }
 0xaba   :  { %v7068_v16 = vadd.f32 %v7067_v6, %v7066_v10  ;;  %v7122_v10 = vmax.f32 %v13780_v41, 0.0 }
 0xabb   :  { %v7064_v27 = vrot.slane %v7063_v28, 1  ;;  %11635 = vmatpush3.bf16.msra.mxu0 %v13681_v52  ;;  %11984 = vpow2.f32 %v7149_v8  ;;  %11656 = vmatpush3.bf16.msra.mxu1 %v13669_v7 }
 0xabc   :  { %v7069_v57 = vrot.slane %v7068_v16, 2  ;;  %11636 = vmatprep.subr.bf16.mxu0 %v12065_v21  ;;  %11657 = vmatprep.subr.bf16.mxu1 %v12065_v21 }
 0xabd   :  { %v7065_v47 = vadd.f32 %v7064_v27, %v7063_v28 }
 0xabe   :  { %v7070_v49 = vadd.f32 %v7069_v57, %v7068_v16 }
 0xabf   :  { %v7091_v38 = vmul.f32 0.2, %v7065_v47  ;;  %11638 = vmatpush3.bf16.msra.mxu0 %v13693_v14  ;;  %11659 = vmatpush3.bf16.msra.mxu1 %v13681_v52 }
 0xac0   :  { %v7071_v19 = vrot.slane %v7070_v49, 1  ;;  %11639 = vmatprep.subr.bf16.mxu0 %v12065_v21  ;;  %11660 = vmatprep.subr.bf16.mxu1 %v12065_v21 }
 0xac1   :  { %v11983_v11 = vpop.eup %11982  ;;  %v7099_v63 = vadd.f32 1e-06, %v7091_v38 }
 0xac2   :  { %v7161_v12 = vadd.f32 1.0, %v11983_v11  ;;  %v7072_v20 = vadd.f32 %v7071_v19, %v7070_v49 }
 0xac3   :  { %11986 = vrcp.f32 %v7099_v63  ;;  %11641 = vmatpush3.bf16.msra.mxu0 %v13705_v13  ;;  %11662 = vmatpush3.bf16.msra.mxu1 %v13693_v14 }
 0xac4   :  { %11988 = vlog2.f32 %v7161_v12  ;;  %v7092_v44 = vmul.f32 0.2, %v7072_v20  ;;  %11642 = vmatprep.subr.bf16.mxu0 %v12065_v21  ;;  %11663 = vmatprep.subr.bf16.mxu1 %v12065_v21 }
 0xac5   :  { %v11985_v53 = vpop.eup %11984 }
 0xac6   :  { %v7100_v46 = vadd.f32 1e-06, %v7092_v44  ;;  %v7162_v61 = vadd.f32 1.0, %v11985_v53 }
 0xac7   :  { %11644 = vmatpush3.bf16.msra.mxu0 %v13717_v58  ;;  %11665 = vmatpush3.bf16.msra.mxu1 %v13705_v13 }
 0xac8   :  { %11990 = vrcp.f32 %v7100_v46  ;;  %11645 = vmatprep.subr.bf16.mxu0 %v12065_v21  ;;  %11666 = vmatprep.subr.bf16.mxu1 %v12065_v21 }
 0xac9   :  { %11992 = vlog2.f32 %v7162_v61 }
 0xacb   :  { %v6930_v9 = vpop.f32.mrb[94].mxu0  ;;  %11647 = vmatpush3.bf16.msra.mxu0 %v13729_v30  ;;  %11668 = vmatpush3.bf16.msra.mxu1 %v13717_v58 }
 0xacc   :  { %v7013_v54 = vmul.f32 0.85, %v6930_v9  ;;  %v10621_v34 = vpop.f32.mrb[95].mxu0  ;;  %11648 = vmatprep.subr.bf16.mxu0 %v12065_v21  ;;  %11669 = vmatprep.subr.bf16.mxu1 %v12065_v21 }
 0xacd   :  { %v11987_v42 = vpop.eup %11986 }
 0xace   :  { %v11989_v43 = vpop.eup %11988  ;;  %v13816_v31 = vmul.f32 %v11987_v42, %v7027_v24  ;;  %v13819_v15 = vadd.f32 %v13761_v37, %v7013_v54 }
 0xacf   :  { %11650 = vmatpush3.bf16.msra.mxu0 %v13741_v55  ;;  %v7172_v29 = vmul.f32 0.6931472, %v11989_v43  ;;  %11671 = vmatpush3.bf16.msra.mxu1 %v13729_v30 }
 0xad0   :  { %v7131_v5 = vand.u32 2147483647, %v13816_v31  ;;  %v7029_v25 = vmax.f32 %v13819_v15, 0.0  ;;  %v7003_v48 = vpop.f32.mrb[94].mxu1  ;;  %11675 = vmatprep.subr.bf16.mxu0 %v12065_v21  ;;  %11672 = vmatprep.subr.bf16.mxu1 %v12065_v21 }
 0xad1   :  { %v7014_v50 = vmul.f32 0.85, %v7003_v48  ;;  %v10626_v24 = vpop.f32.mrb[95].mxu1  ;;  %v7185_v40 = vadd.f32 %v7172_v29, %v7121_v60 }
 0xad2   :  { %v11991_v4 = vpop.eup %11990  ;;  %v7139_v32 = vsub.f32 0.0, %v7131_v5  ;;  %v7073_v59 = vsel %vm831_vm2, %v7029_v25, 0.0  ;;  %v7123_v5 = vmax.f32 %v13816_v31, 0.0 }
 0xad3   :  { %v11993_v3 = vpop.eup %11992  ;;  %v13833_v39 = vmul.f32 %v11991_v4, %v7028_v35  ;;  %v7074_v36 = vrot.slane %v7073_v59, 4  ;;  %v13836_v2 = vadd.f32 %v13761_v37, %v7014_v50  ;;  %10730 = vmatmul.mubr.f32.vlgmr.msra.gmra.mrb[98].mxu0 %v7185_v40  ;;  %11674 = vmatpush3.bf16.msra.mxu1 %v13741_v55 }
 0xad4   :  { %v7151_v17 = vmul.f32 1.442695, %v7139_v32  ;;  %11677 = vmatpush3.bf16.msra.mxu0 %v13657_v56  ;;  %v7174_v6 = vmul.f32 0.6931472, %v11993_v3  ;;  %11699 = vmatprep.subr.bf16.mxu1 %v12065_v21 }
 0xad5   :  { %v7132_v28 = vand.u32 2147483647, %v13833_v39  ;;  %v7075_v8 = vadd.f32 %v7074_v36, %v7073_v59  ;;  %v7030_v51 = vmax.f32 %v13836_v2, 0.0  ;;  %11678 = vmatprep.subr.bf16.mxu0 %v12065_v21  ;;  %10799 = vmatprep.mubr.msk.f32.mxu0 %vm12066_vm1, %v12067_v22  ;;  %v7124_v32 = vmax.f32 %v13833_v39, 0.0 }
 0xad6   :  { %11994 = vpow2.f32 %v7151_v17  ;;  %v7186_v35 = vadd.f32 %v7174_v6, %v7122_v10 }
 0xad7   :  { %v7140_v41 = vsub.f32 0.0, %v7132_v28  ;;  %v7076_v16 = vrot.slane %v7075_v8, 2  ;;  %v7080_v27 = vsel %vm831_vm2, %v7030_v51, 0.0 }
 0xad8   :  { %v7081_v57 = vrot.slane %v7080_v27, 4  ;;  %10765 = vmatmul.mubr.f32.vlgmr.msra.gmra.mrb[98].mxu1 %v7186_v35  ;;  %11680 = vmatpush3.bf16.msra.mxu0 %v13669_v7 }
 0xad9   :  { %v7153_v47 = vmul.f32 1.442695, %v7140_v41  ;;  %v7077_v49 = vadd.f32 %v7076_v16, %v7075_v8  ;;  %11701 = vmatpush3.bf16.msra.mxu1 %v13657_v56  ;;  %11681 = vmatprep.subr.bf16.mxu0 %v12065_v21 }
 0xada   :  { %v7082_v38 = vadd.f32 %v7081_v57, %v7080_v27  ;;  %11702 = vmatprep.subr.bf16.mxu1 %v12065_v21  ;;  %10834 = vmatprep.mubr.msk.f32.mxu1 %vm12066_vm1, %v12067_v22 }
 0xadb   :  { %11996 = vpow2.f32 %v7153_v47  ;;  %v7078_v19 = vrot.slane %v7077_v49, 1 }
 0xadc   :  { %v7083_v11 = vrot.slane %v7082_v38, 2  ;;  %11683 = vmatpush3.bf16.msra.mxu0 %v13681_v52 }
 0xadd   :  { %v7079_v63 = vadd.f32 %v7078_v19, %v7077_v49  ;;  %11704 = vmatpush3.bf16.msra.mxu1 %v13669_v7  ;;  %11684 = vmatprep.subr.bf16.mxu0 %v12065_v21 }
 0xade   :  { %v7084_v12 = vadd.f32 %v7083_v11, %v7082_v38  ;;  %11705 = vmatprep.subr.bf16.mxu1 %v12065_v21 }
 0xadf   :  { %v7093_v20 = vmul.f32 0.2, %v7079_v63 }
 0xae0   :  { %v11995_v44 = vpop.eup %11994  ;;  %v7085_v53 = vrot.slane %v7084_v12, 1  ;;  %11686 = vmatpush3.bf16.msra.mxu0 %v13693_v14 }
 0xae1   :  { %v7163_v46 = vadd.f32 1.0, %v11995_v44  ;;  %v7101_v61 = vadd.f32 1e-06, %v7093_v20  ;;  %11707 = vmatpush3.bf16.msra.mxu1 %v13681_v52  ;;  %11687 = vmatprep.subr.bf16.mxu0 %v12065_v21 }
 0xae2   :  { %v7086_v9 = vadd.f32 %v7085_v53, %v7084_v12  ;;  %11708 = vmatprep.subr.bf16.mxu1 %v12065_v21 }
 0xae3   :  { %11998 = vlog2.f32 %v7163_v46 }
 0xae4   :  { %12000 = vrcp.f32 %v7101_v61  ;;  %v7094_v54 = vmul.f32 0.2, %v7086_v9  ;;  %11689 = vmatpush3.bf16.msra.mxu0 %v13705_v13 }
 0xae5   :  { %v11997_v34 = vpop.eup %11996  ;;  %11710 = vmatpush3.bf16.msra.mxu1 %v13693_v14  ;;  %11690 = vmatprep.subr.bf16.mxu0 %v12065_v21 }
 0xae6   :  { %v7164_v42 = vadd.f32 1.0, %v11997_v34  ;;  %v7102_v43 = vadd.f32 1e-06, %v7094_v54  ;;  %11711 = vmatprep.subr.bf16.mxu1 %v12065_v21 }
 0xae8   :  { %12002 = vlog2.f32 %v7164_v42  ;;  %11692 = vmatpush3.bf16.msra.mxu0 %v13717_v58 }
 0xae9   :  { %12004 = vrcp.f32 %v7102_v43  ;;  %11713 = vmatpush3.bf16.msra.mxu1 %v13705_v13  ;;  %11693 = vmatprep.subr.bf16.mxu0 %v12065_v21 }
 0xaea   :  { %11714 = vmatprep.subr.bf16.mxu1 %v12065_v21 }
 0xaec   :  { %11695 = vmatpush3.bf16.msra.mxu0 %v13729_v30 }
 0xaed   :  { %v11999_v60 = vpop.eup %11998  ;;  %11716 = vmatpush3.bf16.msra.mxu1 %v13717_v58  ;;  %11696 = vmatprep.subr.bf16.mxu0 %v12065_v21 }
 0xaee   :  { %v12001_v29 = vpop.eup %12000  ;;  %11717 = vmatprep.subr.bf16.mxu1 %v12065_v21  ;;  %v7176_v48 = vmul.f32 0.6931472, %v11999_v60 }
 0xaef   :  { %v13879_v50 = vmul.f32 %v12001_v29, %v7029_v25 }
 0xaf0   :  { %11698 = vmatpush3.bf16.msra.mxu0 %v13741_v55  ;;  %v7187_v24 = vadd.f32 %v7176_v48, %v7123_v5 }
 0xaf1   :  { %v7133_v40 = vand.u32 2147483647, %v13879_v50  ;;  %11719 = vmatpush3.bf16.msra.mxu1 %v13729_v30  ;;  %11723 = vmatprep.subr.bf16.mxu0 %v12065_v21 }
 0xaf2   :  { %v12003_v4 = vpop.eup %12002  ;;  %11720 = vmatprep.subr.bf16.mxu1 %v12065_v21 }
 0xaf3   :  { %v12005_v31 = vpop.eup %12004  ;;  %v7141_v59 = vsub.f32 0.0, %v7133_v40  ;;  %10800 = vmatmul.mubr.f32.vlgmr.msra.gmra.mrb[100].mxu0 %v7187_v24  ;;  %v7178_v15 = vmul.f32 0.6931472, %v12003_v4 }
 0xaf4   :  { %v7118_v25 = vmul.f32 %v12005_v31, %v7030_v51  ;;  %11725 = vmatpush3.bf16.msra.mxu0 %v13657_v56  ;;  %10869 = vmatprep.mubr.msk.f32.mxu0 %vm12066_vm1, %v12067_v22 }
 0xaf5   :  { %v7155_v3 = vmul.f32 1.442695, %v7141_v59  ;;  %11722 = vmatpush3.bf16.msra.mxu1 %v13741_v55  ;;  %v7188_v36 = vadd.f32 %v7178_v15, %v7124_v32  ;;  %11726 = vmatprep.subr.bf16.mxu0 %v12065_v21 }
 0xaf6   :  { %v7134_v10 = vand.u32 2147483647, %v7118_v25  ;;  %11747 = vmatprep.subr.bf16.mxu1 %v12065_v21 }
 0xaf7   :  { %12006 = vpow2.f32 %v7155_v3 }
 0xaf8   :  { %v7142_v39 = vsub.f32 0.0, %v7134_v10  ;;  %10835 = vmatmul.mubr.f32.vlgmr.msra.gmra.mrb[100].mxu1 %v7188_v36  ;;  %11728 = vmatpush3.bf16.msra.mxu0 %v13669_v7 }
 0xaf9   :  { %11749 = vmatpush3.bf16.msra.mxu1 %v13657_v56  ;;  %11729 = vmatprep.subr.bf16.mxu0 %v12065_v21 }
 0xafa   :  { %v7157_v2 = vmul.f32 1.442695, %v7142_v39  ;;  %11750 = vmatprep.subr.bf16.mxu1 %v12065_v21  ;;  %10904 = vmatprep.mubr.msk.f32.mxu1 %vm12066_vm1, %v12067_v22 }
 0xafc   :  { %12008 = vpow2.f32 %v7157_v2  ;;  %11731 = vmatpush3.bf16.msra.mxu0 %v13681_v52 }
 0xafd   :  { %11752 = vmatpush3.bf16.msra.mxu1 %v13669_v7  ;;  %11732 = vmatprep.subr.bf16.mxu0 %v12065_v21 }
 0xafe   :  { %11753 = vmatprep.subr.bf16.mxu1 %v12065_v21 }
 0xb00   :  { %11734 = vmatpush3.bf16.msra.mxu0 %v13693_v14 }
 0xb01   :  { %v12007_v56 = vpop.eup %12006  ;;  %11755 = vmatpush3.bf16.msra.mxu1 %v13681_v52  ;;  %11735 = vmatprep.subr.bf16.mxu0 %v12065_v21 }
 0xb02   :  { %v7165_v17 = vadd.f32 1.0, %v12007_v56  ;;  %11756 = vmatprep.subr.bf16.mxu1 %v12065_v21 }
 0xb04   :  { %12010 = vlog2.f32 %v7165_v17  ;;  %11737 = vmatpush3.bf16.msra.mxu0 %v13705_v13 }
 0xb05   :  { %11758 = vmatpush3.bf16.msra.mxu1 %v13693_v14  ;;  %11738 = vmatprep.subr.bf16.mxu0 %v12065_v21  ;;  %v7125_v14 = vmax.f32 %v13879_v50, 0.0 }
 0xb06   :  { %v12009_v7 = vpop.eup %12008  ;;  %11759 = vmatprep.subr.bf16.mxu1 %v12065_v21 }
 0xb07   :  { %v7166_v6 = vadd.f32 1.0, %v12009_v7 }
 0xb08   :  { %11740 = vmatpush3.bf16.msra.mxu0 %v13717_v58 }
 0xb09   :  { %12012 = vlog2.f32 %v7166_v6  ;;  %11761 = vmatpush3.bf16.msra.mxu1 %v13705_v13  ;;  %11741 = vmatprep.subr.bf16.mxu0 %v12065_v21 }
 0xb0a   :  { %11762 = vmatprep.subr.bf16.mxu1 %v12065_v21 }
 0xb0c   :  { %11743 = vmatpush3.bf16.msra.mxu0 %v13729_v30 }
 0xb0d   :  { %11764 = vmatpush3.bf16.msra.mxu1 %v13717_v58  ;;  %11744 = vmatprep.subr.bf16.mxu0 %v12065_v21  ;;  %v7126_v58 = vmax.f32 %v7118_v25, 0.0 }
 0xb0e   :  { %v12011_v52 = vpop.eup %12010  ;;  %11765 = vmatprep.subr.bf16.mxu1 %v12065_v21 }
 0xb0f   :  { %v7180_v28 = vmul.f32 0.6931472, %v12011_v52 }
 0xb10   :  { %11746 = vmatpush3.bf16.msra.mxu0 %v13741_v55 }
 0xb11   :  { %11767 = vmatpush3.bf16.msra.mxu1 %v13729_v30  ;;  %v7189_v13 = vadd.f32 %v7180_v28, %v7125_v14  ;;  %10907 = vmatprep.subr.mxu0 %v12067_v22 }
 0xb12   :  { %11768 = vmatprep.subr.bf16.mxu1 %v12065_v21 }
 0xb13   :  { %v12013_v8 = vpop.eup %12012  ;;  %10870 = vmatmul.mubr.f32.vlgmr.msra.gmra.mrb[102].mxu0 %v7189_v13 }
 0xb14   :  { %v7182_v51 = vmul.f32 0.6931472, %v12013_v8  ;;  %10909 = vmatprep.mubr.msk.f32.mxu0 %vm12066_vm1, %v12067_v22 }
 0xb15   :  { %11770 = vmatpush3.bf16.msra.mxu1 %v13741_v55 }
 0xb16   :  { %v7190_v35 = vadd.f32 %v7182_v51, %v7126_v58  ;;  %10912 = vmatprep.subr.mxu1 %v12067_v22 }
 0xb18   :  { %10905 = vmatmul.mubr.f32.vlgmr.msra.gmra.mrb[102].mxu1 %v7190_v35 }
 0xb19   :  { %10914 = vmatprep.mubr.msk.f32.mxu1 %vm12066_vm1, %v12067_v22 }
 0xb85   :  { %v7273_v30 = vpop.f32.mrb[96].mxu0 }
 0xb86   :  { %v10661_v41 = vpop.f32.mrb[97].mxu0  ;;  %10908 = vmatpush3.msk.msra.mxu0 %vm831_vm2, %v7273_v30 }
 0xb87   :  { %10910 = vmatmul.mubr.msk.f32.vlgmr.msra.gmra.mrb[104].mxu0 %vm827_vm3, %v13224_v23  ;;  %10917 = vmatprep.subr.mxu0 %v12067_v22 }
 0xb88   :  { %10919 = vmatprep.mubr.msk.f32.mxu0 %vm12066_vm1, %v12067_v22 }
 0xb89   :  { %v7343_v21 = vpop.f32.mrb[96].mxu1 }
 0xb8a   :  { %v10696_v55 = vpop.f32.mrb[97].mxu1  ;;  %10913 = vmatpush3.msk.msra.mxu1 %vm831_vm2, %v7343_v21 }
 0xb8b   :  { %10915 = vmatmul.mubr.msk.f32.vlgmr.msra.gmra.mrb[104].mxu1 %vm827_vm3, %v13233_v26  ;;  %10922 = vmatprep.subr.mxu1 %v12067_v22 }
 0xb8c   :  { %10924 = vmatprep.mubr.msk.f32.mxu1 %vm12066_vm1, %v12067_v22 }
 0xba6   :  { %v7413_v16 = vpop.f32.mrb[98].mxu0 }
 0xba7   :  { %v10731_v27 = vpop.f32.mrb[99].mxu0  ;;  %10918 = vmatpush3.msk.msra.mxu0 %vm831_vm2, %v7413_v16 }
 0xba8   :  { %10920 = vmatmul.mubr.msk.f32.vlgmr.msra.gmra.mrb[106].mxu0 %vm827_vm3, %v13242_v62  ;;  %10927 = vmatprep.subr.mxu0 %v12067_v22 }
 0xba9   :  { %10929 = vmatprep.mubr.msk.f32.mxu0 %vm12066_vm1, %v12067_v22 }
 0xbab   :  { %v7483_v23 = vpop.f32.mrb[98].mxu1 }
 0xbac   :  { %v10766_v57 = vpop.f32.mrb[99].mxu1  ;;  %10923 = vmatpush3.msk.msra.mxu1 %vm831_vm2, %v7483_v23 }
 0xbad   :  { %10925 = vmatmul.mubr.msk.f32.vlgmr.msra.gmra.mrb[106].mxu1 %vm827_vm3, %v13251_v0  ;;  %10932 = vmatprep.subr.mxu1 %v12067_v22 }
 0xbae   :  { %10934 = vmatprep.mubr.msk.f32.mxu1 %vm12066_vm1, %v12067_v22 }
 0xbc6   :  { %v7553_v26 = vpop.f32.mrb[100].mxu0 }
 0xbc7   :  { %v10801_v47 = vpop.f32.mrb[101].mxu0  ;;  %10928 = vmatpush3.msk.msra.mxu0 %vm831_vm2, %v7553_v26 }
 0xbc8   :  { %10930 = vmatmul.mubr.msk.f32.vlgmr.msra.gmra.mrb[108].mxu0 %vm827_vm3, %v13260_v18  ;;  %10937 = vmatprep.subr.mxu0 %v12067_v22 }
 0xbc9   :  { %10939 = vmatprep.mubr.msk.f32.mxu0 %vm12066_vm1, %v12067_v22 }
 0xbcb   :  { %v7623_v62 = vpop.f32.mrb[100].mxu1 }
 0xbcc   :  { %v10836_v49 = vpop.f32.mrb[101].mxu1  ;;  %10933 = vmatpush3.msk.msra.mxu1 %vm831_vm2, %v7623_v62 }
 0xbcd   :  { %10935 = vmatmul.mubr.msk.f32.vlgmr.msra.gmra.mrb[108].mxu1 %vm827_vm3, %v13269_v33  ;;  %10942 = vmatprep.subr.mxu1 %v12067_v22 }
 0xbce   :  { %10944 = vmatprep.mubr.msk.f32.mxu1 %vm12066_vm1, %v12067_v22 }
 0xbe6   :  { %v7693_v0 = vpop.f32.mrb[102].mxu0 }
 0xbe7   :  { %v10871_v38 = vpop.f32.mrb[103].mxu0  ;;  %10938 = vmatpush3.msk.msra.mxu0 %vm831_vm2, %v7693_v0 }
 0xbe8   :  { %10940 = vmatmul.mubr.msk.f32.vlgmr.msra.gmra.mrb[110].mxu0 %vm827_vm3, %v13278_v1 }
 0xbeb   :  { %v7763_v18 = vpop.f32.mrb[102].mxu1 }
 0xbec   :  { %v10906_v19 = vpop.f32.mrb[103].mxu1  ;;  %10943 = vmatpush3.msk.msra.mxu1 %vm831_vm2, %v7763_v18 }
 0xbed   :  { %10945 = vmatmul.mubr.msk.f32.vlgmr.msra.gmra.mrb[110].mxu1 %vm827_vm3, %v13284_v45 }
 0xc5a   :  { %v7836_v33 = vpop.f32.mrb[104].mxu0 }
 0xc5b   :  { %v8351_v11 = vmul.f32 0.85, %v7836_v33  ;;  %v10911_v63 = vpop.f32.mrb[105].mxu0 }
 0xc5d   :  { %v8359_v12 = vadd.f32 %v13761_v37, %v8351_v11 }
 0xc5e   :  { %v7909_v20 = vpop.f32.mrb[104].mxu1 }
 0xc5f   :  { %v8367_v22 = vmax.f32 %v8359_v12, 0.0  ;;  %v8352_v44 = vmul.f32 0.85, %v7909_v20  ;;  %v10916_v53 = vpop.f32.mrb[105].mxu1 }
 0xc61   :  { %v8375_v46 = vsel %vm831_vm2, %v8367_v22, 0.0  ;;  %v8360_v1 = vadd.f32 %v13761_v37, %v8352_v44 }
 0xc62   :  { %v8376_v61 = vrot.slane %v8375_v46, 4 }
 0xc63   :  { %v8368_v54 = vmax.f32 %v8360_v1, 0.0 }
 0xc64   :  { %v8377_v9 = vadd.f32 %v8376_v61, %v8375_v46 }
 0xc65   :  { %v8382_v42 = vsel %vm831_vm2, %v8368_v54, 0.0 }
 0xc66   :  { %v8378_v34 = vrot.slane %v8377_v9, 2  ;;  %v8383_v45 = vrot.slane %v8382_v42, 4 }
 0xc68   :  { %v8379_v43 = vadd.f32 %v8378_v34, %v8377_v9  ;;  %v8384_v60 = vadd.f32 %v8383_v45, %v8382_v42 }
 0xc6a   :  { %v8380_v29 = vrot.slane %v8379_v43, 1  ;;  %v8385_v5 = vrot.slane %v8384_v60, 2 }
 0xc6c   :  { %v8381_v48 = vadd.f32 %v8380_v29, %v8379_v43  ;;  %v8386_v50 = vadd.f32 %v8385_v5, %v8384_v60 }
 0xc6e   :  { %v8431_v24 = vmul.f32 0.2, %v8381_v48  ;;  %v8387_v40 = vrot.slane %v8386_v50, 1 }
 0xc70   :  { %v8439_v4 = vadd.f32 1e-06, %v8431_v24  ;;  %v8388_v31 = vadd.f32 %v8387_v40, %v8386_v50 }
 0xc72   :  { %12014 = vrcp.f32 %v8439_v4  ;;  %v8432_v32 = vmul.f32 0.2, %v8388_v31 }
 0xc74   :  { %v8440_v59 = vadd.f32 1e-06, %v8432_v32 }
 0xc76   :  { %12016 = vrcp.f32 %v8440_v59 }
 0xc7b   :  { %v7982_v15 = vpop.f32.mrb[106].mxu0 }
 0xc7c   :  { %v12015_v25 = vpop.eup %12014  ;;  %v8353_v3 = vmul.f32 0.85, %v7982_v15  ;;  %v10921_v36 = vpop.f32.mrb[107].mxu0 }
 0xc7d   :  { %v8448_v10 = vmul.f32 %v12015_v25, %v8367_v22 }
 0xc7e   :  { %v8361_v39 = vadd.f32 %v13761_v37, %v8353_v3 }
 0xc7f   :  { %v8471_v2 = vand.u32 2147483647, %v8448_v10 }
 0xc80   :  { %v8369_v56 = vmax.f32 %v8361_v39, 0.0  ;;  %v8055_v17 = vpop.f32.mrb[106].mxu1  ;;  %v12017_v7 = vpop.eup %12016 }
 0xc81   :  { %v8479_v6 = vsub.f32 0.0, %v8471_v2  ;;  %v8354_v52 = vmul.f32 0.85, %v8055_v17  ;;  %v10926_v14 = vpop.f32.mrb[107].mxu1  ;;  %v8450_v28 = vmul.f32 %v12017_v7, %v8368_v54  ;;  %v8463_v54 = vmax.f32 %v8448_v10, 0.0 }
 0xc82   :  { %v8389_v13 = vsel %vm831_vm2, %v8369_v56, 0.0 }
 0xc83   :  { %v8487_v8 = vmul.f32 1.442695, %v8479_v6  ;;  %v8390_v58 = vrot.slane %v8389_v13, 4  ;;  %v8362_v51 = vadd.f32 %v13761_v37, %v8354_v52  ;;  %v8472_v35 = vand.u32 2147483647, %v8450_v28 }
 0xc84   :  { %v8464_v4 = vmax.f32 %v8450_v28, 0.0 }
 0xc85   :  { %12018 = vpow2.f32 %v8487_v8  ;;  %v8391_v30 = vadd.f32 %v8390_v58, %v8389_v13  ;;  %v8370_v41 = vmax.f32 %v8362_v51, 0.0  ;;  %v8480_v21 = vsub.f32 0.0, %v8472_v35 }
 0xc87   :  { %v8392_v55 = vrot.slane %v8391_v30, 2  ;;  %v8396_v16 = vsel %vm831_vm2, %v8370_v41, 0.0  ;;  %v8489_v27 = vmul.f32 1.442695, %v8480_v21 }
 0xc88   :  { %v8397_v23 = vrot.slane %v8396_v16, 4 }
 0xc89   :  { %v8393_v57 = vadd.f32 %v8392_v55, %v8391_v30  ;;  %12020 = vpow2.f32 %v8489_v27 }
 0xc8a   :  { %v8398_v26 = vadd.f32 %v8397_v23, %v8396_v16 }
 0xc8b   :  { %v8394_v47 = vrot.slane %v8393_v57, 1 }
 0xc8c   :  { %v8399_v62 = vrot.slane %v8398_v26, 2 }
 0xc8d   :  { %v8395_v49 = vadd.f32 %v8394_v47, %v8393_v57 }
 0xc8e   :  { %v8400_v0 = vadd.f32 %v8399_v62, %v8398_v26 }
 0xc8f   :  { %v12019_v38 = vpop.eup %12018  ;;  %v8433_v18 = vmul.f32 0.2, %v8395_v49 }
 0xc90   :  { %v8503_v19 = vadd.f32 1.0, %v12019_v38  ;;  %v8401_v33 = vrot.slane %v8400_v0, 1 }
 0xc91   :  { %v8441_v11 = vadd.f32 1e-06, %v8433_v18 }
 0xc92   :  { %12022 = vlog2.f32 %v8503_v19  ;;  %v8402_v63 = vadd.f32 %v8401_v33, %v8400_v0 }
 0xc93   :  { %12024 = vrcp.f32 %v8441_v11  ;;  %v12021_v12 = vpop.eup %12020 }
 0xc94   :  { %v8434_v22 = vmul.f32 0.2, %v8402_v63  ;;  %v8504_v20 = vadd.f32 1.0, %v12021_v12 }
 0xc96   :  { %v8442_v44 = vadd.f32 1e-06, %v8434_v22  ;;  %12026 = vlog2.f32 %v8504_v20 }
 0xc98   :  { %12028 = vrcp.f32 %v8442_v44 }
 0xc9b   :  { %v8128_v53 = vpop.f32.mrb[108].mxu0 }
 0xc9c   :  { %v12023_v46 = vpop.eup %12022  ;;  %v8355_v61 = vmul.f32 0.85, %v8128_v53  ;;  %v10931_v1 = vpop.f32.mrb[109].mxu0 }
 0xc9d   :  { %v12025_v9 = vpop.eup %12024  ;;  %v8512_v34 = vmul.f32 0.6931472, %v12023_v46 }
 0xc9e   :  { %v8452_v42 = vmul.f32 %v12025_v9, %v8369_v56  ;;  %v8363_v45 = vadd.f32 %v13761_v37, %v8355_v61 }
 0xc9f   :  { %v8527_v43 = vadd.f32 %v8512_v34, %v8463_v54 }
 0xca0   :  { %v8473_v60 = vand.u32 2147483647, %v8452_v42  ;;  %v8371_v29 = vmax.f32 %v8363_v45, 0.0  ;;  %v8201_v5 = vpop.f32.mrb[108].mxu1  ;;  %v12027_v48 = vpop.eup %12026  ;;  %v8465_v19 = vmax.f32 %v8452_v42, 0.0 }
 0xca1   :  { %8535 = vst [vmem:[%s14028_s14] sm:$0x1f] %v8527_v43  ;;  %v8356_v50 = vmul.f32 0.85, %v8201_v5  ;;  %v10936_v24 = vpop.f32.mrb[109].mxu1  ;;  %v8514_v31 = vmul.f32 0.6931472, %v12027_v48 }
 0xca2   :  { %v12029_v40 = vpop.eup %12028  ;;  %v8481_v32 = vsub.f32 0.0, %v8473_v60  ;;  %v8403_v59 = vsel %vm831_vm2, %v8371_v29, 0.0 }
 0xca3   :  { %v8454_v15 = vmul.f32 %v12029_v40, %v8370_v41  ;;  %v8404_v25 = vrot.slane %v8403_v59, 4  ;;  %v8364_v3 = vadd.f32 %v13761_v37, %v8356_v50  ;;  %v8528_v36 = vadd.f32 %v8514_v31, %v8464_v4 }
 0xca4   :  { %v8491_v10 = vmul.f32 1.442695, %v8481_v32 }
 0xca5   :  { %v8474_v39 = vand.u32 2147483647, %v8454_v15  ;;  %v8405_v2 = vadd.f32 %v8404_v25, %v8403_v59  ;;  %v8372_v56 = vmax.f32 %v8364_v3, 0.0  ;;  %8536 = vst [vmem:[%s14028_s14 + $0x8] sm:$0x1f] %v8528_v36  ;;  %v8466_v1 = vmax.f32 %v8454_v15, 0.0 }
 0xca6   :  { %12030 = vpow2.f32 %v8491_v10 }
 0xca7   :  { %v8482_v17 = vsub.f32 0.0, %v8474_v39  ;;  %v8406_v7 = vrot.slane %v8405_v2, 2  ;;  %v8410_v6 = vsel %vm831_vm2, %v8372_v56, 0.0 }
 0xca8   :  { %v8411_v52 = vrot.slane %v8410_v6, 4 }
 0xca9   :  { %v8493_v14 = vmul.f32 1.442695, %v8482_v17  ;;  %v8407_v28 = vadd.f32 %v8406_v7, %v8405_v2 }
 0xcaa   :  { %v8412_v13 = vadd.f32 %v8411_v52, %v8410_v6 }
 0xcab   :  { %12032 = vpow2.f32 %v8493_v14  ;;  %v8408_v8 = vrot.slane %v8407_v28, 1 }
 0xcac   :  { %v8413_v58 = vrot.slane %v8412_v13, 2 }
 0xcad   :  { %v8409_v51 = vadd.f32 %v8408_v8, %v8407_v28 }
 0xcae   :  { %v8414_v35 = vadd.f32 %v8413_v58, %v8412_v13 }
 0xcaf   :  { %v8435_v30 = vmul.f32 0.2, %v8409_v51 }
 0xcb0   :  { %v12031_v41 = vpop.eup %12030  ;;  %v8415_v21 = vrot.slane %v8414_v35, 1 }
 0xcb1   :  { %v8505_v55 = vadd.f32 1.0, %v12031_v41  ;;  %v8443_v16 = vadd.f32 1e-06, %v8435_v30 }
 0xcb2   :  { %v8416_v27 = vadd.f32 %v8415_v21, %v8414_v35 }
 0xcb3   :  { %12034 = vlog2.f32 %v8505_v55 }
 0xcb4   :  { %12036 = vrcp.f32 %v8443_v16  ;;  %v8436_v23 = vmul.f32 0.2, %v8416_v27 }
 0xcb5   :  { %v12033_v57 = vpop.eup %12032 }
 0xcb6   :  { %v8506_v26 = vadd.f32 1.0, %v12033_v57  ;;  %v8444_v47 = vadd.f32 1e-06, %v8436_v23 }
 0xcb8   :  { %12038 = vlog2.f32 %v8506_v26 }
 0xcb9   :  { %12040 = vrcp.f32 %v8444_v47 }
 0xcbb   :  { %v8274_v62 = vpop.f32.mrb[110].mxu0 }
 0xcbc   :  { %v8357_v49 = vmul.f32 0.85, %v8274_v62  ;;  %v10941_v0 = vpop.f32.mrb[111].mxu0 }
 0xcbd   :  { %v12035_v38 = vpop.eup %12034 }
 0xcbe   :  { %v12037_v18 = vpop.eup %12036  ;;  %v8516_v33 = vmul.f32 0.6931472, %v12035_v38  ;;  %v8365_v11 = vadd.f32 %v13761_v37, %v8357_v49 }
 0xcbf   :  { %v8456_v63 = vmul.f32 %v12037_v18, %v8371_v29 }
 0xcc0   :  { %v8529_v12 = vadd.f32 %v8516_v33, %v8465_v19  ;;  %v8373_v22 = vmax.f32 %v8365_v11, 0.0  ;;  %v8347_v20 = vpop.f32.mrb[110].mxu1 }
 0xcc1   :  { %v8475_v44 = vand.u32 2147483647, %v8456_v63  ;;  %v8358_v53 = vmul.f32 0.85, %v8347_v20  ;;  %v10946_v46 = vpop.f32.mrb[111].mxu1  ;;  %v8467_v35 = vmax.f32 %v8456_v63, 0.0 }
 0xcc2   :  { %v12039_v61 = vpop.eup %12038  ;;  %8537 = vst [vmem:[%s14028_s14 + $0x10] sm:$0x1f] %v8529_v12  ;;  %v8417_v9 = vsel %vm831_vm2, %v8373_v22, 0.0 }
 0xcc3   :  { %v12041_v54 = vpop.eup %12040  ;;  %v8518_v34 = vmul.f32 0.6931472, %v12039_v61  ;;  %v8483_v42 = vsub.f32 0.0, %v8475_v44  ;;  %v8418_v45 = vrot.slane %v8417_v9, 4  ;;  %v8366_v43 = vadd.f32 %v13761_v37, %v8358_v53 }
 0xcc4   :  { %v8458_v60 = vmul.f32 %v12041_v54, %v8372_v56 }
 0xcc5   :  { %v8530_v29 = vadd.f32 %v8518_v34, %v8466_v1  ;;  %v8495_v5 = vmul.f32 1.442695, %v8483_v42  ;;  %v8419_v48 = vadd.f32 %v8418_v45, %v8417_v9  ;;  %v8374_v50 = vmax.f32 %v8366_v43, 0.0 }
 0xcc6   :  { %v8476_v24 = vand.u32 2147483647, %v8458_v60  ;;  %v8468_v57 = vmax.f32 %v8458_v60, 0.0 }
 0xcc7   :  { %8538 = vst [vmem:[%s14028_s14 + $0x18] sm:$0x1f] %v8530_v29  ;;  %12042 = vpow2.f32 %v8495_v5  ;;  %v8420_v40 = vrot.slane %v8419_v48, 2  ;;  %v8424_v4 = vsel %vm831_vm2, %v8374_v50, 0.0 }
 0xcc8   :  { %v8484_v31 = vsub.f32 0.0, %v8476_v24  ;;  %v8425_v32 = vrot.slane %v8424_v4, 4 }
 0xcc9   :  { %v8421_v59 = vadd.f32 %v8420_v40, %v8419_v48 }
 0xcca   :  { %v8497_v15 = vmul.f32 1.442695, %v8484_v31  ;;  %v8426_v25 = vadd.f32 %v8425_v32, %v8424_v4 }
 0xccb   :  { %v8422_v37 = vrot.slane %v8421_v59, 1 }
 0xccc   :  { %12044 = vpow2.f32 %v8497_v15  ;;  %v8427_v3 = vrot.slane %v8426_v25, 2 }
 0xccd   :  { %v8423_v36 = vadd.f32 %v8422_v37, %v8421_v59 }
 0xcce   :  { %v8428_v10 = vadd.f32 %v8427_v3, %v8426_v25 }
 0xccf   :  { %v8437_v39 = vmul.f32 0.2, %v8423_v36 }
 0xcd0   :  { %v8429_v2 = vrot.slane %v8428_v10, 1 }
 0xcd1   :  { %v12043_v56 = vpop.eup %12042  ;;  %v8445_v17 = vadd.f32 1e-06, %v8437_v39 }
 0xcd2   :  { %v8507_v7 = vadd.f32 1.0, %v12043_v56  ;;  %v8430_v6 = vadd.f32 %v8429_v2, %v8428_v10 }
 0xcd3   :  { %12046 = vrcp.f32 %v8445_v17 }
 0xcd4   :  { %12048 = vlog2.f32 %v8507_v7  ;;  %v8438_v52 = vmul.f32 0.2, %v8430_v6 }
 0xcd6   :  { %v12045_v14 = vpop.eup %12044  ;;  %v8446_v28 = vadd.f32 1e-06, %v8438_v52 }
 0xcd7   :  { %v8508_v13 = vadd.f32 1.0, %v12045_v14 }
 0xcd8   :  { %12050 = vrcp.f32 %v8446_v28 }
 0xcd9   :  { %12052 = vlog2.f32 %v8508_v13 }
 0xcdd   :  { %v12047_v8 = vpop.eup %12046 }
 0xcde   :  { %v12049_v58 = vpop.eup %12048  ;;  %v8460_v51 = vmul.f32 %v12047_v8, %v8373_v22 }
 0xcdf   :  { %v8520_v30 = vmul.f32 0.6931472, %v12049_v58 }
 0xce0   :  { %v8477_v41 = vand.u32 2147483647, %v8460_v51  ;;  %v8469_v12 = vmax.f32 %v8460_v51, 0.0 }
 0xce1   :  { %v8531_v21 = vadd.f32 %v8520_v30, %v8467_v35 }
 0xce2   :  { %v12051_v55 = vpop.eup %12050  ;;  %v8485_v16 = vsub.f32 0.0, %v8477_v41 }
 0xce3   :  { %v12053_v27 = vpop.eup %12052  ;;  %8539 = vst [vmem:[%s14028_s14 + $0x20] sm:$0x1f] %v8531_v21  ;;  %v8462_v23 = vmul.f32 %v12051_v55, %v8374_v50 }
 0xce4   :  { %v8522_v26 = vmul.f32 0.6931472, %v12053_v27  ;;  %v8499_v47 = vmul.f32 1.442695, %v8485_v16 }
 0xce5   :  { %v8478_v62 = vand.u32 2147483647, %v8462_v23  ;;  %v8470_v53 = vmax.f32 %v8462_v23, 0.0 }
 0xce6   :  { %v8532_v49 = vadd.f32 %v8522_v26, %v8468_v57  ;;  %12054 = vpow2.f32 %v8499_v47 }
 0xce7   :  { %v8486_v0 = vsub.f32 0.0, %v8478_v62 }
 0xce8   :  { %8540 = vst [vmem:[%s14028_s14 + $0x28] sm:$0x1f] %v8532_v49 }
 0xce9   :  { %v8501_v38 = vmul.f32 1.442695, %v8486_v0 }
 0xceb   :  { %12056 = vpow2.f32 %v8501_v38 }
 0xcf0   :  { %v12055_v18 = vpop.eup %12054 }
 0xcf1   :  { %v8509_v19 = vadd.f32 1.0, %v12055_v18 }
 0xcf3   :  { %12058 = vlog2.f32 %v8509_v19 }
 0xcf5   :  { %v12057_v33 = vpop.eup %12056 }
 0xcf6   :  { %v8510_v11 = vadd.f32 1.0, %v12057_v33 }
 0xcf8   :  { %12060 = vlog2.f32 %v8510_v11 }
 0xcfd   :  { %v12059_v63 = vpop.eup %12058 }
 0xcfe   :  { %v8524_v22 = vmul.f32 0.6931472, %v12059_v63 }
 0xd00   :  { %v8533_v20 = vadd.f32 %v8524_v22, %v8469_v12 }
 0xd02   :  { %v12061_v44 = vpop.eup %12060  ;;  %8541 = vst [vmem:[%s14028_s14 + $0x30] sm:$0x1f] %v8533_v20 }
 0xd03   :  { %v8526_v46 = vmul.f32 0.6931472, %v12061_v44 }
 0xd05   :  { %v8534_v61 = vadd.f32 %v8526_v46, %v8470_v53 }
 0xd07   :  { %8542 = vst [vmem:[%s14028_s14 + $0x38] sm:$0x1f] %v8534_v61 }

</bundles_post_ra>
